<compile_context>
chip_gen: v5e
topology: v5e:2x2
jax: 0.10.0
libtpu: 0.0.40
codegen_flags: <defaults>
</compile_context>

<pallas_src>
import jax
import jax.numpy as jnp
from jax.experimental import pallas as pl
from jax.experimental.pallas import tpu as pltpu

# ---------------- configuration (small, consistent with the module) ----------
D_Y = 7          # y feature dim == decoder output_dim (7 in the module)
D_X = 4          # x (time-feature) dim
D_MODEL = 32     # embedding dim == LSTM input_dim
HIDDEN = 32      # LSTM hidden_dim
BATCH = 4
CTX_LEN = 10
TGT_LEN = 8      # pred_len

# ---------------- packed weight slab layout -----------------------------------
# Every block starts on an 8-sublane boundary so in-kernel static slices are
# tile-aligned. Lane width is 4*HIDDEN = 128 (fc blocks use lanes [0, 7)).
_BLOCK_ROWS = (
    ("e_wy0", 8), ("e_wx0", 8), ("e_b0", 8),
    ("e_whh0", HIDDEN), ("e_wih1", HIDDEN), ("e_whh1", HIDDEN), ("e_b1", 8),
    ("d_wy0", 8), ("d_wx0", 8), ("d_b0", 8),
    ("d_whh0", HIDDEN), ("d_wih1", HIDDEN), ("d_whh1", HIDDEN), ("d_b1", 8),
    ("fc_w", HIDDEN), ("fc_b", 8),
)
_OFF = {}
_row = 0
for _name, _rows in _BLOCK_ROWS:
    _OFF[_name] = _row
    _row += _rows
W_ROWS = _row          # 296 rows x 128 lanes x f32  ~= 148 KiB


# ---------------- in-kernel helpers -------------------------------------------
def _gate_act(gates, g_mask):
    """Gate nonlinearities on the full (1, 4H) vreg.

    sigmoid on the i/f/o lanes, tanh on the g lanes via tanh(x)=2*sigmoid(2x)-1,
    so there is a single EUP push per step instead of 4 partial-lane pushes."""
    pre = jnp.where(g_mask, gates * 2.0, gates)
    s = jax.nn.sigmoid(pre)
    return jnp.where(g_mask, 2.0 * s - 1.0, s)


def _cell_update(act, c, H):
    """Split the activated (1, 4H) gates only for the tiny elementwise update."""
    i = act[:, 0 * H:1 * H]
    f = act[:, 1 * H:2 * H]
    g = act[:, 2 * H:3 * H]
    o = act[:, 3 * H:4 * H]
    c_new = f * c + i * g
    h_new = o * jnp.tanh(c_new)
    return h_new, c_new


# ---------------- fused Pallas kernel ------------------------------------------
def _seq2seq_kernel(yc_ref, xc_ref, ty_ref, tx_ref, w_ref, out_ref,
                    xprojd_ref, h1buf_ref):
    H = HIDDEN
    G = 4 * H
    Bc, Tc, _ = yc_ref.shape
    Tt = TGT_LEN
    nb = h1buf_ref.shape[0] // Tt          # B - 1 decoder batch iterations
    DY = out_ref.shape[1]

    # lane mask selecting the "g" gate lanes [2H, 3H) of a (1, 4H) vreg
    lane = jax.lax.broadcasted_iota(jnp.int32, (1, G), 1)
    g_mask = (lane >= 2 * H) & (lane < 3 * H)

    def wslab(name, rows):
        off = _OFF[name]
        return w_ref[off:off + rows, :]

    # ---------------- encoder: 2-layer LSTM, zero init state ------------------
    # Only the last context sample's state survives the reference loop
    # (the encoder is called with zero-init (h, c) for every sample).
    e_wy0 = wslab("e_wy0", D_Y)
    e_wx0 = wslab("e_wx0", D_X)
    e_b0 = wslab("e_b0", 1)
    e_whh0 = wslab("e_whh0", H)
    e_wih1 = wslab("e_wih1", H)
    e_whh1 = wslab("e_whh1", H)
    e_b1 = wslab("e_b1", 1)

    cy = yc_ref[Bc - 1]                    # (Tc, D_Y) last context sample
    cx = xc_ref[Bc - 1]                    # (Tc, D_X)
    # hoisted (embedding + layer-0 input) projection for the whole context seq
    xproj_e = (jnp.dot(cy, e_wy0, preferred_element_type=jnp.float32)
               + jnp.dot(cx, e_wx0, preferred_element_type=jnp.float32)
               + e_b0)

    h0 = jnp.zeros((1, H), jnp.float32)
    c0 = jnp.zeros((1, H), jnp.float32)
    h1 = jnp.zeros((1, H), jnp.float32)
    c1 = jnp.zeros((1, H), jnp.float32)
    for t in range(Tc):                    # static unroll: Tc is small & static
        # recurrent-only dot for layer-1: independent of this step's layer-0,
        # so the scheduler overlaps it with the layer-0 chain.
        rec1 = jnp.dot(h1, e_whh1, preferred_element_type=jnp.float32)
        g0 = xproj_e[t:t + 1, :] + jnp.dot(h0, e_whh0,
                                           preferred_element_type=jnp.float32)
        h0, c0 = _cell_update(_gate_act(g0, g_mask), c0, H)
        g1 = jnp.dot(h0, e_wih1, preferred_element_type=jnp.float32) + rec1 + e_b1
        h1, c1 = _cell_update(_gate_act(g1, g_mask), c1, H)

    # ---------------- decoder: carries h/c across the batch loop --------------
    d_wy0 = wslab("d_wy0", D_Y)
    d_wx0 = wslab("d_wx0", D_X)
    d_b0 = wslab("d_b0", 1)
    d_whh0 = wslab("d_whh0", H)
    d_wih1 = wslab("d_wih1", H)
    d_whh1 = wslab("d_whh1", H)
    d_b1 = wslab("d_b1", 1)

    # Batched layer-0 input projection for ALL decoder steps (off the serial
    # recurrence path): one ((B-1)*Tt, .) matmul into VMEM scratch.
    xprojd_ref[...] = (jnp.dot(ty_ref[...], d_wy0,
                               preferred_element_type=jnp.float32)
                       + jnp.dot(tx_ref[...], d_wx0,
                                 preferred_element_type=jnp.float32)
                       + d_b0)

    # outputs[0] stays at -1 exactly as in the reference forward()
    out_ref[0:Tt, :] = jnp.full((Tt, DY), -1.0, jnp.float32)

    def batch_body(b, carry):
        h0, c0, h1, c1 = carry
        row0 = pl.multiple_of(b * Tt, Tt)                  # aligned tile offset
        xb = xprojd_ref[pl.ds(row0, Tt), :]                # (Tt, 4H)
        rows = []
        for t in range(Tt):                                # static unroll
            rec1 = jnp.dot(h1, d_whh1, preferred_element_type=jnp.float32)
            g0 = xb[t:t + 1, :] + jnp.dot(h0, d_whh0,
                                          preferred_element_type=jnp.float32)
            h0, c0 = _cell_update(_gate_act(g0, g_mask), c0, H)
            g1 = (jnp.dot(h0, d_wih1, preferred_element_type=jnp.float32)
                  + rec1 + d_b1)
            h1, c1 = _cell_update(_gate_act(g1, g_mask), c1, H)
            rows.append(h1)
        # one aligned (Tt, H) store per batch instead of Tt masked row stores
        h1buf_ref[pl.ds(row0, Tt), :] = jnp.concatenate(rows, axis=0)
        return h0, c0, h1, c1

    # fori_loop (not a Python for) bounds vreg live ranges across batches; the
    # h/c carry already serializes batches, so no overlap is lost.
    jax.lax.fori_loop(0, nb, batch_body, (h0, c0, h1, c1))

    # fc projection of ALL (B-1)*Tt top-layer hidden states: one matmul + one
    # contiguous store (fc weights loaded only now to keep them out of the
    # decoder loop's live set).
    wfc = wslab("fc_w", H)          # (H, 128), lanes [0, DY) valid
    bfc = wslab("fc_b", 1)
    fc = jnp.dot(h1buf_ref[...], wfc, preferred_element_type=jnp.float32) + bfc
    out_ref[Tt:, :] = fc[:, :DY]


# ---------------- pallas_call wrapper ------------------------------------------
def lstm_seq2seq_forward(x_context, y_context, x_target, y_target,
                         teacher_forcing_prob, params):
    del teacher_forcing_prob          # ignored by the reference forward as well
    B, Tt, _ = y_target.shape
    # Only target samples 0..B-2 are ever consumed by the decoder; flatten them
    # so the kernel does ONE batched layer-0 projection (trivial fused copy).
    ty = y_target[:B - 1].reshape((B - 1) * Tt, D_Y)
    tx = x_target[:B - 1].reshape((B - 1) * Tt, D_X)

    out2d = pl.pallas_call(
        _seq2seq_kernel,
        out_shape=jax.ShapeDtypeStruct((B * Tt, D_Y), jnp.float32),
        in_specs=[pl.BlockSpec(memory_space=pltpu.MemorySpace.VMEM)] * 5,
        out_specs=pl.BlockSpec(memory_space=pltpu.MemorySpace.VMEM),
        scratch_shapes=[
            pltpu.VMEM(((B - 1) * Tt, 4 * HIDDEN), jnp.float32),   # xproj_d
            pltpu.VMEM(((B - 1) * Tt, HIDDEN), jnp.float32),       # h1 buffer
        ],
    )(y_context, x_context, ty, tx, params["w_packed"])
    return out2d.reshape(B, Tt, D_Y)


# ---------------- parameters (deterministic, PyTorch-shaped, then folded) -----
def _lstm_layer_params(key, in_dim, hidden):
    ks = jax.random.split(key, 4)
    s = 1.0 / float(hidden) ** 0.5
    w_ih = jax.random.uniform(ks[0], (4 * hidden, in_dim), jnp.float32, -s, s)
    w_hh = jax.random.uniform(ks[1], (4 * hidden, hidden), jnp.float32, -s, s)
    b_ih = jax.random.uniform(ks[2], (4 * hidden,), jnp.float32, -s, s)
    b_hh = jax.random.uniform(ks[3], (4 * hidden,), jnp.float32, -s, s)
    return w_ih, w_hh, b_ih + b_hh


def init_params(key):
    ks = jax.random.split(key, 7)
    e_wih0, e_whh0, e_b0 = _lstm_layer_params(ks[0], D_MODEL, HIDDEN)
    e_wih1, e_whh1, e_b1 = _lstm_layer_params(ks[1], HIDDEN, HIDDEN)
    d_wih0, d_whh0, d_b0 = _lstm_layer_params(ks[2], D_MODEL, HIDDEN)
    d_wih1, d_whh1, d_b1 = _lstm_layer_params(ks[3], HIDDEN, HIDDEN)
    s = 1.0 / float(HIDDEN) ** 0.5
    w_fc = jax.random.uniform(ks[4], (D_Y, HIDDEN), jnp.float32, -s, s)
    b_fc = jax.random.uniform(ks[5], (D_Y,), jnp.float32, -s, s)
    # TODO(synk): stand-in for SpacetimeformerEmbedding (class not provided):
    # a linear map of concat(y, x) -> d_model, folded into layer-0 below.
    w_emb = jax.random.normal(ks[6], (D_Y + D_X, D_MODEL), jnp.float32) * 0.1
    b_emb = jnp.zeros((D_MODEL,), jnp.float32)

    def fold(w_ih0, b0):
        # emb @ W_ih0.T == concat(y,x) @ (W_emb @ W_ih0.T) + b_emb @ W_ih0.T
        w_comb = w_emb @ w_ih0.T                       # (D_Y + D_X, 4H)
        b_comb = b_emb @ w_ih0.T + b0                  # (4H,)
        return w_comb[:D_Y], w_comb[D_Y:], b_comb

    e_wy0, e_wx0, e_b0c = fold(e_wih0, e_b0)
    d_wy0, d_wx0, d_b0c = fold(d_wih0, d_b0)

    blocks = {
        "e_wy0": e_wy0, "e_wx0": e_wx0, "e_b0": e_b0c.reshape(1, -1),
        "e_whh0": e_whh0.T, "e_wih1": e_wih1.T, "e_whh1": e_whh1.T,
        "e_b1": e_b1.reshape(1, -1),
        "d_wy0": d_wy0, "d_wx0": d_wx0, "d_b0": d_b0c.reshape(1, -1),
        "d_whh0": d_whh0.T, "d_wih1": d_wih1.T, "d_whh1": d_whh1.T,
        "d_b1": d_b1.reshape(1, -1),
        "fc_w": w_fc.T, "fc_b": b_fc.reshape(1, -1),
    }
    w_packed = jnp.zeros((W_ROWS, 4 * HIDDEN), jnp.float32)
    for name, a in blocks.items():
        a = jnp.asarray(a, jnp.float32)
        off = _OFF[name]
        w_packed = w_packed.at[off:off + a.shape[0], :a.shape[1]].set(a)
    return {"w_packed": w_packed}


# ---------------- demo ---------------------------------------------------------
if __name__ == "__main__":
    key = jax.random.PRNGKey(0)
    ks = jax.random.split(key, 5)
    x_context = jax.random.normal(ks[0], (BATCH, CTX_LEN, D_X), jnp.float32)
    y_context = jax.random.normal(ks[1], (BATCH, CTX_LEN, D_Y), jnp.float32)
    x_target = jax.random.normal(ks[2], (BATCH, TGT_LEN, D_X), jnp.float32)
    y_target = jax.random.normal(ks[3], (BATCH, TGT_LEN, D_Y), jnp.float32)

    params = init_params(ks[4])

    fwd = jax.jit(lstm_seq2seq_forward)
    out = fwd(x_context, y_context, x_target, y_target, 0.0, params)
    out = jax.block_until_ready(out)

    assert out.shape == (BATCH, TGT_LEN, D_Y) and out.dtype == jnp.float32
    assert bool(jnp.all(out[0] == -1.0))      # reference leaves outputs[0] = -1
    assert bool(jnp.all(jnp.isfinite(out)))
    print("KERNEL_OK")
</pallas_src>

<mosaic_0001>
module attributes {stable_mosaic.version = 11 : i64} {
  func.func @_seq2seq_kernel(%arg0: memref<4x10x7xf32, #tpu.memory_space<vmem>>, %arg1: memref<4x10x4xf32, #tpu.memory_space<vmem>>, %arg2: memref<24x7xf32, #tpu.memory_space<vmem>>, %arg3: memref<24x4xf32, #tpu.memory_space<vmem>>, %arg4: memref<296x128xf32, #tpu.memory_space<vmem>>, %arg5: memref<32x7xf32, #tpu.memory_space<vmem>>, %arg6: memref<24x128xf32, #tpu.memory_space<vmem>>, %arg7: memref<24x32xf32, #tpu.memory_space<vmem>>) attributes {dimension_semantics = [], scalar_prefetch = 0 : i64, scratch_operands = 2 : i64, tpu.core_type = #tpu.core_type<tc>} {
    %0 = tpu.iota {dimensions = array<i32: 1>} : vector<1x128xi32>
    %c64_i32 = arith.constant 64 : i32
    %1 = vector.broadcast %c64_i32 : i32 to vector<1x128xi32>
    %2 = arith.cmpi sge, %0, %1 : vector<1x128xi32>
    %c96_i32 = arith.constant 96 : i32
    %3 = vector.broadcast %c96_i32 : i32 to vector<1x128xi32>
    %4 = arith.cmpi slt, %0, %3 : vector<1x128xi32>
    %5 = arith.andi %2, %4 : vector<1x128xi1>
    %c0 = arith.constant 0 : index
    %c0_0 = arith.constant 0 : index
    %6 = vector.load %arg4[%c0, %c0_0] : memref<296x128xf32, #tpu.memory_space<vmem>>, vector<7x128xf32>
    %c8 = arith.constant 8 : index
    %c0_1 = arith.constant 0 : index
    %7 = vector.load %arg4[%c8, %c0_1] : memref<296x128xf32, #tpu.memory_space<vmem>>, vector<4x128xf32>
    %c16 = arith.constant 16 : index
    %c0_2 = arith.constant 0 : index
    %8 = vector.load %arg4[%c16, %c0_2] : memref<296x128xf32, #tpu.memory_space<vmem>>, vector<1x128xf32>
    %c24 = arith.constant 24 : index
    %c0_3 = arith.constant 0 : index
    %9 = vector.load %arg4[%c24, %c0_3] : memref<296x128xf32, #tpu.memory_space<vmem>>, vector<32x128xf32>
    %c56 = arith.constant 56 : index
    %c0_4 = arith.constant 0 : index
    %10 = vector.load %arg4[%c56, %c0_4] : memref<296x128xf32, #tpu.memory_space<vmem>>, vector<32x128xf32>
    %c88 = arith.constant 88 : index
    %c0_5 = arith.constant 0 : index
    %11 = vector.load %arg4[%c88, %c0_5] : memref<296x128xf32, #tpu.memory_space<vmem>>, vector<32x128xf32>
    %c120 = arith.constant 120 : index
    %c0_6 = arith.constant 0 : index
    %12 = vector.load %arg4[%c120, %c0_6] : memref<296x128xf32, #tpu.memory_space<vmem>>, vector<1x128xf32>
    %c3 = arith.constant 3 : index
    %c0_7 = arith.constant 0 : index
    %c0_8 = arith.constant 0 : index
    %13 = vector.load %arg0[%c3, %c0_7, %c0_8] : memref<4x10x7xf32, #tpu.memory_space<vmem>>, vector<1x10x7xf32>
    %14 = vector.shape_cast %13 : vector<1x10x7xf32> to vector<10x7xf32>
    %c3_9 = arith.constant 3 : index
    %c0_10 = arith.constant 0 : index
    %c0_11 = arith.constant 0 : index
    %15 = vector.load %arg1[%c3_9, %c0_10, %c0_11] : memref<4x10x4xf32, #tpu.memory_space<vmem>>, vector<1x10x4xf32>
    %16 = vector.shape_cast %15 : vector<1x10x4xf32> to vector<10x4xf32>
    %cst = arith.constant dense<0.000000e+00> : vector<10x128xf32>
    %17 = tpu.matmul %14, %6, %cst {dimension_numbers = #tpu.dot_dimension_numbers<[1], [0], [0], [1], [0, 0, 1, 1], [], []>} : vector<10x7xf32>, vector<7x128xf32>, vector<10x128xf32> -> vector<10x128xf32>
    %cst_12 = arith.constant dense<0.000000e+00> : vector<10x128xf32>
    %18 = tpu.matmul %16, %7, %cst_12 {dimension_numbers = #tpu.dot_dimension_numbers<[1], [0], [0], [1], [0, 0, 1, 1], [], []>} : vector<10x4xf32>, vector<4x128xf32>, vector<10x128xf32> -> vector<10x128xf32>
    %19 = arith.addf %17, %18 : vector<10x128xf32>
    %20 = vector.broadcast %8 : vector<1x128xf32> to vector<10x128xf32>
    %21 = arith.addf %19, %20 : vector<10x128xf32>
    %cst_13 = arith.constant 0.000000e+00 : f32
    %22 = vector.broadcast %cst_13 : f32 to vector<1x32xf32>
    %cst_14 = arith.constant 0.000000e+00 : f32
    %23 = vector.broadcast %cst_14 : f32 to vector<1x32xf32>
    %cst_15 = arith.constant 0.000000e+00 : f32
    %24 = vector.broadcast %cst_15 : f32 to vector<1x32xf32>
    %cst_16 = arith.constant 0.000000e+00 : f32
    %25 = vector.broadcast %cst_16 : f32 to vector<1x32xf32>
    %cst_17 = arith.constant dense<0.000000e+00> : vector<1x128xf32>
    %26 = tpu.matmul %24, %11, %cst_17 {dimension_numbers = #tpu.dot_dimension_numbers<[1], [0], [0], [1], [0, 0, 1, 1], [], []>} : vector<1x32xf32>, vector<32x128xf32>, vector<1x128xf32> -> vector<1x128xf32>
    %27 = vector.extract_strided_slice %21 {offsets = [0, 0], sizes = [1, 128], strides = [1, 1]} : vector<10x128xf32> to vector<1x128xf32>
    %cst_18 = arith.constant dense<0.000000e+00> : vector<1x128xf32>
    %28 = tpu.matmul %22, %9, %cst_18 {dimension_numbers = #tpu.dot_dimension_numbers<[1], [0], [0], [1], [0, 0, 1, 1], [], []>} : vector<1x32xf32>, vector<32x128xf32>, vector<1x128xf32> -> vector<1x128xf32>
    %29 = arith.addf %27, %28 : vector<1x128xf32>
    %cst_19 = arith.constant 2.000000e+00 : f32
    %30 = vector.broadcast %cst_19 : f32 to vector<1x128xf32>
    %31 = arith.mulf %29, %30 : vector<1x128xf32>
    %32 = arith.select %5, %31, %29 : vector<1x128xi1>, vector<1x128xf32>
    %33 = arith.negf %32 : vector<1x128xf32>
    %34 = math.exp %33 : vector<1x128xf32>
    %cst_20 = arith.constant 1.000000e+00 : f32
    %35 = vector.broadcast %cst_20 : f32 to vector<1x128xf32>
    %36 = arith.addf %35, %34 : vector<1x128xf32>
    %37 = arith.divf %35, %36 : vector<1x128xf32>
    %cst_21 = arith.constant 2.000000e+00 : f32
    %38 = vector.broadcast %cst_21 : f32 to vector<1x128xf32>
    %39 = arith.mulf %38, %37 : vector<1x128xf32>
    %cst_22 = arith.constant 1.000000e+00 : f32
    %40 = vector.broadcast %cst_22 : f32 to vector<1x128xf32>
    %41 = arith.subf %39, %40 : vector<1x128xf32>
    %42 = arith.select %5, %41, %37 : vector<1x128xi1>, vector<1x128xf32>
    %43 = vector.extract_strided_slice %42 {offsets = [0, 0], sizes = [1, 32], strides = [1, 1]} : vector<1x128xf32> to vector<1x32xf32>
    %44 = vector.extract_strided_slice %42 {offsets = [0, 32], sizes = [1, 32], strides = [1, 1]} : vector<1x128xf32> to vector<1x32xf32>
    %45 = vector.extract_strided_slice %42 {offsets = [0, 64], sizes = [1, 32], strides = [1, 1]} : vector<1x128xf32> to vector<1x32xf32>
    %46 = vector.extract_strided_slice %42 {offsets = [0, 96], sizes = [1, 32], strides = [1, 1]} : vector<1x128xf32> to vector<1x32xf32>
    %47 = arith.mulf %44, %23 : vector<1x32xf32>
    %48 = arith.mulf %43, %45 : vector<1x32xf32>
    %49 = arith.addf %47, %48 : vector<1x32xf32>
    %50 = math.tanh %49 : vector<1x32xf32>
    %51 = arith.mulf %46, %50 : vector<1x32xf32>
    %cst_23 = arith.constant dense<0.000000e+00> : vector<1x128xf32>
    %52 = tpu.matmul %51, %10, %cst_23 {dimension_numbers = #tpu.dot_dimension_numbers<[1], [0], [0], [1], [0, 0, 1, 1], [], []>} : vector<1x32xf32>, vector<32x128xf32>, vector<1x128xf32> -> vector<1x128xf32>
    %53 = arith.addf %52, %26 : vector<1x128xf32>
    %54 = arith.addf %53, %12 : vector<1x128xf32>
    %cst_24 = arith.constant 2.000000e+00 : f32
    %55 = vector.broadcast %cst_24 : f32 to vector<1x128xf32>
    %56 = arith.mulf %54, %55 : vector<1x128xf32>
    %57 = arith.select %5, %56, %54 : vector<1x128xi1>, vector<1x128xf32>
    %58 = arith.negf %57 : vector<1x128xf32>
    %59 = math.exp %58 : vector<1x128xf32>
    %cst_25 = arith.constant 1.000000e+00 : f32
    %60 = vector.broadcast %cst_25 : f32 to vector<1x128xf32>
    %61 = arith.addf %60, %59 : vector<1x128xf32>
    %62 = arith.divf %60, %61 : vector<1x128xf32>
    %cst_26 = arith.constant 2.000000e+00 : f32
    %63 = vector.broadcast %cst_26 : f32 to vector<1x128xf32>
    %64 = arith.mulf %63, %62 : vector<1x128xf32>
    %cst_27 = arith.constant 1.000000e+00 : f32
    %65 = vector.broadcast %cst_27 : f32 to vector<1x128xf32>
    %66 = arith.subf %64, %65 : vector<1x128xf32>
    %67 = arith.select %5, %66, %62 : vector<1x128xi1>, vector<1x128xf32>
    %68 = vector.extract_strided_slice %67 {offsets = [0, 0], sizes = [1, 32], strides = [1, 1]} : vector<1x128xf32> to vector<1x32xf32>
    %69 = vector.extract_strided_slice %67 {offsets = [0, 32], sizes = [1, 32], strides = [1, 1]} : vector<1x128xf32> to vector<1x32xf32>
    %70 = vector.extract_strided_slice %67 {offsets = [0, 64], sizes = [1, 32], strides = [1, 1]} : vector<1x128xf32> to vector<1x32xf32>
    %71 = vector.extract_strided_slice %67 {offsets = [0, 96], sizes = [1, 32], strides = [1, 1]} : vector<1x128xf32> to vector<1x32xf32>
    %72 = arith.mulf %69, %25 : vector<1x32xf32>
    %73 = arith.mulf %68, %70 : vector<1x32xf32>
    %74 = arith.addf %72, %73 : vector<1x32xf32>
    %75 = math.tanh %74 : vector<1x32xf32>
    %76 = arith.mulf %71, %75 : vector<1x32xf32>
    %cst_28 = arith.constant dense<0.000000e+00> : vector<1x128xf32>
    %77 = tpu.matmul %76, %11, %cst_28 {dimension_numbers = #tpu.dot_dimension_numbers<[1], [0], [0], [1], [0, 0, 1, 1], [], []>} : vector<1x32xf32>, vector<32x128xf32>, vector<1x128xf32> -> vector<1x128xf32>
    %78 = vector.extract_strided_slice %21 {offsets = [1, 0], sizes = [1, 128], strides = [1, 1]} : vector<10x128xf32> to vector<1x128xf32>
    %cst_29 = arith.constant dense<0.000000e+00> : vector<1x128xf32>
    %79 = tpu.matmul %51, %9, %cst_29 {dimension_numbers = #tpu.dot_dimension_numbers<[1], [0], [0], [1], [0, 0, 1, 1], [], []>} : vector<1x32xf32>, vector<32x128xf32>, vector<1x128xf32> -> vector<1x128xf32>
    %80 = arith.addf %78, %79 : vector<1x128xf32>
    %cst_30 = arith.constant 2.000000e+00 : f32
    %81 = vector.broadcast %cst_30 : f32 to vector<1x128xf32>
    %82 = arith.mulf %80, %81 : vector<1x128xf32>
    %83 = arith.select %5, %82, %80 : vector<1x128xi1>, vector<1x128xf32>
    %84 = arith.negf %83 : vector<1x128xf32>
    %85 = math.exp %84 : vector<1x128xf32>
    %cst_31 = arith.constant 1.000000e+00 : f32
    %86 = vector.broadcast %cst_31 : f32 to vector<1x128xf32>
    %87 = arith.addf %86, %85 : vector<1x128xf32>
    %88 = arith.divf %86, %87 : vector<1x128xf32>
    %cst_32 = arith.constant 2.000000e+00 : f32
    %89 = vector.broadcast %cst_32 : f32 to vector<1x128xf32>
    %90 = arith.mulf %89, %88 : vector<1x128xf32>
    %cst_33 = arith.constant 1.000000e+00 : f32
    %91 = vector.broadcast %cst_33 : f32 to vector<1x128xf32>
    %92 = arith.subf %90, %91 : vector<1x128xf32>
    %93 = arith.select %5, %92, %88 : vector<1x128xi1>, vector<1x128xf32>
    %94 = vector.extract_strided_slice %93 {offsets = [0, 0], sizes = [1, 32], strides = [1, 1]} : vector<1x128xf32> to vector<1x32xf32>
    %95 = vector.extract_strided_slice %93 {offsets = [0, 32], sizes = [1, 32], strides = [1, 1]} : vector<1x128xf32> to vector<1x32xf32>
    %96 = vector.extract_strided_slice %93 {offsets = [0, 64], sizes = [1, 32], strides = [1, 1]} : vector<1x128xf32> to vector<1x32xf32>
    %97 = vector.extract_strided_slice %93 {offsets = [0, 96], sizes = [1, 32], strides = [1, 1]} : vector<1x128xf32> to vector<1x32xf32>
    %98 = arith.mulf %95, %49 : vector<1x32xf32>
    %99 = arith.mulf %94, %96 : vector<1x32xf32>
    %100 = arith.addf %98, %99 : vector<1x32xf32>
    %101 = math.tanh %100 : vector<1x32xf32>
    %102 = arith.mulf %97, %101 : vector<1x32xf32>
    %cst_34 = arith.constant dense<0.000000e+00> : vector<1x128xf32>
    %103 = tpu.matmul %102, %10, %cst_34 {dimension_numbers = #tpu.dot_dimension_numbers<[1], [0], [0], [1], [0, 0, 1, 1], [], []>} : vector<1x32xf32>, vector<32x128xf32>, vector<1x128xf32> -> vector<1x128xf32>
    %104 = arith.addf %103, %77 : vector<1x128xf32>
    %105 = arith.addf %104, %12 : vector<1x128xf32>
    %cst_35 = arith.constant 2.000000e+00 : f32
    %106 = vector.broadcast %cst_35 : f32 to vector<1x128xf32>
    %107 = arith.mulf %105, %106 : vector<1x128xf32>
    %108 = arith.select %5, %107, %105 : vector<1x128xi1>, vector<1x128xf32>
    %109 = arith.negf %108 : vector<1x128xf32>
    %110 = math.exp %109 : vector<1x128xf32>
    %cst_36 = arith.constant 1.000000e+00 : f32
    %111 = vector.broadcast %cst_36 : f32 to vector<1x128xf32>
    %112 = arith.addf %111, %110 : vector<1x128xf32>
    %113 = arith.divf %111, %112 : vector<1x128xf32>
    %cst_37 = arith.constant 2.000000e+00 : f32
    %114 = vector.broadcast %cst_37 : f32 to vector<1x128xf32>
    %115 = arith.mulf %114, %113 : vector<1x128xf32>
    %cst_38 = arith.constant 1.000000e+00 : f32
    %116 = vector.broadcast %cst_38 : f32 to vector<1x128xf32>
    %117 = arith.subf %115, %116 : vector<1x128xf32>
    %118 = arith.select %5, %117, %113 : vector<1x128xi1>, vector<1x128xf32>
    %119 = vector.extract_strided_slice %118 {offsets = [0, 0], sizes = [1, 32], strides = [1, 1]} : vector<1x128xf32> to vector<1x32xf32>
    %120 = vector.extract_strided_slice %118 {offsets = [0, 32], sizes = [1, 32], strides = [1, 1]} : vector<1x128xf32> to vector<1x32xf32>
    %121 = vector.extract_strided_slice %118 {offsets = [0, 64], sizes = [1, 32], strides = [1, 1]} : vector<1x128xf32> to vector<1x32xf32>
    %122 = vector.extract_strided_slice %118 {offsets = [0, 96], sizes = [1, 32], strides = [1, 1]} : vector<1x128xf32> to vector<1x32xf32>
    %123 = arith.mulf %120, %74 : vector<1x32xf32>
    %124 = arith.mulf %119, %121 : vector<1x32xf32>
    %125 = arith.addf %123, %124 : vector<1x32xf32>
    %126 = math.tanh %125 : vector<1x32xf32>
    %127 = arith.mulf %122, %126 : vector<1x32xf32>
    %cst_39 = arith.constant dense<0.000000e+00> : vector<1x128xf32>
    %128 = tpu.matmul %127, %11, %cst_39 {dimension_numbers = #tpu.dot_dimension_numbers<[1], [0], [0], [1], [0, 0, 1, 1], [], []>} : vector<1x32xf32>, vector<32x128xf32>, vector<1x128xf32> -> vector<1x128xf32>
    %129 = vector.extract_strided_slice %21 {offsets = [2, 0], sizes = [1, 128], strides = [1, 1]} : vector<10x128xf32> to vector<1x128xf32>
    %cst_40 = arith.constant dense<0.000000e+00> : vector<1x128xf32>
    %130 = tpu.matmul %102, %9, %cst_40 {dimension_numbers = #tpu.dot_dimension_numbers<[1], [0], [0], [1], [0, 0, 1, 1], [], []>} : vector<1x32xf32>, vector<32x128xf32>, vector<1x128xf32> -> vector<1x128xf32>
    %131 = arith.addf %129, %130 : vector<1x128xf32>
    %cst_41 = arith.constant 2.000000e+00 : f32
    %132 = vector.broadcast %cst_41 : f32 to vector<1x128xf32>
    %133 = arith.mulf %131, %132 : vector<1x128xf32>
    %134 = arith.select %5, %133, %131 : vector<1x128xi1>, vector<1x128xf32>
    %135 = arith.negf %134 : vector<1x128xf32>
    %136 = math.exp %135 : vector<1x128xf32>
    %cst_42 = arith.constant 1.000000e+00 : f32
    %137 = vector.broadcast %cst_42 : f32 to vector<1x128xf32>
    %138 = arith.addf %137, %136 : vector<1x128xf32>
    %139 = arith.divf %137, %138 : vector<1x128xf32>
    %cst_43 = arith.constant 2.000000e+00 : f32
    %140 = vector.broadcast %cst_43 : f32 to vector<1x128xf32>
    %141 = arith.mulf %140, %139 : vector<1x128xf32>
    %cst_44 = arith.constant 1.000000e+00 : f32
    %142 = vector.broadcast %cst_44 : f32 to vector<1x128xf32>
    %143 = arith.subf %141, %142 : vector<1x128xf32>
    %144 = arith.select %5, %143, %139 : vector<1x128xi1>, vector<1x128xf32>
    %145 = vector.extract_strided_slice %144 {offsets = [0, 0], sizes = [1, 32], strides = [1, 1]} : vector<1x128xf32> to vector<1x32xf32>
    %146 = vector.extract_strided_slice %144 {offsets = [0, 32], sizes = [1, 32], strides = [1, 1]} : vector<1x128xf32> to vector<1x32xf32>
    %147 = vector.extract_strided_slice %144 {offsets = [0, 64], sizes = [1, 32], strides = [1, 1]} : vector<1x128xf32> to vector<1x32xf32>
    %148 = vector.extract_strided_slice %144 {offsets = [0, 96], sizes = [1, 32], strides = [1, 1]} : vector<1x128xf32> to vector<1x32xf32>
    %149 = arith.mulf %146, %100 : vector<1x32xf32>
    %150 = arith.mulf %145, %147 : vector<1x32xf32>
    %151 = arith.addf %149, %150 : vector<1x32xf32>
    %152 = math.tanh %151 : vector<1x32xf32>
    %153 = arith.mulf %148, %152 : vector<1x32xf32>
    %cst_45 = arith.constant dense<0.000000e+00> : vector<1x128xf32>
    %154 = tpu.matmul %153, %10, %cst_45 {dimension_numbers = #tpu.dot_dimension_numbers<[1], [0], [0], [1], [0, 0, 1, 1], [], []>} : vector<1x32xf32>, vector<32x128xf32>, vector<1x128xf32> -> vector<1x128xf32>
    %155 = arith.addf %154, %128 : vector<1x128xf32>
    %156 = arith.addf %155, %12 : vector<1x128xf32>
    %cst_46 = arith.constant 2.000000e+00 : f32
    %157 = vector.broadcast %cst_46 : f32 to vector<1x128xf32>
    %158 = arith.mulf %156, %157 : vector<1x128xf32>
    %159 = arith.select %5, %158, %156 : vector<1x128xi1>, vector<1x128xf32>
    %160 = arith.negf %159 : vector<1x128xf32>
    %161 = math.exp %160 : vector<1x128xf32>
    %cst_47 = arith.constant 1.000000e+00 : f32
    %162 = vector.broadcast %cst_47 : f32 to vector<1x128xf32>
    %163 = arith.addf %162, %161 : vector<1x128xf32>
    %164 = arith.divf %162, %163 : vector<1x128xf32>
    %cst_48 = arith.constant 2.000000e+00 : f32
    %165 = vector.broadcast %cst_48 : f32 to vector<1x128xf32>
    %166 = arith.mulf %165, %164 : vector<1x128xf32>
    %cst_49 = arith.constant 1.000000e+00 : f32
    %167 = vector.broadcast %cst_49 : f32 to vector<1x128xf32>
    %168 = arith.subf %166, %167 : vector<1x128xf32>
    %169 = arith.select %5, %168, %164 : vector<1x128xi1>, vector<1x128xf32>
    %170 = vector.extract_strided_slice %169 {offsets = [0, 0], sizes = [1, 32], strides = [1, 1]} : vector<1x128xf32> to vector<1x32xf32>
    %171 = vector.extract_strided_slice %169 {offsets = [0, 32], sizes = [1, 32], strides = [1, 1]} : vector<1x128xf32> to vector<1x32xf32>
    %172 = vector.extract_strided_slice %169 {offsets = [0, 64], sizes = [1, 32], strides = [1, 1]} : vector<1x128xf32> to vector<1x32xf32>
    %173 = vector.extract_strided_slice %169 {offsets = [0, 96], sizes = [1, 32], strides = [1, 1]} : vector<1x128xf32> to vector<1x32xf32>
    %174 = arith.mulf %171, %125 : vector<1x32xf32>
    %175 = arith.mulf %170, %172 : vector<1x32xf32>
    %176 = arith.addf %174, %175 : vector<1x32xf32>
    %177 = math.tanh %176 : vector<1x32xf32>
    %178 = arith.mulf %173, %177 : vector<1x32xf32>
    %cst_50 = arith.constant dense<0.000000e+00> : vector<1x128xf32>
    %179 = tpu.matmul %178, %11, %cst_50 {dimension_numbers = #tpu.dot_dimension_numbers<[1], [0], [0], [1], [0, 0, 1, 1], [], []>} : vector<1x32xf32>, vector<32x128xf32>, vector<1x128xf32> -> vector<1x128xf32>
    %180 = vector.extract_strided_slice %21 {offsets = [3, 0], sizes = [1, 128], strides = [1, 1]} : vector<10x128xf32> to vector<1x128xf32>
    %cst_51 = arith.constant dense<0.000000e+00> : vector<1x128xf32>
    %181 = tpu.matmul %153, %9, %cst_51 {dimension_numbers = #tpu.dot_dimension_numbers<[1], [0], [0], [1], [0, 0, 1, 1], [], []>} : vector<1x32xf32>, vector<32x128xf32>, vector<1x128xf32> -> vector<1x128xf32>
    %182 = arith.addf %180, %181 : vector<1x128xf32>
    %cst_52 = arith.constant 2.000000e+00 : f32
    %183 = vector.broadcast %cst_52 : f32 to vector<1x128xf32>
    %184 = arith.mulf %182, %183 : vector<1x128xf32>
    %185 = arith.select %5, %184, %182 : vector<1x128xi1>, vector<1x128xf32>
    %186 = arith.negf %185 : vector<1x128xf32>
    %187 = math.exp %186 : vector<1x128xf32>
    %cst_53 = arith.constant 1.000000e+00 : f32
    %188 = vector.broadcast %cst_53 : f32 to vector<1x128xf32>
    %189 = arith.addf %188, %187 : vector<1x128xf32>
    %190 = arith.divf %188, %189 : vector<1x128xf32>
    %cst_54 = arith.constant 2.000000e+00 : f32
    %191 = vector.broadcast %cst_54 : f32 to vector<1x128xf32>
    %192 = arith.mulf %191, %190 : vector<1x128xf32>
    %cst_55 = arith.constant 1.000000e+00 : f32
    %193 = vector.broadcast %cst_55 : f32 to vector<1x128xf32>
    %194 = arith.subf %192, %193 : vector<1x128xf32>
    %195 = arith.select %5, %194, %190 : vector<1x128xi1>, vector<1x128xf32>
    %196 = vector.extract_strided_slice %195 {offsets = [0, 0], sizes = [1, 32], strides = [1, 1]} : vector<1x128xf32> to vector<1x32xf32>
    %197 = vector.extract_strided_slice %195 {offsets = [0, 32], sizes = [1, 32], strides = [1, 1]} : vector<1x128xf32> to vector<1x32xf32>
    %198 = vector.extract_strided_slice %195 {offsets = [0, 64], sizes = [1, 32], strides = [1, 1]} : vector<1x128xf32> to vector<1x32xf32>
    %199 = vector.extract_strided_slice %195 {offsets = [0, 96], sizes = [1, 32], strides = [1, 1]} : vector<1x128xf32> to vector<1x32xf32>
    %200 = arith.mulf %197, %151 : vector<1x32xf32>
    %201 = arith.mulf %196, %198 : vector<1x32xf32>
    %202 = arith.addf %200, %201 : vector<1x32xf32>
    %203 = math.tanh %202 : vector<1x32xf32>
    %204 = arith.mulf %199, %203 : vector<1x32xf32>
    %cst_56 = arith.constant dense<0.000000e+00> : vector<1x128xf32>
    %205 = tpu.matmul %204, %10, %cst_56 {dimension_numbers = #tpu.dot_dimension_numbers<[1], [0], [0], [1], [0, 0, 1, 1], [], []>} : vector<1x32xf32>, vector<32x128xf32>, vector<1x128xf32> -> vector<1x128xf32>
    %206 = arith.addf %205, %179 : vector<1x128xf32>
    %207 = arith.addf %206, %12 : vector<1x128xf32>
    %cst_57 = arith.constant 2.000000e+00 : f32
    %208 = vector.broadcast %cst_57 : f32 to vector<1x128xf32>
    %209 = arith.mulf %207, %208 : vector<1x128xf32>
    %210 = arith.select %5, %209, %207 : vector<1x128xi1>, vector<1x128xf32>
    %211 = arith.negf %210 : vector<1x128xf32>
    %212 = math.exp %211 : vector<1x128xf32>
    %cst_58 = arith.constant 1.000000e+00 : f32
    %213 = vector.broadcast %cst_58 : f32 to vector<1x128xf32>
    %214 = arith.addf %213, %212 : vector<1x128xf32>
    %215 = arith.divf %213, %214 : vector<1x128xf32>
    %cst_59 = arith.constant 2.000000e+00 : f32
    %216 = vector.broadcast %cst_59 : f32 to vector<1x128xf32>
    %217 = arith.mulf %216, %215 : vector<1x128xf32>
    %cst_60 = arith.constant 1.000000e+00 : f32
    %218 = vector.broadcast %cst_60 : f32 to vector<1x128xf32>
    %219 = arith.subf %217, %218 : vector<1x128xf32>
    %220 = arith.select %5, %219, %215 : vector<1x128xi1>, vector<1x128xf32>
    %221 = vector.extract_strided_slice %220 {offsets = [0, 0], sizes = [1, 32], strides = [1, 1]} : vector<1x128xf32> to vector<1x32xf32>
    %222 = vector.extract_strided_slice %220 {offsets = [0, 32], sizes = [1, 32], strides = [1, 1]} : vector<1x128xf32> to vector<1x32xf32>
    %223 = vector.extract_strided_slice %220 {offsets = [0, 64], sizes = [1, 32], strides = [1, 1]} : vector<1x128xf32> to vector<1x32xf32>
    %224 = vector.extract_strided_slice %220 {offsets = [0, 96], sizes = [1, 32], strides = [1, 1]} : vector<1x128xf32> to vector<1x32xf32>
    %225 = arith.mulf %222, %176 : vector<1x32xf32>
    %226 = arith.mulf %221, %223 : vector<1x32xf32>
    %227 = arith.addf %225, %226 : vector<1x32xf32>
    %228 = math.tanh %227 : vector<1x32xf32>
    %229 = arith.mulf %224, %228 : vector<1x32xf32>
    %cst_61 = arith.constant dense<0.000000e+00> : vector<1x128xf32>
    %230 = tpu.matmul %229, %11, %cst_61 {dimension_numbers = #tpu.dot_dimension_numbers<[1], [0], [0], [1], [0, 0, 1, 1], [], []>} : vector<1x32xf32>, vector<32x128xf32>, vector<1x128xf32> -> vector<1x128xf32>
    %231 = vector.extract_strided_slice %21 {offsets = [4, 0], sizes = [1, 128], strides = [1, 1]} : vector<10x128xf32> to vector<1x128xf32>
    %cst_62 = arith.constant dense<0.000000e+00> : vector<1x128xf32>
    %232 = tpu.matmul %204, %9, %cst_62 {dimension_numbers = #tpu.dot_dimension_numbers<[1], [0], [0], [1], [0, 0, 1, 1], [], []>} : vector<1x32xf32>, vector<32x128xf32>, vector<1x128xf32> -> vector<1x128xf32>
    %233 = arith.addf %231, %232 : vector<1x128xf32>
    %cst_63 = arith.constant 2.000000e+00 : f32
    %234 = vector.broadcast %cst_63 : f32 to vector<1x128xf32>
    %235 = arith.mulf %233, %234 : vector<1x128xf32>
    %236 = arith.select %5, %235, %233 : vector<1x128xi1>, vector<1x128xf32>
    %237 = arith.negf %236 : vector<1x128xf32>
    %238 = math.exp %237 : vector<1x128xf32>
    %cst_64 = arith.constant 1.000000e+00 : f32
    %239 = vector.broadcast %cst_64 : f32 to vector<1x128xf32>
    %240 = arith.addf %239, %238 : vector<1x128xf32>
    %241 = arith.divf %239, %240 : vector<1x128xf32>
    %cst_65 = arith.constant 2.000000e+00 : f32
    %242 = vector.broadcast %cst_65 : f32 to vector<1x128xf32>
    %243 = arith.mulf %242, %241 : vector<1x128xf32>
    %cst_66 = arith.constant 1.000000e+00 : f32
    %244 = vector.broadcast %cst_66 : f32 to vector<1x128xf32>
    %245 = arith.subf %243, %244 : vector<1x128xf32>
    %246 = arith.select %5, %245, %241 : vector<1x128xi1>, vector<1x128xf32>
    %247 = vector.extract_strided_slice %246 {offsets = [0, 0], sizes = [1, 32], strides = [1, 1]} : vector<1x128xf32> to vector<1x32xf32>
    %248 = vector.extract_strided_slice %246 {offsets = [0, 32], sizes = [1, 32], strides = [1, 1]} : vector<1x128xf32> to vector<1x32xf32>
    %249 = vector.extract_strided_slice %246 {offsets = [0, 64], sizes = [1, 32], strides = [1, 1]} : vector<1x128xf32> to vector<1x32xf32>
    %250 = vector.extract_strided_slice %246 {offsets = [0, 96], sizes = [1, 32], strides = [1, 1]} : vector<1x128xf32> to vector<1x32xf32>
    %251 = arith.mulf %248, %202 : vector<1x32xf32>
    %252 = arith.mulf %247, %249 : vector<1x32xf32>
    %253 = arith.addf %251, %252 : vector<1x32xf32>
    %254 = math.tanh %253 : vector<1x32xf32>
    %255 = arith.mulf %250, %254 : vector<1x32xf32>
    %cst_67 = arith.constant dense<0.000000e+00> : vector<1x128xf32>
    %256 = tpu.matmul %255, %10, %cst_67 {dimension_numbers = #tpu.dot_dimension_numbers<[1], [0], [0], [1], [0, 0, 1, 1], [], []>} : vector<1x32xf32>, vector<32x128xf32>, vector<1x128xf32> -> vector<1x128xf32>
    %257 = arith.addf %256, %230 : vector<1x128xf32>
    %258 = arith.addf %257, %12 : vector<1x128xf32>
    %cst_68 = arith.constant 2.000000e+00 : f32
    %259 = vector.broadcast %cst_68 : f32 to vector<1x128xf32>
    %260 = arith.mulf %258, %259 : vector<1x128xf32>
    %261 = arith.select %5, %260, %258 : vector<1x128xi1>, vector<1x128xf32>
    %262 = arith.negf %261 : vector<1x128xf32>
    %263 = math.exp %262 : vector<1x128xf32>
    %cst_69 = arith.constant 1.000000e+00 : f32
    %264 = vector.broadcast %cst_69 : f32 to vector<1x128xf32>
    %265 = arith.addf %264, %263 : vector<1x128xf32>
    %266 = arith.divf %264, %265 : vector<1x128xf32>
    %cst_70 = arith.constant 2.000000e+00 : f32
    %267 = vector.broadcast %cst_70 : f32 to vector<1x128xf32>
    %268 = arith.mulf %267, %266 : vector<1x128xf32>
    %cst_71 = arith.constant 1.000000e+00 : f32
    %269 = vector.broadcast %cst_71 : f32 to vector<1x128xf32>
    %270 = arith.subf %268, %269 : vector<1x128xf32>
    %271 = arith.select %5, %270, %266 : vector<1x128xi1>, vector<1x128xf32>
    %272 = vector.extract_strided_slice %271 {offsets = [0, 0], sizes = [1, 32], strides = [1, 1]} : vector<1x128xf32> to vector<1x32xf32>
    %273 = vector.extract_strided_slice %271 {offsets = [0, 32], sizes = [1, 32], strides = [1, 1]} : vector<1x128xf32> to vector<1x32xf32>
    %274 = vector.extract_strided_slice %271 {offsets = [0, 64], sizes = [1, 32], strides = [1, 1]} : vector<1x128xf32> to vector<1x32xf32>
    %275 = vector.extract_strided_slice %271 {offsets = [0, 96], sizes = [1, 32], strides = [1, 1]} : vector<1x128xf32> to vector<1x32xf32>
    %276 = arith.mulf %273, %227 : vector<1x32xf32>
    %277 = arith.mulf %272, %274 : vector<1x32xf32>
    %278 = arith.addf %276, %277 : vector<1x32xf32>
    %279 = math.tanh %278 : vector<1x32xf32>
    %280 = arith.mulf %275, %279 : vector<1x32xf32>
    %cst_72 = arith.constant dense<0.000000e+00> : vector<1x128xf32>
    %281 = tpu.matmul %280, %11, %cst_72 {dimension_numbers = #tpu.dot_dimension_numbers<[1], [0], [0], [1], [0, 0, 1, 1], [], []>} : vector<1x32xf32>, vector<32x128xf32>, vector<1x128xf32> -> vector<1x128xf32>
    %282 = vector.extract_strided_slice %21 {offsets = [5, 0], sizes = [1, 128], strides = [1, 1]} : vector<10x128xf32> to vector<1x128xf32>
    %cst_73 = arith.constant dense<0.000000e+00> : vector<1x128xf32>
    %283 = tpu.matmul %255, %9, %cst_73 {dimension_numbers = #tpu.dot_dimension_numbers<[1], [0], [0], [1], [0, 0, 1, 1], [], []>} : vector<1x32xf32>, vector<32x128xf32>, vector<1x128xf32> -> vector<1x128xf32>
    %284 = arith.addf %282, %283 : vector<1x128xf32>
    %cst_74 = arith.constant 2.000000e+00 : f32
    %285 = vector.broadcast %cst_74 : f32 to vector<1x128xf32>
    %286 = arith.mulf %284, %285 : vector<1x128xf32>
    %287 = arith.select %5, %286, %284 : vector<1x128xi1>, vector<1x128xf32>
    %288 = arith.negf %287 : vector<1x128xf32>
    %289 = math.exp %288 : vector<1x128xf32>
    %cst_75 = arith.constant 1.000000e+00 : f32
    %290 = vector.broadcast %cst_75 : f32 to vector<1x128xf32>
    %291 = arith.addf %290, %289 : vector<1x128xf32>
    %292 = arith.divf %290, %291 : vector<1x128xf32>
    %cst_76 = arith.constant 2.000000e+00 : f32
    %293 = vector.broadcast %cst_76 : f32 to vector<1x128xf32>
    %294 = arith.mulf %293, %292 : vector<1x128xf32>
    %cst_77 = arith.constant 1.000000e+00 : f32
    %295 = vector.broadcast %cst_77 : f32 to vector<1x128xf32>
    %296 = arith.subf %294, %295 : vector<1x128xf32>
    %297 = arith.select %5, %296, %292 : vector<1x128xi1>, vector<1x128xf32>
    %298 = vector.extract_strided_slice %297 {offsets = [0, 0], sizes = [1, 32], strides = [1, 1]} : vector<1x128xf32> to vector<1x32xf32>
    %299 = vector.extract_strided_slice %297 {offsets = [0, 32], sizes = [1, 32], strides = [1, 1]} : vector<1x128xf32> to vector<1x32xf32>
    %300 = vector.extract_strided_slice %297 {offsets = [0, 64], sizes = [1, 32], strides = [1, 1]} : vector<1x128xf32> to vector<1x32xf32>
    %301 = vector.extract_strided_slice %297 {offsets = [0, 96], sizes = [1, 32], strides = [1, 1]} : vector<1x128xf32> to vector<1x32xf32>
    %302 = arith.mulf %299, %253 : vector<1x32xf32>
    %303 = arith.mulf %298, %300 : vector<1x32xf32>
    %304 = arith.addf %302, %303 : vector<1x32xf32>
    %305 = math.tanh %304 : vector<1x32xf32>
    %306 = arith.mulf %301, %305 : vector<1x32xf32>
    %cst_78 = arith.constant dense<0.000000e+00> : vector<1x128xf32>
    %307 = tpu.matmul %306, %10, %cst_78 {dimension_numbers = #tpu.dot_dimension_numbers<[1], [0], [0], [1], [0, 0, 1, 1], [], []>} : vector<1x32xf32>, vector<32x128xf32>, vector<1x128xf32> -> vector<1x128xf32>
    %308 = arith.addf %307, %281 : vector<1x128xf32>
    %309 = arith.addf %308, %12 : vector<1x128xf32>
    %cst_79 = arith.constant 2.000000e+00 : f32
    %310 = vector.broadcast %cst_79 : f32 to vector<1x128xf32>
    %311 = arith.mulf %309, %310 : vector<1x128xf32>
    %312 = arith.select %5, %311, %309 : vector<1x128xi1>, vector<1x128xf32>
    %313 = arith.negf %312 : vector<1x128xf32>
    %314 = math.exp %313 : vector<1x128xf32>
    %cst_80 = arith.constant 1.000000e+00 : f32
    %315 = vector.broadcast %cst_80 : f32 to vector<1x128xf32>
    %316 = arith.addf %315, %314 : vector<1x128xf32>
    %317 = arith.divf %315, %316 : vector<1x128xf32>
    %cst_81 = arith.constant 2.000000e+00 : f32
    %318 = vector.broadcast %cst_81 : f32 to vector<1x128xf32>
    %319 = arith.mulf %318, %317 : vector<1x128xf32>
    %cst_82 = arith.constant 1.000000e+00 : f32
    %320 = vector.broadcast %cst_82 : f32 to vector<1x128xf32>
    %321 = arith.subf %319, %320 : vector<1x128xf32>
    %322 = arith.select %5, %321, %317 : vector<1x128xi1>, vector<1x128xf32>
    %323 = vector.extract_strided_slice %322 {offsets = [0, 0], sizes = [1, 32], strides = [1, 1]} : vector<1x128xf32> to vector<1x32xf32>
    %324 = vector.extract_strided_slice %322 {offsets = [0, 32], sizes = [1, 32], strides = [1, 1]} : vector<1x128xf32> to vector<1x32xf32>
    %325 = vector.extract_strided_slice %322 {offsets = [0, 64], sizes = [1, 32], strides = [1, 1]} : vector<1x128xf32> to vector<1x32xf32>
    %326 = vector.extract_strided_slice %322 {offsets = [0, 96], sizes = [1, 32], strides = [1, 1]} : vector<1x128xf32> to vector<1x32xf32>
    %327 = arith.mulf %324, %278 : vector<1x32xf32>
    %328 = arith.mulf %323, %325 : vector<1x32xf32>
    %329 = arith.addf %327, %328 : vector<1x32xf32>
    %330 = math.tanh %329 : vector<1x32xf32>
    %331 = arith.mulf %326, %330 : vector<1x32xf32>
    %cst_83 = arith.constant dense<0.000000e+00> : vector<1x128xf32>
    %332 = tpu.matmul %331, %11, %cst_83 {dimension_numbers = #tpu.dot_dimension_numbers<[1], [0], [0], [1], [0, 0, 1, 1], [], []>} : vector<1x32xf32>, vector<32x128xf32>, vector<1x128xf32> -> vector<1x128xf32>
    %333 = vector.extract_strided_slice %21 {offsets = [6, 0], sizes = [1, 128], strides = [1, 1]} : vector<10x128xf32> to vector<1x128xf32>
    %cst_84 = arith.constant dense<0.000000e+00> : vector<1x128xf32>
    %334 = tpu.matmul %306, %9, %cst_84 {dimension_numbers = #tpu.dot_dimension_numbers<[1], [0], [0], [1], [0, 0, 1, 1], [], []>} : vector<1x32xf32>, vector<32x128xf32>, vector<1x128xf32> -> vector<1x128xf32>
    %335 = arith.addf %333, %334 : vector<1x128xf32>
    %cst_85 = arith.constant 2.000000e+00 : f32
    %336 = vector.broadcast %cst_85 : f32 to vector<1x128xf32>
    %337 = arith.mulf %335, %336 : vector<1x128xf32>
    %338 = arith.select %5, %337, %335 : vector<1x128xi1>, vector<1x128xf32>
    %339 = arith.negf %338 : vector<1x128xf32>
    %340 = math.exp %339 : vector<1x128xf32>
    %cst_86 = arith.constant 1.000000e+00 : f32
    %341 = vector.broadcast %cst_86 : f32 to vector<1x128xf32>
    %342 = arith.addf %341, %340 : vector<1x128xf32>
    %343 = arith.divf %341, %342 : vector<1x128xf32>
    %cst_87 = arith.constant 2.000000e+00 : f32
    %344 = vector.broadcast %cst_87 : f32 to vector<1x128xf32>
    %345 = arith.mulf %344, %343 : vector<1x128xf32>
    %cst_88 = arith.constant 1.000000e+00 : f32
    %346 = vector.broadcast %cst_88 : f32 to vector<1x128xf32>
    %347 = arith.subf %345, %346 : vector<1x128xf32>
    %348 = arith.select %5, %347, %343 : vector<1x128xi1>, vector<1x128xf32>
    %349 = vector.extract_strided_slice %348 {offsets = [0, 0], sizes = [1, 32], strides = [1, 1]} : vector<1x128xf32> to vector<1x32xf32>
    %350 = vector.extract_strided_slice %348 {offsets = [0, 32], sizes = [1, 32], strides = [1, 1]} : vector<1x128xf32> to vector<1x32xf32>
    %351 = vector.extract_strided_slice %348 {offsets = [0, 64], sizes = [1, 32], strides = [1, 1]} : vector<1x128xf32> to vector<1x32xf32>
    %352 = vector.extract_strided_slice %348 {offsets = [0, 96], sizes = [1, 32], strides = [1, 1]} : vector<1x128xf32> to vector<1x32xf32>
    %353 = arith.mulf %350, %304 : vector<1x32xf32>
    %354 = arith.mulf %349, %351 : vector<1x32xf32>
    %355 = arith.addf %353, %354 : vector<1x32xf32>
    %356 = math.tanh %355 : vector<1x32xf32>
    %357 = arith.mulf %352, %356 : vector<1x32xf32>
    %cst_89 = arith.constant dense<0.000000e+00> : vector<1x128xf32>
    %358 = tpu.matmul %357, %10, %cst_89 {dimension_numbers = #tpu.dot_dimension_numbers<[1], [0], [0], [1], [0, 0, 1, 1], [], []>} : vector<1x32xf32>, vector<32x128xf32>, vector<1x128xf32> -> vector<1x128xf32>
    %359 = arith.addf %358, %332 : vector<1x128xf32>
    %360 = arith.addf %359, %12 : vector<1x128xf32>
    %cst_90 = arith.constant 2.000000e+00 : f32
    %361 = vector.broadcast %cst_90 : f32 to vector<1x128xf32>
    %362 = arith.mulf %360, %361 : vector<1x128xf32>
    %363 = arith.select %5, %362, %360 : vector<1x128xi1>, vector<1x128xf32>
    %364 = arith.negf %363 : vector<1x128xf32>
    %365 = math.exp %364 : vector<1x128xf32>
    %cst_91 = arith.constant 1.000000e+00 : f32
    %366 = vector.broadcast %cst_91 : f32 to vector<1x128xf32>
    %367 = arith.addf %366, %365 : vector<1x128xf32>
    %368 = arith.divf %366, %367 : vector<1x128xf32>
    %cst_92 = arith.constant 2.000000e+00 : f32
    %369 = vector.broadcast %cst_92 : f32 to vector<1x128xf32>
    %370 = arith.mulf %369, %368 : vector<1x128xf32>
    %cst_93 = arith.constant 1.000000e+00 : f32
    %371 = vector.broadcast %cst_93 : f32 to vector<1x128xf32>
    %372 = arith.subf %370, %371 : vector<1x128xf32>
    %373 = arith.select %5, %372, %368 : vector<1x128xi1>, vector<1x128xf32>
    %374 = vector.extract_strided_slice %373 {offsets = [0, 0], sizes = [1, 32], strides = [1, 1]} : vector<1x128xf32> to vector<1x32xf32>
    %375 = vector.extract_strided_slice %373 {offsets = [0, 32], sizes = [1, 32], strides = [1, 1]} : vector<1x128xf32> to vector<1x32xf32>
    %376 = vector.extract_strided_slice %373 {offsets = [0, 64], sizes = [1, 32], strides = [1, 1]} : vector<1x128xf32> to vector<1x32xf32>
    %377 = vector.extract_strided_slice %373 {offsets = [0, 96], sizes = [1, 32], strides = [1, 1]} : vector<1x128xf32> to vector<1x32xf32>
    %378 = arith.mulf %375, %329 : vector<1x32xf32>
    %379 = arith.mulf %374, %376 : vector<1x32xf32>
    %380 = arith.addf %378, %379 : vector<1x32xf32>
    %381 = math.tanh %380 : vector<1x32xf32>
    %382 = arith.mulf %377, %381 : vector<1x32xf32>
    %cst_94 = arith.constant dense<0.000000e+00> : vector<1x128xf32>
    %383 = tpu.matmul %382, %11, %cst_94 {dimension_numbers = #tpu.dot_dimension_numbers<[1], [0], [0], [1], [0, 0, 1, 1], [], []>} : vector<1x32xf32>, vector<32x128xf32>, vector<1x128xf32> -> vector<1x128xf32>
    %384 = vector.extract_strided_slice %21 {offsets = [7, 0], sizes = [1, 128], strides = [1, 1]} : vector<10x128xf32> to vector<1x128xf32>
    %cst_95 = arith.constant dense<0.000000e+00> : vector<1x128xf32>
    %385 = tpu.matmul %357, %9, %cst_95 {dimension_numbers = #tpu.dot_dimension_numbers<[1], [0], [0], [1], [0, 0, 1, 1], [], []>} : vector<1x32xf32>, vector<32x128xf32>, vector<1x128xf32> -> vector<1x128xf32>
    %386 = arith.addf %384, %385 : vector<1x128xf32>
    %cst_96 = arith.constant 2.000000e+00 : f32
    %387 = vector.broadcast %cst_96 : f32 to vector<1x128xf32>
    %388 = arith.mulf %386, %387 : vector<1x128xf32>
    %389 = arith.select %5, %388, %386 : vector<1x128xi1>, vector<1x128xf32>
    %390 = arith.negf %389 : vector<1x128xf32>
    %391 = math.exp %390 : vector<1x128xf32>
    %cst_97 = arith.constant 1.000000e+00 : f32
    %392 = vector.broadcast %cst_97 : f32 to vector<1x128xf32>
    %393 = arith.addf %392, %391 : vector<1x128xf32>
    %394 = arith.divf %392, %393 : vector<1x128xf32>
    %cst_98 = arith.constant 2.000000e+00 : f32
    %395 = vector.broadcast %cst_98 : f32 to vector<1x128xf32>
    %396 = arith.mulf %395, %394 : vector<1x128xf32>
    %cst_99 = arith.constant 1.000000e+00 : f32
    %397 = vector.broadcast %cst_99 : f32 to vector<1x128xf32>
    %398 = arith.subf %396, %397 : vector<1x128xf32>
    %399 = arith.select %5, %398, %394 : vector<1x128xi1>, vector<1x128xf32>
    %400 = vector.extract_strided_slice %399 {offsets = [0, 0], sizes = [1, 32], strides = [1, 1]} : vector<1x128xf32> to vector<1x32xf32>
    %401 = vector.extract_strided_slice %399 {offsets = [0, 32], sizes = [1, 32], strides = [1, 1]} : vector<1x128xf32> to vector<1x32xf32>
    %402 = vector.extract_strided_slice %399 {offsets = [0, 64], sizes = [1, 32], strides = [1, 1]} : vector<1x128xf32> to vector<1x32xf32>
    %403 = vector.extract_strided_slice %399 {offsets = [0, 96], sizes = [1, 32], strides = [1, 1]} : vector<1x128xf32> to vector<1x32xf32>
    %404 = arith.mulf %401, %355 : vector<1x32xf32>
    %405 = arith.mulf %400, %402 : vector<1x32xf32>
    %406 = arith.addf %404, %405 : vector<1x32xf32>
    %407 = math.tanh %406 : vector<1x32xf32>
    %408 = arith.mulf %403, %407 : vector<1x32xf32>
    %cst_100 = arith.constant dense<0.000000e+00> : vector<1x128xf32>
    %409 = tpu.matmul %408, %10, %cst_100 {dimension_numbers = #tpu.dot_dimension_numbers<[1], [0], [0], [1], [0, 0, 1, 1], [], []>} : vector<1x32xf32>, vector<32x128xf32>, vector<1x128xf32> -> vector<1x128xf32>
    %410 = arith.addf %409, %383 : vector<1x128xf32>
    %411 = arith.addf %410, %12 : vector<1x128xf32>
    %cst_101 = arith.constant 2.000000e+00 : f32
    %412 = vector.broadcast %cst_101 : f32 to vector<1x128xf32>
    %413 = arith.mulf %411, %412 : vector<1x128xf32>
    %414 = arith.select %5, %413, %411 : vector<1x128xi1>, vector<1x128xf32>
    %415 = arith.negf %414 : vector<1x128xf32>
    %416 = math.exp %415 : vector<1x128xf32>
    %cst_102 = arith.constant 1.000000e+00 : f32
    %417 = vector.broadcast %cst_102 : f32 to vector<1x128xf32>
    %418 = arith.addf %417, %416 : vector<1x128xf32>
    %419 = arith.divf %417, %418 : vector<1x128xf32>
    %cst_103 = arith.constant 2.000000e+00 : f32
    %420 = vector.broadcast %cst_103 : f32 to vector<1x128xf32>
    %421 = arith.mulf %420, %419 : vector<1x128xf32>
    %cst_104 = arith.constant 1.000000e+00 : f32
    %422 = vector.broadcast %cst_104 : f32 to vector<1x128xf32>
    %423 = arith.subf %421, %422 : vector<1x128xf32>
    %424 = arith.select %5, %423, %419 : vector<1x128xi1>, vector<1x128xf32>
    %425 = vector.extract_strided_slice %424 {offsets = [0, 0], sizes = [1, 32], strides = [1, 1]} : vector<1x128xf32> to vector<1x32xf32>
    %426 = vector.extract_strided_slice %424 {offsets = [0, 32], sizes = [1, 32], strides = [1, 1]} : vector<1x128xf32> to vector<1x32xf32>
    %427 = vector.extract_strided_slice %424 {offsets = [0, 64], sizes = [1, 32], strides = [1, 1]} : vector<1x128xf32> to vector<1x32xf32>
    %428 = vector.extract_strided_slice %424 {offsets = [0, 96], sizes = [1, 32], strides = [1, 1]} : vector<1x128xf32> to vector<1x32xf32>
    %429 = arith.mulf %426, %380 : vector<1x32xf32>
    %430 = arith.mulf %425, %427 : vector<1x32xf32>
    %431 = arith.addf %429, %430 : vector<1x32xf32>
    %432 = math.tanh %431 : vector<1x32xf32>
    %433 = arith.mulf %428, %432 : vector<1x32xf32>
    %cst_105 = arith.constant dense<0.000000e+00> : vector<1x128xf32>
    %434 = tpu.matmul %433, %11, %cst_105 {dimension_numbers = #tpu.dot_dimension_numbers<[1], [0], [0], [1], [0, 0, 1, 1], [], []>} : vector<1x32xf32>, vector<32x128xf32>, vector<1x128xf32> -> vector<1x128xf32>
    %435 = vector.extract_strided_slice %21 {offsets = [8, 0], sizes = [1, 128], strides = [1, 1]} : vector<10x128xf32> to vector<1x128xf32>
    %cst_106 = arith.constant dense<0.000000e+00> : vector<1x128xf32>
    %436 = tpu.matmul %408, %9, %cst_106 {dimension_numbers = #tpu.dot_dimension_numbers<[1], [0], [0], [1], [0, 0, 1, 1], [], []>} : vector<1x32xf32>, vector<32x128xf32>, vector<1x128xf32> -> vector<1x128xf32>
    %437 = arith.addf %435, %436 : vector<1x128xf32>
    %cst_107 = arith.constant 2.000000e+00 : f32
    %438 = vector.broadcast %cst_107 : f32 to vector<1x128xf32>
    %439 = arith.mulf %437, %438 : vector<1x128xf32>
    %440 = arith.select %5, %439, %437 : vector<1x128xi1>, vector<1x128xf32>
    %441 = arith.negf %440 : vector<1x128xf32>
    %442 = math.exp %441 : vector<1x128xf32>
    %cst_108 = arith.constant 1.000000e+00 : f32
    %443 = vector.broadcast %cst_108 : f32 to vector<1x128xf32>
    %444 = arith.addf %443, %442 : vector<1x128xf32>
    %445 = arith.divf %443, %444 : vector<1x128xf32>
    %cst_109 = arith.constant 2.000000e+00 : f32
    %446 = vector.broadcast %cst_109 : f32 to vector<1x128xf32>
    %447 = arith.mulf %446, %445 : vector<1x128xf32>
    %cst_110 = arith.constant 1.000000e+00 : f32
    %448 = vector.broadcast %cst_110 : f32 to vector<1x128xf32>
    %449 = arith.subf %447, %448 : vector<1x128xf32>
    %450 = arith.select %5, %449, %445 : vector<1x128xi1>, vector<1x128xf32>
    %451 = vector.extract_strided_slice %450 {offsets = [0, 0], sizes = [1, 32], strides = [1, 1]} : vector<1x128xf32> to vector<1x32xf32>
    %452 = vector.extract_strided_slice %450 {offsets = [0, 32], sizes = [1, 32], strides = [1, 1]} : vector<1x128xf32> to vector<1x32xf32>
    %453 = vector.extract_strided_slice %450 {offsets = [0, 64], sizes = [1, 32], strides = [1, 1]} : vector<1x128xf32> to vector<1x32xf32>
    %454 = vector.extract_strided_slice %450 {offsets = [0, 96], sizes = [1, 32], strides = [1, 1]} : vector<1x128xf32> to vector<1x32xf32>
    %455 = arith.mulf %452, %406 : vector<1x32xf32>
    %456 = arith.mulf %451, %453 : vector<1x32xf32>
    %457 = arith.addf %455, %456 : vector<1x32xf32>
    %458 = math.tanh %457 : vector<1x32xf32>
    %459 = arith.mulf %454, %458 : vector<1x32xf32>
    %cst_111 = arith.constant dense<0.000000e+00> : vector<1x128xf32>
    %460 = tpu.matmul %459, %10, %cst_111 {dimension_numbers = #tpu.dot_dimension_numbers<[1], [0], [0], [1], [0, 0, 1, 1], [], []>} : vector<1x32xf32>, vector<32x128xf32>, vector<1x128xf32> -> vector<1x128xf32>
    %461 = arith.addf %460, %434 : vector<1x128xf32>
    %462 = arith.addf %461, %12 : vector<1x128xf32>
    %cst_112 = arith.constant 2.000000e+00 : f32
    %463 = vector.broadcast %cst_112 : f32 to vector<1x128xf32>
    %464 = arith.mulf %462, %463 : vector<1x128xf32>
    %465 = arith.select %5, %464, %462 : vector<1x128xi1>, vector<1x128xf32>
    %466 = arith.negf %465 : vector<1x128xf32>
    %467 = math.exp %466 : vector<1x128xf32>
    %cst_113 = arith.constant 1.000000e+00 : f32
    %468 = vector.broadcast %cst_113 : f32 to vector<1x128xf32>
    %469 = arith.addf %468, %467 : vector<1x128xf32>
    %470 = arith.divf %468, %469 : vector<1x128xf32>
    %cst_114 = arith.constant 2.000000e+00 : f32
    %471 = vector.broadcast %cst_114 : f32 to vector<1x128xf32>
    %472 = arith.mulf %471, %470 : vector<1x128xf32>
    %cst_115 = arith.constant 1.000000e+00 : f32
    %473 = vector.broadcast %cst_115 : f32 to vector<1x128xf32>
    %474 = arith.subf %472, %473 : vector<1x128xf32>
    %475 = arith.select %5, %474, %470 : vector<1x128xi1>, vector<1x128xf32>
    %476 = vector.extract_strided_slice %475 {offsets = [0, 0], sizes = [1, 32], strides = [1, 1]} : vector<1x128xf32> to vector<1x32xf32>
    %477 = vector.extract_strided_slice %475 {offsets = [0, 32], sizes = [1, 32], strides = [1, 1]} : vector<1x128xf32> to vector<1x32xf32>
    %478 = vector.extract_strided_slice %475 {offsets = [0, 64], sizes = [1, 32], strides = [1, 1]} : vector<1x128xf32> to vector<1x32xf32>
    %479 = vector.extract_strided_slice %475 {offsets = [0, 96], sizes = [1, 32], strides = [1, 1]} : vector<1x128xf32> to vector<1x32xf32>
    %480 = arith.mulf %477, %431 : vector<1x32xf32>
    %481 = arith.mulf %476, %478 : vector<1x32xf32>
    %482 = arith.addf %480, %481 : vector<1x32xf32>
    %483 = math.tanh %482 : vector<1x32xf32>
    %484 = arith.mulf %479, %483 : vector<1x32xf32>
    %cst_116 = arith.constant dense<0.000000e+00> : vector<1x128xf32>
    %485 = tpu.matmul %484, %11, %cst_116 {dimension_numbers = #tpu.dot_dimension_numbers<[1], [0], [0], [1], [0, 0, 1, 1], [], []>} : vector<1x32xf32>, vector<32x128xf32>, vector<1x128xf32> -> vector<1x128xf32>
    %486 = vector.extract_strided_slice %21 {offsets = [9, 0], sizes = [1, 128], strides = [1, 1]} : vector<10x128xf32> to vector<1x128xf32>
    %cst_117 = arith.constant dense<0.000000e+00> : vector<1x128xf32>
    %487 = tpu.matmul %459, %9, %cst_117 {dimension_numbers = #tpu.dot_dimension_numbers<[1], [0], [0], [1], [0, 0, 1, 1], [], []>} : vector<1x32xf32>, vector<32x128xf32>, vector<1x128xf32> -> vector<1x128xf32>
    %488 = arith.addf %486, %487 : vector<1x128xf32>
    %cst_118 = arith.constant 2.000000e+00 : f32
    %489 = vector.broadcast %cst_118 : f32 to vector<1x128xf32>
    %490 = arith.mulf %488, %489 : vector<1x128xf32>
    %491 = arith.select %5, %490, %488 : vector<1x128xi1>, vector<1x128xf32>
    %492 = arith.negf %491 : vector<1x128xf32>
    %493 = math.exp %492 : vector<1x128xf32>
    %cst_119 = arith.constant 1.000000e+00 : f32
    %494 = vector.broadcast %cst_119 : f32 to vector<1x128xf32>
    %495 = arith.addf %494, %493 : vector<1x128xf32>
    %496 = arith.divf %494, %495 : vector<1x128xf32>
    %cst_120 = arith.constant 2.000000e+00 : f32
    %497 = vector.broadcast %cst_120 : f32 to vector<1x128xf32>
    %498 = arith.mulf %497, %496 : vector<1x128xf32>
    %cst_121 = arith.constant 1.000000e+00 : f32
    %499 = vector.broadcast %cst_121 : f32 to vector<1x128xf32>
    %500 = arith.subf %498, %499 : vector<1x128xf32>
    %501 = arith.select %5, %500, %496 : vector<1x128xi1>, vector<1x128xf32>
    %502 = vector.extract_strided_slice %501 {offsets = [0, 0], sizes = [1, 32], strides = [1, 1]} : vector<1x128xf32> to vector<1x32xf32>
    %503 = vector.extract_strided_slice %501 {offsets = [0, 32], sizes = [1, 32], strides = [1, 1]} : vector<1x128xf32> to vector<1x32xf32>
    %504 = vector.extract_strided_slice %501 {offsets = [0, 64], sizes = [1, 32], strides = [1, 1]} : vector<1x128xf32> to vector<1x32xf32>
    %505 = vector.extract_strided_slice %501 {offsets = [0, 96], sizes = [1, 32], strides = [1, 1]} : vector<1x128xf32> to vector<1x32xf32>
    %506 = arith.mulf %503, %457 : vector<1x32xf32>
    %507 = arith.mulf %502, %504 : vector<1x32xf32>
    %508 = arith.addf %506, %507 : vector<1x32xf32>
    %509 = math.tanh %508 : vector<1x32xf32>
    %510 = arith.mulf %505, %509 : vector<1x32xf32>
    %cst_122 = arith.constant dense<0.000000e+00> : vector<1x128xf32>
    %511 = tpu.matmul %510, %10, %cst_122 {dimension_numbers = #tpu.dot_dimension_numbers<[1], [0], [0], [1], [0, 0, 1, 1], [], []>} : vector<1x32xf32>, vector<32x128xf32>, vector<1x128xf32> -> vector<1x128xf32>
    %512 = arith.addf %511, %485 : vector<1x128xf32>
    %513 = arith.addf %512, %12 : vector<1x128xf32>
    %cst_123 = arith.constant 2.000000e+00 : f32
    %514 = vector.broadcast %cst_123 : f32 to vector<1x128xf32>
    %515 = arith.mulf %513, %514 : vector<1x128xf32>
    %516 = arith.select %5, %515, %513 : vector<1x128xi1>, vector<1x128xf32>
    %517 = arith.negf %516 : vector<1x128xf32>
    %518 = math.exp %517 : vector<1x128xf32>
    %cst_124 = arith.constant 1.000000e+00 : f32
    %519 = vector.broadcast %cst_124 : f32 to vector<1x128xf32>
    %520 = arith.addf %519, %518 : vector<1x128xf32>
    %521 = arith.divf %519, %520 : vector<1x128xf32>
    %cst_125 = arith.constant 2.000000e+00 : f32
    %522 = vector.broadcast %cst_125 : f32 to vector<1x128xf32>
    %523 = arith.mulf %522, %521 : vector<1x128xf32>
    %cst_126 = arith.constant 1.000000e+00 : f32
    %524 = vector.broadcast %cst_126 : f32 to vector<1x128xf32>
    %525 = arith.subf %523, %524 : vector<1x128xf32>
    %526 = arith.select %5, %525, %521 : vector<1x128xi1>, vector<1x128xf32>
    %527 = vector.extract_strided_slice %526 {offsets = [0, 0], sizes = [1, 32], strides = [1, 1]} : vector<1x128xf32> to vector<1x32xf32>
    %528 = vector.extract_strided_slice %526 {offsets = [0, 32], sizes = [1, 32], strides = [1, 1]} : vector<1x128xf32> to vector<1x32xf32>
    %529 = vector.extract_strided_slice %526 {offsets = [0, 64], sizes = [1, 32], strides = [1, 1]} : vector<1x128xf32> to vector<1x32xf32>
    %530 = vector.extract_strided_slice %526 {offsets = [0, 96], sizes = [1, 32], strides = [1, 1]} : vector<1x128xf32> to vector<1x32xf32>
    %531 = arith.mulf %528, %482 : vector<1x32xf32>
    %532 = arith.mulf %527, %529 : vector<1x32xf32>
    %533 = arith.addf %531, %532 : vector<1x32xf32>
    %534 = math.tanh %533 : vector<1x32xf32>
    %535 = arith.mulf %530, %534 : vector<1x32xf32>
    %c128 = arith.constant 128 : index
    %c0_127 = arith.constant 0 : index
    %536 = vector.load %arg4[%c128, %c0_127] : memref<296x128xf32, #tpu.memory_space<vmem>>, vector<7x128xf32>
    %c136 = arith.constant 136 : index
    %c0_128 = arith.constant 0 : index
    %537 = vector.load %arg4[%c136, %c0_128] : memref<296x128xf32, #tpu.memory_space<vmem>>, vector<4x128xf32>
    %c144 = arith.constant 144 : index
    %c0_129 = arith.constant 0 : index
    %538 = vector.load %arg4[%c144, %c0_129] : memref<296x128xf32, #tpu.memory_space<vmem>>, vector<1x128xf32>
    %c152 = arith.constant 152 : index
    %c0_130 = arith.constant 0 : index
    %539 = vector.load %arg4[%c152, %c0_130] : memref<296x128xf32, #tpu.memory_space<vmem>>, vector<32x128xf32>
    %c184 = arith.constant 184 : index
    %c0_131 = arith.constant 0 : index
    %540 = vector.load %arg4[%c184, %c0_131] : memref<296x128xf32, #tpu.memory_space<vmem>>, vector<32x128xf32>
    %c216 = arith.constant 216 : index
    %c0_132 = arith.constant 0 : index
    %541 = vector.load %arg4[%c216, %c0_132] : memref<296x128xf32, #tpu.memory_space<vmem>>, vector<32x128xf32>
    %c248 = arith.constant 248 : index
    %c0_133 = arith.constant 0 : index
    %542 = vector.load %arg4[%c248, %c0_133] : memref<296x128xf32, #tpu.memory_space<vmem>>, vector<1x128xf32>
    %c0_134 = arith.constant 0 : index
    %c0_135 = arith.constant 0 : index
    %543 = vector.load %arg2[%c0_134, %c0_135] : memref<24x7xf32, #tpu.memory_space<vmem>>, vector<24x7xf32>
    %cst_136 = arith.constant dense<0.000000e+00> : vector<24x128xf32>
    %544 = tpu.matmul %543, %536, %cst_136 {dimension_numbers = #tpu.dot_dimension_numbers<[1], [0], [0], [1], [0, 0, 1, 1], [], []>} : vector<24x7xf32>, vector<7x128xf32>, vector<24x128xf32> -> vector<24x128xf32>
    %c0_137 = arith.constant 0 : index
    %c0_138 = arith.constant 0 : index
    %545 = vector.load %arg3[%c0_137, %c0_138] : memref<24x4xf32, #tpu.memory_space<vmem>>, vector<24x4xf32>
    %cst_139 = arith.constant dense<0.000000e+00> : vector<24x128xf32>
    %546 = tpu.matmul %545, %537, %cst_139 {dimension_numbers = #tpu.dot_dimension_numbers<[1], [0], [0], [1], [0, 0, 1, 1], [], []>} : vector<24x4xf32>, vector<4x128xf32>, vector<24x128xf32> -> vector<24x128xf32>
    %547 = arith.addf %544, %546 : vector<24x128xf32>
    %548 = vector.broadcast %538 : vector<1x128xf32> to vector<24x128xf32>
    %549 = arith.addf %547, %548 : vector<24x128xf32>
    %c0_140 = arith.constant 0 : index
    %c0_141 = arith.constant 0 : index
    %550 = vector.load %arg6[%c0_140, %c0_141] : memref<24x128xf32, #tpu.memory_space<vmem>>, vector<24x128xf32>
    tpu.vector_store %arg6[%c0_140, %c0_141], %549 {strides = array<i32>} : memref<24x128xf32, #tpu.memory_space<vmem>>, vector<24x128xf32>,
    %cst_142 = arith.constant -1.000000e+00 : f32
    %551 = vector.broadcast %cst_142 : f32 to vector<8x7xf32>
    %c0_143 = arith.constant 0 : index
    %c0_144 = arith.constant 0 : index
    %552 = vector.load %arg5[%c0_143, %c0_144] : memref<32x7xf32, #tpu.memory_space<vmem>>, vector<8x7xf32>
    tpu.vector_store %arg5[%c0_143, %c0_144], %551 {strides = array<i32>} : memref<32x7xf32, #tpu.memory_space<vmem>>, vector<8x7xf32>,
    %c0_i32 = arith.constant 0 : i32
    %c3_i32 = arith.constant 3 : i32
    %553 = arith.addi %c0_i32, %c3_i32 : i32
    %c1_i32 = arith.constant 1 : i32
    %554:4 = scf.for %arg8 = %c0_i32 to %553 step %c1_i32 iter_args(%arg9 = %510, %arg10 = %508, %arg11 = %535, %arg12 = %533) -> (vector<1x32xf32>, vector<1x32xf32>, vector<1x32xf32>, vector<1x32xf32>)  : i32 {
      %c8_i32 = arith.constant 8 : i32
      %563 = arith.muli %arg8, %c8_i32 : i32
      %564 = tpu.assume_multiple %563, 8 : i32
      %565 = arith.index_cast %564 : i32 to index
      %c0_153 = arith.constant 0 : index
      %566 = vector.load %arg6[%565, %c0_153] : memref<24x128xf32, #tpu.memory_space<vmem>>, vector<8x128xf32>
      %cst_154 = arith.constant dense<0.000000e+00> : vector<1x128xf32>
      %567 = tpu.matmul %arg11, %541, %cst_154 {dimension_numbers = #tpu.dot_dimension_numbers<[1], [0], [0], [1], [0, 0, 1, 1], [], []>} : vector<1x32xf32>, vector<32x128xf32>, vector<1x128xf32> -> vector<1x128xf32>
      %568 = vector.extract_strided_slice %566 {offsets = [0, 0], sizes = [1, 128], strides = [1, 1]} : vector<8x128xf32> to vector<1x128xf32>
      %cst_155 = arith.constant dense<0.000000e+00> : vector<1x128xf32>
      %569 = tpu.matmul %arg9, %539, %cst_155 {dimension_numbers = #tpu.dot_dimension_numbers<[1], [0], [0], [1], [0, 0, 1, 1], [], []>} : vector<1x32xf32>, vector<32x128xf32>, vector<1x128xf32> -> vector<1x128xf32>
      %570 = arith.addf %568, %569 : vector<1x128xf32>
      %cst_156 = arith.constant 2.000000e+00 : f32
      %571 = vector.broadcast %cst_156 : f32 to vector<1x128xf32>
      %572 = arith.mulf %570, %571 : vector<1x128xf32>
      %573 = arith.select %5, %572, %570 : vector<1x128xi1>, vector<1x128xf32>
      %574 = arith.negf %573 : vector<1x128xf32>
      %575 = math.exp %574 : vector<1x128xf32>
      %cst_157 = arith.constant 1.000000e+00 : f32
      %576 = vector.broadcast %cst_157 : f32 to vector<1x128xf32>
      %577 = arith.addf %576, %575 : vector<1x128xf32>
      %578 = arith.divf %576, %577 : vector<1x128xf32>
      %cst_158 = arith.constant 2.000000e+00 : f32
      %579 = vector.broadcast %cst_158 : f32 to vector<1x128xf32>
      %580 = arith.mulf %579, %578 : vector<1x128xf32>
      %cst_159 = arith.constant 1.000000e+00 : f32
      %581 = vector.broadcast %cst_159 : f32 to vector<1x128xf32>
      %582 = arith.subf %580, %581 : vector<1x128xf32>
      %583 = arith.select %5, %582, %578 : vector<1x128xi1>, vector<1x128xf32>
      %584 = vector.extract_strided_slice %583 {offsets = [0, 0], sizes = [1, 32], strides = [1, 1]} : vector<1x128xf32> to vector<1x32xf32>
      %585 = vector.extract_strided_slice %583 {offsets = [0, 32], sizes = [1, 32], strides = [1, 1]} : vector<1x128xf32> to vector<1x32xf32>
      %586 = vector.extract_strided_slice %583 {offsets = [0, 64], sizes = [1, 32], strides = [1, 1]} : vector<1x128xf32> to vector<1x32xf32>
      %587 = vector.extract_strided_slice %583 {offsets = [0, 96], sizes = [1, 32], strides = [1, 1]} : vector<1x128xf32> to vector<1x32xf32>
      %588 = arith.mulf %585, %arg10 : vector<1x32xf32>
      %589 = arith.mulf %584, %586 : vector<1x32xf32>
      %590 = arith.addf %588, %589 : vector<1x32xf32>
      %591 = math.tanh %590 : vector<1x32xf32>
      %592 = arith.mulf %587, %591 : vector<1x32xf32>
      %cst_160 = arith.constant dense<0.000000e+00> : vector<1x128xf32>
      %593 = tpu.matmul %592, %540, %cst_160 {dimension_numbers = #tpu.dot_dimension_numbers<[1], [0], [0], [1], [0, 0, 1, 1], [], []>} : vector<1x32xf32>, vector<32x128xf32>, vector<1x128xf32> -> vector<1x128xf32>
      %594 = arith.addf %593, %567 : vector<1x128xf32>
      %595 = arith.addf %594, %542 : vector<1x128xf32>
      %cst_161 = arith.constant 2.000000e+00 : f32
      %596 = vector.broadcast %cst_161 : f32 to vector<1x128xf32>
      %597 = arith.mulf %595, %596 : vector<1x128xf32>
      %598 = arith.select %5, %597, %595 : vector<1x128xi1>, vector<1x128xf32>
      %599 = arith.negf %598 : vector<1x128xf32>
      %600 = math.exp %599 : vector<1x128xf32>
      %cst_162 = arith.constant 1.000000e+00 : f32
      %601 = vector.broadcast %cst_162 : f32 to vector<1x128xf32>
      %602 = arith.addf %601, %600 : vector<1x128xf32>
      %603 = arith.divf %601, %602 : vector<1x128xf32>
      %cst_163 = arith.constant 2.000000e+00 : f32
      %604 = vector.broadcast %cst_163 : f32 to vector<1x128xf32>
      %605 = arith.mulf %604, %603 : vector<1x128xf32>
      %cst_164 = arith.constant 1.000000e+00 : f32
      %606 = vector.broadcast %cst_164 : f32 to vector<1x128xf32>
      %607 = arith.subf %605, %606 : vector<1x128xf32>
      %608 = arith.select %5, %607, %603 : vector<1x128xi1>, vector<1x128xf32>
      %609 = vector.extract_strided_slice %608 {offsets = [0, 0], sizes = [1, 32], strides = [1, 1]} : vector<1x128xf32> to vector<1x32xf32>
      %610 = vector.extract_strided_slice %608 {offsets = [0, 32], sizes = [1, 32], strides = [1, 1]} : vector<1x128xf32> to vector<1x32xf32>
      %611 = vector.extract_strided_slice %608 {offsets = [0, 64], sizes = [1, 32], strides = [1, 1]} : vector<1x128xf32> to vector<1x32xf32>
      %612 = vector.extract_strided_slice %608 {offsets = [0, 96], sizes = [1, 32], strides = [1, 1]} : vector<1x128xf32> to vector<1x32xf32>
      %613 = arith.mulf %610, %arg12 : vector<1x32xf32>
      %614 = arith.mulf %609, %611 : vector<1x32xf32>
      %615 = arith.addf %613, %614 : vector<1x32xf32>
      %616 = math.tanh %615 : vector<1x32xf32>
      %617 = arith.mulf %612, %616 : vector<1x32xf32>
      %cst_165 = arith.constant dense<0.000000e+00> : vector<1x128xf32>
      %618 = tpu.matmul %617, %541, %cst_165 {dimension_numbers = #tpu.dot_dimension_numbers<[1], [0], [0], [1], [0, 0, 1, 1], [], []>} : vector<1x32xf32>, vector<32x128xf32>, vector<1x128xf32> -> vector<1x128xf32>
      %619 = vector.extract_strided_slice %566 {offsets = [1, 0], sizes = [1, 128], strides = [1, 1]} : vector<8x128xf32> to vector<1x128xf32>
      %cst_166 = arith.constant dense<0.000000e+00> : vector<1x128xf32>
      %620 = tpu.matmul %592, %539, %cst_166 {dimension_numbers = #tpu.dot_dimension_numbers<[1], [0], [0], [1], [0, 0, 1, 1], [], []>} : vector<1x32xf32>, vector<32x128xf32>, vector<1x128xf32> -> vector<1x128xf32>
      %621 = arith.addf %619, %620 : vector<1x128xf32>
      %cst_167 = arith.constant 2.000000e+00 : f32
      %622 = vector.broadcast %cst_167 : f32 to vector<1x128xf32>
      %623 = arith.mulf %621, %622 : vector<1x128xf32>
      %624 = arith.select %5, %623, %621 : vector<1x128xi1>, vector<1x128xf32>
      %625 = arith.negf %624 : vector<1x128xf32>
      %626 = math.exp %625 : vector<1x128xf32>
      %cst_168 = arith.constant 1.000000e+00 : f32
      %627 = vector.broadcast %cst_168 : f32 to vector<1x128xf32>
      %628 = arith.addf %627, %626 : vector<1x128xf32>
      %629 = arith.divf %627, %628 : vector<1x128xf32>
      %cst_169 = arith.constant 2.000000e+00 : f32
      %630 = vector.broadcast %cst_169 : f32 to vector<1x128xf32>
      %631 = arith.mulf %630, %629 : vector<1x128xf32>
      %cst_170 = arith.constant 1.000000e+00 : f32
      %632 = vector.broadcast %cst_170 : f32 to vector<1x128xf32>
      %633 = arith.subf %631, %632 : vector<1x128xf32>
      %634 = arith.select %5, %633, %629 : vector<1x128xi1>, vector<1x128xf32>
      %635 = vector.extract_strided_slice %634 {offsets = [0, 0], sizes = [1, 32], strides = [1, 1]} : vector<1x128xf32> to vector<1x32xf32>
      %636 = vector.extract_strided_slice %634 {offsets = [0, 32], sizes = [1, 32], strides = [1, 1]} : vector<1x128xf32> to vector<1x32xf32>
      %637 = vector.extract_strided_slice %634 {offsets = [0, 64], sizes = [1, 32], strides = [1, 1]} : vector<1x128xf32> to vector<1x32xf32>
      %638 = vector.extract_strided_slice %634 {offsets = [0, 96], sizes = [1, 32], strides = [1, 1]} : vector<1x128xf32> to vector<1x32xf32>
      %639 = arith.mulf %636, %590 : vector<1x32xf32>
      %640 = arith.mulf %635, %637 : vector<1x32xf32>
      %641 = arith.addf %639, %640 : vector<1x32xf32>
      %642 = math.tanh %641 : vector<1x32xf32>
      %643 = arith.mulf %638, %642 : vector<1x32xf32>
      %cst_171 = arith.constant dense<0.000000e+00> : vector<1x128xf32>
      %644 = tpu.matmul %643, %540, %cst_171 {dimension_numbers = #tpu.dot_dimension_numbers<[1], [0], [0], [1], [0, 0, 1, 1], [], []>} : vector<1x32xf32>, vector<32x128xf32>, vector<1x128xf32> -> vector<1x128xf32>
      %645 = arith.addf %644, %618 : vector<1x128xf32>
      %646 = arith.addf %645, %542 : vector<1x128xf32>
      %cst_172 = arith.constant 2.000000e+00 : f32
      %647 = vector.broadcast %cst_172 : f32 to vector<1x128xf32>
      %648 = arith.mulf %646, %647 : vector<1x128xf32>
      %649 = arith.select %5, %648, %646 : vector<1x128xi1>, vector<1x128xf32>
      %650 = arith.negf %649 : vector<1x128xf32>
      %651 = math.exp %650 : vector<1x128xf32>
      %cst_173 = arith.constant 1.000000e+00 : f32
      %652 = vector.broadcast %cst_173 : f32 to vector<1x128xf32>
      %653 = arith.addf %652, %651 : vector<1x128xf32>
      %654 = arith.divf %652, %653 : vector<1x128xf32>
      %cst_174 = arith.constant 2.000000e+00 : f32
      %655 = vector.broadcast %cst_174 : f32 to vector<1x128xf32>
      %656 = arith.mulf %655, %654 : vector<1x128xf32>
      %cst_175 = arith.constant 1.000000e+00 : f32
      %657 = vector.broadcast %cst_175 : f32 to vector<1x128xf32>
      %658 = arith.subf %656, %657 : vector<1x128xf32>
      %659 = arith.select %5, %658, %654 : vector<1x128xi1>, vector<1x128xf32>
      %660 = vector.extract_strided_slice %659 {offsets = [0, 0], sizes = [1, 32], strides = [1, 1]} : vector<1x128xf32> to vector<1x32xf32>
      %661 = vector.extract_strided_slice %659 {offsets = [0, 32], sizes = [1, 32], strides = [1, 1]} : vector<1x128xf32> to vector<1x32xf32>
      %662 = vector.extract_strided_slice %659 {offsets = [0, 64], sizes = [1, 32], strides = [1, 1]} : vector<1x128xf32> to vector<1x32xf32>
      %663 = vector.extract_strided_slice %659 {offsets = [0, 96], sizes = [1, 32], strides = [1, 1]} : vector<1x128xf32> to vector<1x32xf32>
      %664 = arith.mulf %661, %615 : vector<1x32xf32>
      %665 = arith.mulf %660, %662 : vector<1x32xf32>
      %666 = arith.addf %664, %665 : vector<1x32xf32>
      %667 = math.tanh %666 : vector<1x32xf32>
      %668 = arith.mulf %663, %667 : vector<1x32xf32>
      %cst_176 = arith.constant dense<0.000000e+00> : vector<1x128xf32>
      %669 = tpu.matmul %668, %541, %cst_176 {dimension_numbers = #tpu.dot_dimension_numbers<[1], [0], [0], [1], [0, 0, 1, 1], [], []>} : vector<1x32xf32>, vector<32x128xf32>, vector<1x128xf32> -> vector<1x128xf32>
      %670 = vector.extract_strided_slice %566 {offsets = [2, 0], sizes = [1, 128], strides = [1, 1]} : vector<8x128xf32> to vector<1x128xf32>
      %cst_177 = arith.constant dense<0.000000e+00> : vector<1x128xf32>
      %671 = tpu.matmul %643, %539, %cst_177 {dimension_numbers = #tpu.dot_dimension_numbers<[1], [0], [0], [1], [0, 0, 1, 1], [], []>} : vector<1x32xf32>, vector<32x128xf32>, vector<1x128xf32> -> vector<1x128xf32>
      %672 = arith.addf %670, %671 : vector<1x128xf32>
      %cst_178 = arith.constant 2.000000e+00 : f32
      %673 = vector.broadcast %cst_178 : f32 to vector<1x128xf32>
      %674 = arith.mulf %672, %673 : vector<1x128xf32>
      %675 = arith.select %5, %674, %672 : vector<1x128xi1>, vector<1x128xf32>
      %676 = arith.negf %675 : vector<1x128xf32>
      %677 = math.exp %676 : vector<1x128xf32>
      %cst_179 = arith.constant 1.000000e+00 : f32
      %678 = vector.broadcast %cst_179 : f32 to vector<1x128xf32>
      %679 = arith.addf %678, %677 : vector<1x128xf32>
      %680 = arith.divf %678, %679 : vector<1x128xf32>
      %cst_180 = arith.constant 2.000000e+00 : f32
      %681 = vector.broadcast %cst_180 : f32 to vector<1x128xf32>
      %682 = arith.mulf %681, %680 : vector<1x128xf32>
      %cst_181 = arith.constant 1.000000e+00 : f32
      %683 = vector.broadcast %cst_181 : f32 to vector<1x128xf32>
      %684 = arith.subf %682, %683 : vector<1x128xf32>
      %685 = arith.select %5, %684, %680 : vector<1x128xi1>, vector<1x128xf32>
      %686 = vector.extract_strided_slice %685 {offsets = [0, 0], sizes = [1, 32], strides = [1, 1]} : vector<1x128xf32> to vector<1x32xf32>
      %687 = vector.extract_strided_slice %685 {offsets = [0, 32], sizes = [1, 32], strides = [1, 1]} : vector<1x128xf32> to vector<1x32xf32>
      %688 = vector.extract_strided_slice %685 {offsets = [0, 64], sizes = [1, 32], strides = [1, 1]} : vector<1x128xf32> to vector<1x32xf32>
      %689 = vector.extract_strided_slice %685 {offsets = [0, 96], sizes = [1, 32], strides = [1, 1]} : vector<1x128xf32> to vector<1x32xf32>
      %690 = arith.mulf %687, %641 : vector<1x32xf32>
      %691 = arith.mulf %686, %688 : vector<1x32xf32>
      %692 = arith.addf %690, %691 : vector<1x32xf32>
      %693 = math.tanh %692 : vector<1x32xf32>
      %694 = arith.mulf %689, %693 : vector<1x32xf32>
      %cst_182 = arith.constant dense<0.000000e+00> : vector<1x128xf32>
      %695 = tpu.matmul %694, %540, %cst_182 {dimension_numbers = #tpu.dot_dimension_numbers<[1], [0], [0], [1], [0, 0, 1, 1], [], []>} : vector<1x32xf32>, vector<32x128xf32>, vector<1x128xf32> -> vector<1x128xf32>
      %696 = arith.addf %695, %669 : vector<1x128xf32>
      %697 = arith.addf %696, %542 : vector<1x128xf32>
      %cst_183 = arith.constant 2.000000e+00 : f32
      %698 = vector.broadcast %cst_183 : f32 to vector<1x128xf32>
      %699 = arith.mulf %697, %698 : vector<1x128xf32>
      %700 = arith.select %5, %699, %697 : vector<1x128xi1>, vector<1x128xf32>
      %701 = arith.negf %700 : vector<1x128xf32>
      %702 = math.exp %701 : vector<1x128xf32>
      %cst_184 = arith.constant 1.000000e+00 : f32
      %703 = vector.broadcast %cst_184 : f32 to vector<1x128xf32>
      %704 = arith.addf %703, %702 : vector<1x128xf32>
      %705 = arith.divf %703, %704 : vector<1x128xf32>
      %cst_185 = arith.constant 2.000000e+00 : f32
      %706 = vector.broadcast %cst_185 : f32 to vector<1x128xf32>
      %707 = arith.mulf %706, %705 : vector<1x128xf32>
      %cst_186 = arith.constant 1.000000e+00 : f32
      %708 = vector.broadcast %cst_186 : f32 to vector<1x128xf32>
      %709 = arith.subf %707, %708 : vector<1x128xf32>
      %710 = arith.select %5, %709, %705 : vector<1x128xi1>, vector<1x128xf32>
      %711 = vector.extract_strided_slice %710 {offsets = [0, 0], sizes = [1, 32], strides = [1, 1]} : vector<1x128xf32> to vector<1x32xf32>
      %712 = vector.extract_strided_slice %710 {offsets = [0, 32], sizes = [1, 32], strides = [1, 1]} : vector<1x128xf32> to vector<1x32xf32>
      %713 = vector.extract_strided_slice %710 {offsets = [0, 64], sizes = [1, 32], strides = [1, 1]} : vector<1x128xf32> to vector<1x32xf32>
      %714 = vector.extract_strided_slice %710 {offsets = [0, 96], sizes = [1, 32], strides = [1, 1]} : vector<1x128xf32> to vector<1x32xf32>
      %715 = arith.mulf %712, %666 : vector<1x32xf32>
      %716 = arith.mulf %711, %713 : vector<1x32xf32>
      %717 = arith.addf %715, %716 : vector<1x32xf32>
      %718 = math.tanh %717 : vector<1x32xf32>
      %719 = arith.mulf %714, %718 : vector<1x32xf32>
      %cst_187 = arith.constant dense<0.000000e+00> : vector<1x128xf32>
      %720 = tpu.matmul %719, %541, %cst_187 {dimension_numbers = #tpu.dot_dimension_numbers<[1], [0], [0], [1], [0, 0, 1, 1], [], []>} : vector<1x32xf32>, vector<32x128xf32>, vector<1x128xf32> -> vector<1x128xf32>
      %721 = vector.extract_strided_slice %566 {offsets = [3, 0], sizes = [1, 128], strides = [1, 1]} : vector<8x128xf32> to vector<1x128xf32>
      %cst_188 = arith.constant dense<0.000000e+00> : vector<1x128xf32>
      %722 = tpu.matmul %694, %539, %cst_188 {dimension_numbers = #tpu.dot_dimension_numbers<[1], [0], [0], [1], [0, 0, 1, 1], [], []>} : vector<1x32xf32>, vector<32x128xf32>, vector<1x128xf32> -> vector<1x128xf32>
      %723 = arith.addf %721, %722 : vector<1x128xf32>
      %cst_189 = arith.constant 2.000000e+00 : f32
      %724 = vector.broadcast %cst_189 : f32 to vector<1x128xf32>
      %725 = arith.mulf %723, %724 : vector<1x128xf32>
      %726 = arith.select %5, %725, %723 : vector<1x128xi1>, vector<1x128xf32>
      %727 = arith.negf %726 : vector<1x128xf32>
      %728 = math.exp %727 : vector<1x128xf32>
      %cst_190 = arith.constant 1.000000e+00 : f32
      %729 = vector.broadcast %cst_190 : f32 to vector<1x128xf32>
      %730 = arith.addf %729, %728 : vector<1x128xf32>
      %731 = arith.divf %729, %730 : vector<1x128xf32>
      %cst_191 = arith.constant 2.000000e+00 : f32
      %732 = vector.broadcast %cst_191 : f32 to vector<1x128xf32>
      %733 = arith.mulf %732, %731 : vector<1x128xf32>
      %cst_192 = arith.constant 1.000000e+00 : f32
      %734 = vector.broadcast %cst_192 : f32 to vector<1x128xf32>
      %735 = arith.subf %733, %734 : vector<1x128xf32>
      %736 = arith.select %5, %735, %731 : vector<1x128xi1>, vector<1x128xf32>
      %737 = vector.extract_strided_slice %736 {offsets = [0, 0], sizes = [1, 32], strides = [1, 1]} : vector<1x128xf32> to vector<1x32xf32>
      %738 = vector.extract_strided_slice %736 {offsets = [0, 32], sizes = [1, 32], strides = [1, 1]} : vector<1x128xf32> to vector<1x32xf32>
      %739 = vector.extract_strided_slice %736 {offsets = [0, 64], sizes = [1, 32], strides = [1, 1]} : vector<1x128xf32> to vector<1x32xf32>
      %740 = vector.extract_strided_slice %736 {offsets = [0, 96], sizes = [1, 32], strides = [1, 1]} : vector<1x128xf32> to vector<1x32xf32>
      %741 = arith.mulf %738, %692 : vector<1x32xf32>
      %742 = arith.mulf %737, %739 : vector<1x32xf32>
      %743 = arith.addf %741, %742 : vector<1x32xf32>
      %744 = math.tanh %743 : vector<1x32xf32>
      %745 = arith.mulf %740, %744 : vector<1x32xf32>
      %cst_193 = arith.constant dense<0.000000e+00> : vector<1x128xf32>
      %746 = tpu.matmul %745, %540, %cst_193 {dimension_numbers = #tpu.dot_dimension_numbers<[1], [0], [0], [1], [0, 0, 1, 1], [], []>} : vector<1x32xf32>, vector<32x128xf32>, vector<1x128xf32> -> vector<1x128xf32>
      %747 = arith.addf %746, %720 : vector<1x128xf32>
      %748 = arith.addf %747, %542 : vector<1x128xf32>
      %cst_194 = arith.constant 2.000000e+00 : f32
      %749 = vector.broadcast %cst_194 : f32 to vector<1x128xf32>
      %750 = arith.mulf %748, %749 : vector<1x128xf32>
      %751 = arith.select %5, %750, %748 : vector<1x128xi1>, vector<1x128xf32>
      %752 = arith.negf %751 : vector<1x128xf32>
      %753 = math.exp %752 : vector<1x128xf32>
      %cst_195 = arith.constant 1.000000e+00 : f32
      %754 = vector.broadcast %cst_195 : f32 to vector<1x128xf32>
      %755 = arith.addf %754, %753 : vector<1x128xf32>
      %756 = arith.divf %754, %755 : vector<1x128xf32>
      %cst_196 = arith.constant 2.000000e+00 : f32
      %757 = vector.broadcast %cst_196 : f32 to vector<1x128xf32>
      %758 = arith.mulf %757, %756 : vector<1x128xf32>
      %cst_197 = arith.constant 1.000000e+00 : f32
      %759 = vector.broadcast %cst_197 : f32 to vector<1x128xf32>
      %760 = arith.subf %758, %759 : vector<1x128xf32>
      %761 = arith.select %5, %760, %756 : vector<1x128xi1>, vector<1x128xf32>
      %762 = vector.extract_strided_slice %761 {offsets = [0, 0], sizes = [1, 32], strides = [1, 1]} : vector<1x128xf32> to vector<1x32xf32>
      %763 = vector.extract_strided_slice %761 {offsets = [0, 32], sizes = [1, 32], strides = [1, 1]} : vector<1x128xf32> to vector<1x32xf32>
      %764 = vector.extract_strided_slice %761 {offsets = [0, 64], sizes = [1, 32], strides = [1, 1]} : vector<1x128xf32> to vector<1x32xf32>
      %765 = vector.extract_strided_slice %761 {offsets = [0, 96], sizes = [1, 32], strides = [1, 1]} : vector<1x128xf32> to vector<1x32xf32>
      %766 = arith.mulf %763, %717 : vector<1x32xf32>
      %767 = arith.mulf %762, %764 : vector<1x32xf32>
      %768 = arith.addf %766, %767 : vector<1x32xf32>
      %769 = math.tanh %768 : vector<1x32xf32>
      %770 = arith.mulf %765, %769 : vector<1x32xf32>
      %cst_198 = arith.constant dense<0.000000e+00> : vector<1x128xf32>
      %771 = tpu.matmul %770, %541, %cst_198 {dimension_numbers = #tpu.dot_dimension_numbers<[1], [0], [0], [1], [0, 0, 1, 1], [], []>} : vector<1x32xf32>, vector<32x128xf32>, vector<1x128xf32> -> vector<1x128xf32>
      %772 = vector.extract_strided_slice %566 {offsets = [4, 0], sizes = [1, 128], strides = [1, 1]} : vector<8x128xf32> to vector<1x128xf32>
      %cst_199 = arith.constant dense<0.000000e+00> : vector<1x128xf32>
      %773 = tpu.matmul %745, %539, %cst_199 {dimension_numbers = #tpu.dot_dimension_numbers<[1], [0], [0], [1], [0, 0, 1, 1], [], []>} : vector<1x32xf32>, vector<32x128xf32>, vector<1x128xf32> -> vector<1x128xf32>
      %774 = arith.addf %772, %773 : vector<1x128xf32>
      %cst_200 = arith.constant 2.000000e+00 : f32
      %775 = vector.broadcast %cst_200 : f32 to vector<1x128xf32>
      %776 = arith.mulf %774, %775 : vector<1x128xf32>
      %777 = arith.select %5, %776, %774 : vector<1x128xi1>, vector<1x128xf32>
      %778 = arith.negf %777 : vector<1x128xf32>
      %779 = math.exp %778 : vector<1x128xf32>
      %cst_201 = arith.constant 1.000000e+00 : f32
      %780 = vector.broadcast %cst_201 : f32 to vector<1x128xf32>
      %781 = arith.addf %780, %779 : vector<1x128xf32>
      %782 = arith.divf %780, %781 : vector<1x128xf32>
      %cst_202 = arith.constant 2.000000e+00 : f32
      %783 = vector.broadcast %cst_202 : f32 to vector<1x128xf32>
      %784 = arith.mulf %783, %782 : vector<1x128xf32>
      %cst_203 = arith.constant 1.000000e+00 : f32
      %785 = vector.broadcast %cst_203 : f32 to vector<1x128xf32>
      %786 = arith.subf %784, %785 : vector<1x128xf32>
      %787 = arith.select %5, %786, %782 : vector<1x128xi1>, vector<1x128xf32>
      %788 = vector.extract_strided_slice %787 {offsets = [0, 0], sizes = [1, 32], strides = [1, 1]} : vector<1x128xf32> to vector<1x32xf32>
      %789 = vector.extract_strided_slice %787 {offsets = [0, 32], sizes = [1, 32], strides = [1, 1]} : vector<1x128xf32> to vector<1x32xf32>
      %790 = vector.extract_strided_slice %787 {offsets = [0, 64], sizes = [1, 32], strides = [1, 1]} : vector<1x128xf32> to vector<1x32xf32>
      %791 = vector.extract_strided_slice %787 {offsets = [0, 96], sizes = [1, 32], strides = [1, 1]} : vector<1x128xf32> to vector<1x32xf32>
      %792 = arith.mulf %789, %743 : vector<1x32xf32>
      %793 = arith.mulf %788, %790 : vector<1x32xf32>
      %794 = arith.addf %792, %793 : vector<1x32xf32>
      %795 = math.tanh %794 : vector<1x32xf32>
      %796 = arith.mulf %791, %795 : vector<1x32xf32>
      %cst_204 = arith.constant dense<0.000000e+00> : vector<1x128xf32>
      %797 = tpu.matmul %796, %540, %cst_204 {dimension_numbers = #tpu.dot_dimension_numbers<[1], [0], [0], [1], [0, 0, 1, 1], [], []>} : vector<1x32xf32>, vector<32x128xf32>, vector<1x128xf32> -> vector<1x128xf32>
      %798 = arith.addf %797, %771 : vector<1x128xf32>
      %799 = arith.addf %798, %542 : vector<1x128xf32>
      %cst_205 = arith.constant 2.000000e+00 : f32
      %800 = vector.broadcast %cst_205 : f32 to vector<1x128xf32>
      %801 = arith.mulf %799, %800 : vector<1x128xf32>
      %802 = arith.select %5, %801, %799 : vector<1x128xi1>, vector<1x128xf32>
      %803 = arith.negf %802 : vector<1x128xf32>
      %804 = math.exp %803 : vector<1x128xf32>
      %cst_206 = arith.constant 1.000000e+00 : f32
      %805 = vector.broadcast %cst_206 : f32 to vector<1x128xf32>
      %806 = arith.addf %805, %804 : vector<1x128xf32>
      %807 = arith.divf %805, %806 : vector<1x128xf32>
      %cst_207 = arith.constant 2.000000e+00 : f32
      %808 = vector.broadcast %cst_207 : f32 to vector<1x128xf32>
      %809 = arith.mulf %808, %807 : vector<1x128xf32>
      %cst_208 = arith.constant 1.000000e+00 : f32
      %810 = vector.broadcast %cst_208 : f32 to vector<1x128xf32>
      %811 = arith.subf %809, %810 : vector<1x128xf32>
      %812 = arith.select %5, %811, %807 : vector<1x128xi1>, vector<1x128xf32>
      %813 = vector.extract_strided_slice %812 {offsets = [0, 0], sizes = [1, 32], strides = [1, 1]} : vector<1x128xf32> to vector<1x32xf32>
      %814 = vector.extract_strided_slice %812 {offsets = [0, 32], sizes = [1, 32], strides = [1, 1]} : vector<1x128xf32> to vector<1x32xf32>
      %815 = vector.extract_strided_slice %812 {offsets = [0, 64], sizes = [1, 32], strides = [1, 1]} : vector<1x128xf32> to vector<1x32xf32>
      %816 = vector.extract_strided_slice %812 {offsets = [0, 96], sizes = [1, 32], strides = [1, 1]} : vector<1x128xf32> to vector<1x32xf32>
      %817 = arith.mulf %814, %768 : vector<1x32xf32>
      %818 = arith.mulf %813, %815 : vector<1x32xf32>
      %819 = arith.addf %817, %818 : vector<1x32xf32>
      %820 = math.tanh %819 : vector<1x32xf32>
      %821 = arith.mulf %816, %820 : vector<1x32xf32>
      %cst_209 = arith.constant dense<0.000000e+00> : vector<1x128xf32>
      %822 = tpu.matmul %821, %541, %cst_209 {dimension_numbers = #tpu.dot_dimension_numbers<[1], [0], [0], [1], [0, 0, 1, 1], [], []>} : vector<1x32xf32>, vector<32x128xf32>, vector<1x128xf32> -> vector<1x128xf32>
      %823 = vector.extract_strided_slice %566 {offsets = [5, 0], sizes = [1, 128], strides = [1, 1]} : vector<8x128xf32> to vector<1x128xf32>
      %cst_210 = arith.constant dense<0.000000e+00> : vector<1x128xf32>
      %824 = tpu.matmul %796, %539, %cst_210 {dimension_numbers = #tpu.dot_dimension_numbers<[1], [0], [0], [1], [0, 0, 1, 1], [], []>} : vector<1x32xf32>, vector<32x128xf32>, vector<1x128xf32> -> vector<1x128xf32>
      %825 = arith.addf %823, %824 : vector<1x128xf32>
      %cst_211 = arith.constant 2.000000e+00 : f32
      %826 = vector.broadcast %cst_211 : f32 to vector<1x128xf32>
      %827 = arith.mulf %825, %826 : vector<1x128xf32>
      %828 = arith.select %5, %827, %825 : vector<1x128xi1>, vector<1x128xf32>
      %829 = arith.negf %828 : vector<1x128xf32>
      %830 = math.exp %829 : vector<1x128xf32>
      %cst_212 = arith.constant 1.000000e+00 : f32
      %831 = vector.broadcast %cst_212 : f32 to vector<1x128xf32>
      %832 = arith.addf %831, %830 : vector<1x128xf32>
      %833 = arith.divf %831, %832 : vector<1x128xf32>
      %cst_213 = arith.constant 2.000000e+00 : f32
      %834 = vector.broadcast %cst_213 : f32 to vector<1x128xf32>
      %835 = arith.mulf %834, %833 : vector<1x128xf32>
      %cst_214 = arith.constant 1.000000e+00 : f32
      %836 = vector.broadcast %cst_214 : f32 to vector<1x128xf32>
      %837 = arith.subf %835, %836 : vector<1x128xf32>
      %838 = arith.select %5, %837, %833 : vector<1x128xi1>, vector<1x128xf32>
      %839 = vector.extract_strided_slice %838 {offsets = [0, 0], sizes = [1, 32], strides = [1, 1]} : vector<1x128xf32> to vector<1x32xf32>
      %840 = vector.extract_strided_slice %838 {offsets = [0, 32], sizes = [1, 32], strides = [1, 1]} : vector<1x128xf32> to vector<1x32xf32>
      %841 = vector.extract_strided_slice %838 {offsets = [0, 64], sizes = [1, 32], strides = [1, 1]} : vector<1x128xf32> to vector<1x32xf32>
      %842 = vector.extract_strided_slice %838 {offsets = [0, 96], sizes = [1, 32], strides = [1, 1]} : vector<1x128xf32> to vector<1x32xf32>
      %843 = arith.mulf %840, %794 : vector<1x32xf32>
      %844 = arith.mulf %839, %841 : vector<1x32xf32>
      %845 = arith.addf %843, %844 : vector<1x32xf32>
      %846 = math.tanh %845 : vector<1x32xf32>
      %847 = arith.mulf %842, %846 : vector<1x32xf32>
      %cst_215 = arith.constant dense<0.000000e+00> : vector<1x128xf32>
      %848 = tpu.matmul %847, %540, %cst_215 {dimension_numbers = #tpu.dot_dimension_numbers<[1], [0], [0], [1], [0, 0, 1, 1], [], []>} : vector<1x32xf32>, vector<32x128xf32>, vector<1x128xf32> -> vector<1x128xf32>
      %849 = arith.addf %848, %822 : vector<1x128xf32>
      %850 = arith.addf %849, %542 : vector<1x128xf32>
      %cst_216 = arith.constant 2.000000e+00 : f32
      %851 = vector.broadcast %cst_216 : f32 to vector<1x128xf32>
      %852 = arith.mulf %850, %851 : vector<1x128xf32>
      %853 = arith.select %5, %852, %850 : vector<1x128xi1>, vector<1x128xf32>
      %854 = arith.negf %853 : vector<1x128xf32>
      %855 = math.exp %854 : vector<1x128xf32>
      %cst_217 = arith.constant 1.000000e+00 : f32
      %856 = vector.broadcast %cst_217 : f32 to vector<1x128xf32>
      %857 = arith.addf %856, %855 : vector<1x128xf32>
      %858 = arith.divf %856, %857 : vector<1x128xf32>
      %cst_218 = arith.constant 2.000000e+00 : f32
      %859 = vector.broadcast %cst_218 : f32 to vector<1x128xf32>
      %860 = arith.mulf %859, %858 : vector<1x128xf32>
      %cst_219 = arith.constant 1.000000e+00 : f32
      %861 = vector.broadcast %cst_219 : f32 to vector<1x128xf32>
      %862 = arith.subf %860, %861 : vector<1x128xf32>
      %863 = arith.select %5, %862, %858 : vector<1x128xi1>, vector<1x128xf32>
      %864 = vector.extract_strided_slice %863 {offsets = [0, 0], sizes = [1, 32], strides = [1, 1]} : vector<1x128xf32> to vector<1x32xf32>
      %865 = vector.extract_strided_slice %863 {offsets = [0, 32], sizes = [1, 32], strides = [1, 1]} : vector<1x128xf32> to vector<1x32xf32>
      %866 = vector.extract_strided_slice %863 {offsets = [0, 64], sizes = [1, 32], strides = [1, 1]} : vector<1x128xf32> to vector<1x32xf32>
      %867 = vector.extract_strided_slice %863 {offsets = [0, 96], sizes = [1, 32], strides = [1, 1]} : vector<1x128xf32> to vector<1x32xf32>
      %868 = arith.mulf %865, %819 : vector<1x32xf32>
      %869 = arith.mulf %864, %866 : vector<1x32xf32>
      %870 = arith.addf %868, %869 : vector<1x32xf32>
      %871 = math.tanh %870 : vector<1x32xf32>
      %872 = arith.mulf %867, %871 : vector<1x32xf32>
      %cst_220 = arith.constant dense<0.000000e+00> : vector<1x128xf32>
      %873 = tpu.matmul %872, %541, %cst_220 {dimension_numbers = #tpu.dot_dimension_numbers<[1], [0], [0], [1], [0, 0, 1, 1], [], []>} : vector<1x32xf32>, vector<32x128xf32>, vector<1x128xf32> -> vector<1x128xf32>
      %874 = vector.extract_strided_slice %566 {offsets = [6, 0], sizes = [1, 128], strides = [1, 1]} : vector<8x128xf32> to vector<1x128xf32>
      %cst_221 = arith.constant dense<0.000000e+00> : vector<1x128xf32>
      %875 = tpu.matmul %847, %539, %cst_221 {dimension_numbers = #tpu.dot_dimension_numbers<[1], [0], [0], [1], [0, 0, 1, 1], [], []>} : vector<1x32xf32>, vector<32x128xf32>, vector<1x128xf32> -> vector<1x128xf32>
      %876 = arith.addf %874, %875 : vector<1x128xf32>
      %cst_222 = arith.constant 2.000000e+00 : f32
      %877 = vector.broadcast %cst_222 : f32 to vector<1x128xf32>
      %878 = arith.mulf %876, %877 : vector<1x128xf32>
      %879 = arith.select %5, %878, %876 : vector<1x128xi1>, vector<1x128xf32>
      %880 = arith.negf %879 : vector<1x128xf32>
      %881 = math.exp %880 : vector<1x128xf32>
      %cst_223 = arith.constant 1.000000e+00 : f32
      %882 = vector.broadcast %cst_223 : f32 to vector<1x128xf32>
      %883 = arith.addf %882, %881 : vector<1x128xf32>
      %884 = arith.divf %882, %883 : vector<1x128xf32>
      %cst_224 = arith.constant 2.000000e+00 : f32
      %885 = vector.broadcast %cst_224 : f32 to vector<1x128xf32>
      %886 = arith.mulf %885, %884 : vector<1x128xf32>
      %cst_225 = arith.constant 1.000000e+00 : f32
      %887 = vector.broadcast %cst_225 : f32 to vector<1x128xf32>
      %888 = arith.subf %886, %887 : vector<1x128xf32>
      %889 = arith.select %5, %888, %884 : vector<1x128xi1>, vector<1x128xf32>
      %890 = vector.extract_strided_slice %889 {offsets = [0, 0], sizes = [1, 32], strides = [1, 1]} : vector<1x128xf32> to vector<1x32xf32>
      %891 = vector.extract_strided_slice %889 {offsets = [0, 32], sizes = [1, 32], strides = [1, 1]} : vector<1x128xf32> to vector<1x32xf32>
      %892 = vector.extract_strided_slice %889 {offsets = [0, 64], sizes = [1, 32], strides = [1, 1]} : vector<1x128xf32> to vector<1x32xf32>
      %893 = vector.extract_strided_slice %889 {offsets = [0, 96], sizes = [1, 32], strides = [1, 1]} : vector<1x128xf32> to vector<1x32xf32>
      %894 = arith.mulf %891, %845 : vector<1x32xf32>
      %895 = arith.mulf %890, %892 : vector<1x32xf32>
      %896 = arith.addf %894, %895 : vector<1x32xf32>
      %897 = math.tanh %896 : vector<1x32xf32>
      %898 = arith.mulf %893, %897 : vector<1x32xf32>
      %cst_226 = arith.constant dense<0.000000e+00> : vector<1x128xf32>
      %899 = tpu.matmul %898, %540, %cst_226 {dimension_numbers = #tpu.dot_dimension_numbers<[1], [0], [0], [1], [0, 0, 1, 1], [], []>} : vector<1x32xf32>, vector<32x128xf32>, vector<1x128xf32> -> vector<1x128xf32>
      %900 = arith.addf %899, %873 : vector<1x128xf32>
      %901 = arith.addf %900, %542 : vector<1x128xf32>
      %cst_227 = arith.constant 2.000000e+00 : f32
      %902 = vector.broadcast %cst_227 : f32 to vector<1x128xf32>
      %903 = arith.mulf %901, %902 : vector<1x128xf32>
      %904 = arith.select %5, %903, %901 : vector<1x128xi1>, vector<1x128xf32>
      %905 = arith.negf %904 : vector<1x128xf32>
      %906 = math.exp %905 : vector<1x128xf32>
      %cst_228 = arith.constant 1.000000e+00 : f32
      %907 = vector.broadcast %cst_228 : f32 to vector<1x128xf32>
      %908 = arith.addf %907, %906 : vector<1x128xf32>
      %909 = arith.divf %907, %908 : vector<1x128xf32>
      %cst_229 = arith.constant 2.000000e+00 : f32
      %910 = vector.broadcast %cst_229 : f32 to vector<1x128xf32>
      %911 = arith.mulf %910, %909 : vector<1x128xf32>
      %cst_230 = arith.constant 1.000000e+00 : f32
      %912 = vector.broadcast %cst_230 : f32 to vector<1x128xf32>
      %913 = arith.subf %911, %912 : vector<1x128xf32>
      %914 = arith.select %5, %913, %909 : vector<1x128xi1>, vector<1x128xf32>
      %915 = vector.extract_strided_slice %914 {offsets = [0, 0], sizes = [1, 32], strides = [1, 1]} : vector<1x128xf32> to vector<1x32xf32>
      %916 = vector.extract_strided_slice %914 {offsets = [0, 32], sizes = [1, 32], strides = [1, 1]} : vector<1x128xf32> to vector<1x32xf32>
      %917 = vector.extract_strided_slice %914 {offsets = [0, 64], sizes = [1, 32], strides = [1, 1]} : vector<1x128xf32> to vector<1x32xf32>
      %918 = vector.extract_strided_slice %914 {offsets = [0, 96], sizes = [1, 32], strides = [1, 1]} : vector<1x128xf32> to vector<1x32xf32>
      %919 = arith.mulf %916, %870 : vector<1x32xf32>
      %920 = arith.mulf %915, %917 : vector<1x32xf32>
      %921 = arith.addf %919, %920 : vector<1x32xf32>
      %922 = math.tanh %921 : vector<1x32xf32>
      %923 = arith.mulf %918, %922 : vector<1x32xf32>
      %cst_231 = arith.constant dense<0.000000e+00> : vector<1x128xf32>
      %924 = tpu.matmul %923, %541, %cst_231 {dimension_numbers = #tpu.dot_dimension_numbers<[1], [0], [0], [1], [0, 0, 1, 1], [], []>} : vector<1x32xf32>, vector<32x128xf32>, vector<1x128xf32> -> vector<1x128xf32>
      %925 = vector.extract_strided_slice %566 {offsets = [7, 0], sizes = [1, 128], strides = [1, 1]} : vector<8x128xf32> to vector<1x128xf32>
      %cst_232 = arith.constant dense<0.000000e+00> : vector<1x128xf32>
      %926 = tpu.matmul %898, %539, %cst_232 {dimension_numbers = #tpu.dot_dimension_numbers<[1], [0], [0], [1], [0, 0, 1, 1], [], []>} : vector<1x32xf32>, vector<32x128xf32>, vector<1x128xf32> -> vector<1x128xf32>
      %927 = arith.addf %925, %926 : vector<1x128xf32>
      %cst_233 = arith.constant 2.000000e+00 : f32
      %928 = vector.broadcast %cst_233 : f32 to vector<1x128xf32>
      %929 = arith.mulf %927, %928 : vector<1x128xf32>
      %930 = arith.select %5, %929, %927 : vector<1x128xi1>, vector<1x128xf32>
      %931 = arith.negf %930 : vector<1x128xf32>
      %932 = math.exp %931 : vector<1x128xf32>
      %cst_234 = arith.constant 1.000000e+00 : f32
      %933 = vector.broadcast %cst_234 : f32 to vector<1x128xf32>
      %934 = arith.addf %933, %932 : vector<1x128xf32>
      %935 = arith.divf %933, %934 : vector<1x128xf32>
      %cst_235 = arith.constant 2.000000e+00 : f32
      %936 = vector.broadcast %cst_235 : f32 to vector<1x128xf32>
      %937 = arith.mulf %936, %935 : vector<1x128xf32>
      %cst_236 = arith.constant 1.000000e+00 : f32
      %938 = vector.broadcast %cst_236 : f32 to vector<1x128xf32>
      %939 = arith.subf %937, %938 : vector<1x128xf32>
      %940 = arith.select %5, %939, %935 : vector<1x128xi1>, vector<1x128xf32>
      %941 = vector.extract_strided_slice %940 {offsets = [0, 0], sizes = [1, 32], strides = [1, 1]} : vector<1x128xf32> to vector<1x32xf32>
      %942 = vector.extract_strided_slice %940 {offsets = [0, 32], sizes = [1, 32], strides = [1, 1]} : vector<1x128xf32> to vector<1x32xf32>
      %943 = vector.extract_strided_slice %940 {offsets = [0, 64], sizes = [1, 32], strides = [1, 1]} : vector<1x128xf32> to vector<1x32xf32>
      %944 = vector.extract_strided_slice %940 {offsets = [0, 96], sizes = [1, 32], strides = [1, 1]} : vector<1x128xf32> to vector<1x32xf32>
      %945 = arith.mulf %942, %896 : vector<1x32xf32>
      %946 = arith.mulf %941, %943 : vector<1x32xf32>
      %947 = arith.addf %945, %946 : vector<1x32xf32>
      %948 = math.tanh %947 : vector<1x32xf32>
      %949 = arith.mulf %944, %948 : vector<1x32xf32>
      %cst_237 = arith.constant dense<0.000000e+00> : vector<1x128xf32>
      %950 = tpu.matmul %949, %540, %cst_237 {dimension_numbers = #tpu.dot_dimension_numbers<[1], [0], [0], [1], [0, 0, 1, 1], [], []>} : vector<1x32xf32>, vector<32x128xf32>, vector<1x128xf32> -> vector<1x128xf32>
      %951 = arith.addf %950, %924 : vector<1x128xf32>
      %952 = arith.addf %951, %542 : vector<1x128xf32>
      %cst_238 = arith.constant 2.000000e+00 : f32
      %953 = vector.broadcast %cst_238 : f32 to vector<1x128xf32>
      %954 = arith.mulf %952, %953 : vector<1x128xf32>
      %955 = arith.select %5, %954, %952 : vector<1x128xi1>, vector<1x128xf32>
      %956 = arith.negf %955 : vector<1x128xf32>
      %957 = math.exp %956 : vector<1x128xf32>
      %cst_239 = arith.constant 1.000000e+00 : f32
      %958 = vector.broadcast %cst_239 : f32 to vector<1x128xf32>
      %959 = arith.addf %958, %957 : vector<1x128xf32>
      %960 = arith.divf %958, %959 : vector<1x128xf32>
      %cst_240 = arith.constant 2.000000e+00 : f32
      %961 = vector.broadcast %cst_240 : f32 to vector<1x128xf32>
      %962 = arith.mulf %961, %960 : vector<1x128xf32>
      %cst_241 = arith.constant 1.000000e+00 : f32
      %963 = vector.broadcast %cst_241 : f32 to vector<1x128xf32>
      %964 = arith.subf %962, %963 : vector<1x128xf32>
      %965 = arith.select %5, %964, %960 : vector<1x128xi1>, vector<1x128xf32>
      %966 = vector.extract_strided_slice %965 {offsets = [0, 0], sizes = [1, 32], strides = [1, 1]} : vector<1x128xf32> to vector<1x32xf32>
      %967 = vector.extract_strided_slice %965 {offsets = [0, 32], sizes = [1, 32], strides = [1, 1]} : vector<1x128xf32> to vector<1x32xf32>
      %968 = vector.extract_strided_slice %965 {offsets = [0, 64], sizes = [1, 32], strides = [1, 1]} : vector<1x128xf32> to vector<1x32xf32>
      %969 = vector.extract_strided_slice %965 {offsets = [0, 96], sizes = [1, 32], strides = [1, 1]} : vector<1x128xf32> to vector<1x32xf32>
      %970 = arith.mulf %967, %921 : vector<1x32xf32>
      %971 = arith.mulf %966, %968 : vector<1x32xf32>
      %972 = arith.addf %970, %971 : vector<1x32xf32>
      %973 = math.tanh %972 : vector<1x32xf32>
      %974 = arith.mulf %969, %973 : vector<1x32xf32>
      %975 = tpu.concatenate %617, %668, %719, %770, %821, %872, %923, %974 in 0 : vector<1x32xf32>, vector<1x32xf32>, vector<1x32xf32>, vector<1x32xf32>, vector<1x32xf32>, vector<1x32xf32>, vector<1x32xf32>, vector<1x32xf32> -> vector<8x32xf32>
      %976 = arith.index_cast %564 : i32 to index
      %c0_242 = arith.constant 0 : index
      %977 = vector.load %arg7[%976, %c0_242] : memref<24x32xf32, #tpu.memory_space<vmem>>, vector<8x32xf32>
      tpu.vector_store %arg7[%976, %c0_242], %975 {strides = array<i32>} : memref<24x32xf32, #tpu.memory_space<vmem>>, vector<8x32xf32>,
      scf.yield %949, %947, %974, %972 : vector<1x32xf32>, vector<1x32xf32>, vector<1x32xf32>, vector<1x32xf32>
    }
    %c3_i32_145 = arith.constant 3 : i32
    %c256 = arith.constant 256 : index
    %c0_146 = arith.constant 0 : index
    %555 = vector.load %arg4[%c256, %c0_146] : memref<296x128xf32, #tpu.memory_space<vmem>>, vector<32x128xf32>
    %c288 = arith.constant 288 : index
    %c0_147 = arith.constant 0 : index
    %556 = vector.load %arg4[%c288, %c0_147] : memref<296x128xf32, #tpu.memory_space<vmem>>, vector<1x128xf32>
    %c0_148 = arith.constant 0 : index
    %c0_149 = arith.constant 0 : index
    %557 = vector.load %arg7[%c0_148, %c0_149] : memref<24x32xf32, #tpu.memory_space<vmem>>, vector<24x32xf32>
    %cst_150 = arith.constant dense<0.000000e+00> : vector<24x128xf32>
    %558 = tpu.matmul %557, %555, %cst_150 {dimension_numbers = #tpu.dot_dimension_numbers<[1], [0], [0], [1], [0, 0, 1, 1], [], []>} : vector<24x32xf32>, vector<32x128xf32>, vector<24x128xf32> -> vector<24x128xf32>
    %559 = vector.broadcast %556 : vector<1x128xf32> to vector<24x128xf32>
    %560 = arith.addf %558, %559 : vector<24x128xf32>
    %561 = vector.extract_strided_slice %560 {offsets = [0, 0], sizes = [24, 7], strides = [1, 1]} : vector<24x128xf32> to vector<24x7xf32>
    %c8_151 = arith.constant 8 : index
    %c0_152 = arith.constant 0 : index
    %562 = vector.load %arg5[%c8_151, %c0_152] : memref<32x7xf32, #tpu.memory_space<vmem>>, vector<24x7xf32>
    tpu.vector_store %arg5[%c8_151, %c0_152], %561 {strides = array<i32>} : memref<32x7xf32, #tpu.memory_space<vmem>>, vector<24x7xf32>,
    return
  }
}

</mosaic_0001>

<bundles_post_ra>
// kernel: lstm_seq2seq_forward.1
= control target key start
LH: loop header
LB: loop body
LE: loop exit
PB: predicated region body
PF: predicated region fallthrough
CT: control target
= control target key end

     0   :  { %10 = vsyncpa [#allocation5], 0  ;;  %s3761_s21 = smov [#allocation4]   ;;  %s3762_s23 = smov 128   ;;  %s4738_s0 = inlined_call_operand.vmem [shape: f32[4,10,7], index: 0, kind: input, shape index: {}]   ;;  %s4739_s1 = inlined_call_operand.vmem [shape: f32[4,10,4], index: 1, kind: input, shape index: {}]   ;;  %s4740_s2 = inlined_call_operand.vmem [shape: f32[24,7], index: 2, kind: input, shape index: {}]   ;;  %s4741_s3 = inlined_call_operand.vmem [shape: f32[24,4], index: 3, kind: input, shape index: {}]   ;;  %s4742_s4 = inlined_call_operand.hbm [shape: f32[296,128], index: 4, kind: input, shape index: {}]   ;;  %s4743_s5 = inlined_call_operand.vmem [shape: f32[32,7], index: 5, kind: output, shape index: {}]  }
   0x1   :  { %s23_s20 = sshll.u32 %s4742_s4, 4  ;;  %s25_s22 = sshll.u32 %s3761_s21, 4  ;;  %s24_s20 = int_to_ptr.hbm [resolvable:$true] %s23_s20  ;;  %s26_s22 = int_to_ptr.vmem [resolvable:$true] %s25_s22 }
   0x2   :  { %s3763_s24 = smov 8  }
   0x3   :  { %31 = dma.hbm_to_vmem [thread:$0]  %s24_s20, 4736, %s26_s22, [#allocation5], %s3762_s23, %s3762_s23, %s3763_s24  }
   0x4   :  { %3739 = dma.done.wait [#allocation5], 4736  }
   0x5   :  { %3740 = vsyncadd [#allocation5], 4294962560  ;;  %vm97_vm0 = vcmask 56320   ;;  %v3764_v0 = vmov -1.0   ;;  %v3809_v1 = vld [vmem:[#allocation4 + $0x98] sm:$0xff]  ;;  %v3811_v2 = vld [vmem:[#allocation4 + $0xa0] sm:$0xff]  ;;  %v36_v27 = vlaneseq }
   0x6   :  { %1837 = vst.msk [vmem:[%s4743_s5] sm:$0xff] %vm97_vm0, %v3764_v0  ;;  %v3813_v3 = vld [vmem:[#allocation4 + $0xa8] sm:$0xff]  ;;  %v3815_v4 = vld [vmem:[#allocation4 + $0xb0] sm:$0xff]  ;;  %v3817_v5 = vld [vmem:[#allocation4 + $0xb8] sm:$0xff]  ;;  %vm70_vm1 = vcmask 1043456   ;;  %vm104_vm2 = vcmask 1046528  }
   0x7   :  { %v3819_v6 = vld [vmem:[#allocation4 + $0xc0] sm:$0xff]  ;;  %v3821_v7 = vld [vmem:[#allocation4 + $0xc8] sm:$0xff]  ;;  %v3823_v8 = vld [vmem:[#allocation4 + $0xd0] sm:$0xff]  ;;  %vm63_vm3 = vcmask 31744   ;;  %v3765_v24 = vmov 0.0   ;;  %v37_v33 = vand.u32 127, %v36_v27 }
   0x8   :  { %v3825_v9 = vld [vmem:[#allocation4 + $0xd8] sm:$0xff]  ;;  %v3827_v10 = vld [vmem:[#allocation4 + $0xe0] sm:$0xff]  ;;  %v3829_v11 = vld [vmem:[#allocation4 + $0xe8] sm:$0xff]  ;;  %vm134_vm11 = vcmask 261120   ;;  %s3768_s9 = smov 96  }
   0x9   :  { %v3831_v12 = vld [vmem:[#allocation4 + $0xf0] sm:$0xff]  ;;  %v3833_v13 = vld [vmem:[#allocation4 + $0xf8] sm:$0x1]  ;;  %v42_v14 = vld [vmem:[#allocation4 + $0x8] sm:$0xf]  ;;  %vm38_vm4 = vcmp.ge.s32.totalorder %v37_v33, 64 }
   0xa   :  { %v41_v15 = vld [vmem:[#allocation4] sm:$0x7f]  ;;  %3261 = vmatpush.msk.msra.mxu0 %vm70_vm1, %v42_v14  ;;  %v3843_v18 = vld [vmem:[#allocation4 + $0x30] sm:$0xff]  ;;  %v3847_v19 = vld [vmem:[#allocation4 + $0x28] sm:$0xff]  ;;  %vm39_vm5 = vcmp.lt.s32.totalorder %v37_v33, 96 }
   0xb   :  { %3264 = vmatpush.msk.msra.mxu1 %vm104_vm2, %v41_v15  ;;  %v3259_v16 = vld [vmem:[%s4739_s1 + $0x30] sm:$0xff]  ;;  %v3853_v21 = vld [vmem:[#allocation4 + $0x18] sm:$0xff]  ;;  %v3260_v22 = vld [vmem:[%s4739_s1 + $0x38] sm:$0x3]  ;;  %s3767_s1 = smov 32  }
   0xc   :  { %v3257_v17 = vld [vmem:[%s4738_s0 + $0x30] sm:$0xff]  ;;  %3262 = vmatmul.msk.f32.vlgmr.msra.gmra.mxu0 %vm63_vm3, %v3259_v16  ;;  %v3258_v23 = vld [vmem:[%s4738_s0 + $0x38] sm:$0x3]  ;;  %v3462_v30 = vld [vmem:[#allocation4 + $0x10] ss:$0 sm:$0xff]  ;;  %s3766_s0 = smov 64  }
   0xd   :  { %3265 = vmatmul.msk.f32.vlgmr.msra.gmra.mxu1 %vm97_vm0, %v3257_v17  ;;  %v3850_v20 = vld [vmem:[#allocation4 + $0x20] sm:$0xff]  ;;  %vm3871_vm6 = vmand %vm38_vm4, %vm39_vm5  ;;  %v3885_v63 = vld [vmem:[#allocation4 + $0x70] sm:$0xff] }
   0xe   :  { %170 = vmatpush.msrb.mxu1 %v3843_v18  ;;  %v3887_v0 = vld [vmem:[#allocation4 + $0x68] sm:$0xff]  ;;  %150 = vmatpush.msrb.mxu0 %v3885_v63  ;;  %v3890_v14 = vld [vmem:[#allocation4 + $0x50] sm:$0xff]  ;;  %v3895_v16 = vld [vmem:[#allocation4 + $0x60] sm:$0xff] }
   0xf   :  { %v3892_v15 = vld [vmem:[#allocation4 + $0x48] sm:$0xff]  ;;  %304 = vmatpush.msra.mxu3 %v3885_v63  ;;  %237 = vmatpush.msra.mxu2 %v3890_v14  ;;  %v3900_v17 = vld [vmem:[#allocation4 + $0x40] sm:$0xff] }
  0x10   :  { %171 = vmatpush.msrb.mxu1 %v3847_v19  ;;  %151 = vmatpush.msrb.mxu0 %v3887_v0 }
  0x11   :  { %305 = vmatpush.msra.mxu3 %v3887_v0  ;;  %238 = vmatpush.msra.mxu2 %v3892_v15 }
  0x12   :  { %172 = vmatpush.msrb.mxu1 %v3850_v20  ;;  %152 = vmatpush.msrb.mxu0 %v3895_v16 }
  0x13   :  { %306 = vmatpush.msra.mxu3 %v3895_v16  ;;  %239 = vmatpush.msra.mxu2 %v3900_v17 }
  0x14   :  { %173 = vmatpush.msrb.mxu1 %v3853_v21  ;;  %3263 = vmatmul.msk.f32.gmra.mxu0 %vm63_vm3, %v3260_v22  ;;  %v3903_v22 = vld [vmem:[#allocation4 + $0x58] sm:$0xff] }
  0x15   :  { %3266 = vmatmul.msk.f32.gmra.mxu1 %vm97_vm0, %v3258_v23  ;;  %v3908_v23 = vld [vmem:[#allocation4 + $0x38] sm:$0xff]  ;;  %153 = vmatpush.msrb.mxu0 %v3903_v22 }
  0x16   :  { %398 = vmatpush.msra.mxu1 %v3890_v14  ;;  %307 = vmatpush.msra.mxu3 %v3903_v22 }
  0x17   :  { %240 = vmatpush.msra.mxu2 %v3908_v23  ;;  %324 = vmatpush.msra.mxu0 %v3843_v18 }
  0x18   :  { %399 = vmatpush.msra.mxu1 %v3892_v15  ;;  %485 = vmatpush.msrb.mxu3 %v3843_v18 }
  0x19   :  { %465 = vmatpush.msrb.mxu2 %v3885_v63  ;;  %325 = vmatpush.msra.mxu0 %v3847_v19 }
  0x1a   :  { %400 = vmatpush.msra.mxu1 %v3900_v17  ;;  %486 = vmatpush.msrb.mxu3 %v3847_v19 }
  0x1b   :  { %466 = vmatpush.msrb.mxu2 %v3887_v0  ;;  %326 = vmatpush.msra.mxu0 %v3850_v20 }
  0x1c   :  { %154 = vmatmul.f32.vlgmr.msrb.gmra.mxu0 %v3765_v24  ;;  %401 = vmatpush.msra.mxu1 %v3908_v23 }
  0x1d   :  { %174 = vmatmul.f32.vlgmr.msrb.gmra.mxu1 %v3765_v24  ;;  %487 = vmatpush.msrb.mxu3 %v3850_v20 }
  0x1e   :  { %626 = vmatpush.msrb.mxu1 %v3885_v63  ;;  %467 = vmatpush.msrb.mxu2 %v3895_v16 }
  0x1f   :  { %327 = vmatpush.msra.mxu0 %v3853_v21  ;;  %488 = vmatpush.msrb.mxu3 %v3853_v21 }
  0x20   :  { %627 = vmatpush.msrb.mxu1 %v3887_v0  ;;  %468 = vmatpush.msrb.mxu2 %v3903_v22 }
  0x21   :  { %559 = vmatpush.msrb.mxu0 %v3890_v14 }
  0x22   :  { %628 = vmatpush.msrb.mxu1 %v3895_v16 }
  0x23   :  { %560 = vmatpush.msrb.mxu0 %v3892_v15 }
  0x24   :  { %629 = vmatpush.msrb.mxu1 %v3903_v22 }
  0x25   :  { %561 = vmatpush.msrb.mxu0 %v3900_v17 }
  0x27   :  { %562 = vmatpush.msrb.mxu0 %v3908_v23 }
  0x89   :  { %v91_v25 = vpop.f32.mrf.mxu0 }
  0x8a   :  { %v125_v26 = vpop.f32.mrf.mxu1 }
  0x8b   :  { %v126_v32 = vadd.f32 %v125_v26, %v91_v25 }
  0x8d   :  { %v3868_v35 = vadd.f32 %v3462_v30, %v126_v32  ;;  %v3950_v32 = vld [vmem:[#allocation4 + $0x78] sm:$0x1] }
  0x91   :  { %v94_v28 = vpop.f32.mrf.mxu0 }
  0x92   :  { %v128_v29 = vpop.f32.mrf.mxu1 }
  0x93   :  { %v129_v31 = vadd.f32 %v128_v29, %v94_v28 }
  0x95   :  { %v3866_v34 = vadd.f32 %v3462_v30, %v129_v31 }
  0x99   :  { %v155_v27 = vpop.f32.mrf.mxu0 }
  0x9a   :  { %v175_v36 = vpop.f32.mrf.mxu1 }
  0x9b   :  { %v178_v37 = vadd.f32 %v175_v36, %v3868_v35 }
  0x9d   :  { %v179_v39 = vmul.f32 2.0, %v178_v37 }
  0x9f   :  { %v180_v40 = vsel %vm3871_vm6, %v179_v39, %v178_v37 }
  0xa0   :  { %v3267_v41 = vmul.f32 -1.442695, %v180_v40 }
  0xa2   :  { %3464 = vpow2.f32 %v3267_v41 }
  0xa8   :  { %v3465_v42 = vpop.eup %3464 }
  0xa9   :  { %v184_v43 = vadd.f32 1.0, %v3465_v42 }
  0xab   :  { %3466 = vrcp.f32 %v184_v43  ;;  %v196_v47 = vand.u32 2147483648, %v184_v43  ;;  %v194_v49 = vand.u32 2147483647, %v184_v43  ;;  %vm190_vm8 = vweird.f32 %v184_v43 }
  0xad   :  { %v197_v51 = vor.u32 1.1754944e-38, %v196_v47  ;;  %vm195_vm10 = vcmp.eq.f32.partialorder %v194_v49, 8.507059e+37 }
  0xb1   :  { %v3467_v44 = vpop.eup %3466 }
  0xb2   :  { %v186_v45 = vmul.f32 %v3467_v44, %v184_v43  ;;  %vm191_vm7 = vweird.f32 %v3467_v44 }
  0xb3   :  { %vm192_vm9 = vmor %vm190_vm8, %vm191_vm7 }
  0xb4   :  { %v187_v46 = vsub.f32 1.0, %v186_v45 }
  0xb6   :  { %v188_v48 = vmul.f32 %v3467_v44, %v187_v46 }
  0xb8   :  { %v189_v50 = vadd.f32 %v3467_v44, %v188_v48 }
  0xba   :  { %v193_v52 = vsel %vm192_vm9, %v3467_v44, %v189_v50 }
  0xbb   :  { %v198_v53 = vsel %vm195_vm10, %v197_v51, %v193_v52 }
  0xbc   :  { %v200_v54 = vmul.f32 2.0, %v198_v53 }
  0xbe   :  { %v3268_v55 = vadd.f32 -1.0, %v200_v54 }
  0xc0   :  { %v202_v56 = vsel %vm3871_vm6, %v3268_v55, %v198_v53 }
  0xc1   :  { %205 = vrot.lane.b32.xlu0 %v202_v56, %s3766_s0  ;;  %v203_v59 = vmul.f32 0.0, %v202_v56 }
 0x133   :  { %v206_v57 = vpop.permute.xlu0 %205 }
 0x134   :  { %v208_v58 = vmul.f32 %v206_v57, %v202_v56 }
 0x136   :  { %210 = vrot.lane.b32.xlu0 %v208_v58, %s3767_s1 }
 0x1a8   :  { %v211_v60 = vpop.permute.xlu0 %210 }
 0x1a9   :  { %v3881_v61 = vadd.f32 %v211_v60, %v203_v59 }
 0x1ab   :  { %3468 = vtanh.f32 %v3881_v61 }
 0x1b1   :  { %v3469_v62 = vpop.eup %3468 }
 0x1b2   :  { %216 = vrot.lane.b32.xlu1 %v3469_v62, %s3766_s0 }
 0x224   :  { %v217_v24 = vpop.permute.xlu1 %216 }
 0x225   :  { %v219_v25 = vmul.f32 %v217_v24, %v202_v56 }
 0x227   :  { %221 = vrot.lane.b32.xlu1 %v219_v25, %s3767_s1 }
 0x299   :  { %v222_v26 = vpop.permute.xlu1 %221 }
 0x29a   :  { %3269 = vmatmul.msk.f32.vlgmr.msra.gmra.mxu2 %vm134_vm11, %v222_v26  ;;  %3273 = vmatmul.msk.f32.vlgmr.msra.gmra.mxu0 %vm134_vm11, %v222_v26 }
 0x29b   :  { %646 = vmatpush.msra.mxu2 %v3843_v18  ;;  %787 = vmatpush.msra.mxu0 %v3885_v63 }
 0x29d   :  { %647 = vmatpush.msra.mxu2 %v3847_v19  ;;  %788 = vmatpush.msra.mxu0 %v3887_v0 }
 0x29f   :  { %648 = vmatpush.msra.mxu2 %v3850_v20  ;;  %789 = vmatpush.msra.mxu0 %v3895_v16 }
 0x2a1   :  { %649 = vmatpush.msra.mxu2 %v3853_v21  ;;  %790 = vmatpush.msra.mxu0 %v3903_v22 }
 0x317   :  { %v329_v28 = vpop.f32.mrf.mxu0 }
 0x318   :  { %v333_v29 = vrot.slane %v329_v28, 7 }
 0x31a   :  { %v335_v30 = vadd.f32 %v333_v29, %v3868_v35 }
 0x31c   :  { %v336_v31 = vmul.f32 2.0, %v335_v30 }
 0x31d   :  { %v242_v33 = vpop.f32.mrf.mxu2 }
 0x31e   :  { %v337_v36 = vsel %vm3871_vm6, %v336_v31, %v335_v30  ;;  %v243_v37 = vadd.f32 %v242_v33, %v155_v27 }
 0x31f   :  { %v3274_v39 = vmul.f32 -1.442695, %v337_v36 }
 0x320   :  { %v245_v40 = vadd.f32 %v243_v37, %v3950_v32 }
 0x321   :  { %3470 = vpow2.f32 %v3274_v39 }
 0x322   :  { %v246_v41 = vmul.f32 2.0, %v245_v40 }
 0x324   :  { %v247_v42 = vsel %vm3871_vm6, %v246_v41, %v245_v40 }
 0x325   :  { %v3270_v43 = vmul.f32 -1.442695, %v247_v42 }
 0x327   :  { %v3471_v44 = vpop.eup %3470  ;;  %3472 = vpow2.f32 %v3270_v43 }
 0x328   :  { %v341_v45 = vadd.f32 1.0, %v3471_v44 }
 0x32a   :  { %3474 = vrcp.f32 %v341_v45  ;;  %vm347_vm14 = vweird.f32 %v341_v45  ;;  %v353_v59 = vand.u32 2147483648, %v341_v45  ;;  %v351_v62 = vand.u32 2147483647, %v341_v45 }
 0x32c   :  { %v354_v28 = vor.u32 1.1754944e-38, %v353_v59  ;;  %vm352_vm8 = vcmp.eq.f32.partialorder %v351_v62, 8.507059e+37 }
 0x32d   :  { %v3473_v46 = vpop.eup %3472 }
 0x32e   :  { %v251_v47 = vadd.f32 1.0, %v3473_v46 }
 0x330   :  { %v3475_v48 = vpop.eup %3474  ;;  %3476 = vrcp.f32 %v251_v47  ;;  %v263_v55 = vand.u32 2147483648, %v251_v47  ;;  %v261_v57 = vand.u32 2147483647, %v251_v47  ;;  %vm257_vm15 = vweird.f32 %v251_v47 }
 0x331   :  { %v343_v49 = vmul.f32 %v3475_v48, %v341_v45  ;;  %vm348_vm12 = vweird.f32 %v3475_v48 }
 0x332   :  { %vm349_vm4 = vmor %vm347_vm14, %vm348_vm12  ;;  %v264_v24 = vor.u32 1.1754944e-38, %v263_v55  ;;  %vm262_vm7 = vcmp.eq.f32.partialorder %v261_v57, 8.507059e+37 }
 0x333   :  { %v344_v50 = vsub.f32 1.0, %v343_v49 }
 0x335   :  { %v345_v53 = vmul.f32 %v3475_v48, %v344_v50 }
 0x336   :  { %v3477_v51 = vpop.eup %3476 }
 0x337   :  { %v253_v52 = vmul.f32 %v3477_v51, %v251_v47  ;;  %vm258_vm13 = vweird.f32 %v3477_v51  ;;  %v346_v58 = vadd.f32 %v3475_v48, %v345_v53  ;;  %v361_v47 = vrot.slane %v3881_v61, 7 }
 0x338   :  { %vm259_vm5 = vmor %vm257_vm15, %vm258_vm13 }
 0x339   :  { %v254_v54 = vsub.f32 1.0, %v253_v52  ;;  %v350_v26 = vsel %vm349_vm4, %v3475_v48, %v346_v58 }
 0x33a   :  { %v355_v30 = vsel %vm352_vm8, %v354_v28, %v350_v26 }
 0x33b   :  { %v255_v56 = vmul.f32 %v3477_v51, %v254_v54  ;;  %v357_v36 = vmul.f32 2.0, %v355_v30 }
 0x33d   :  { %v256_v60 = vadd.f32 %v3477_v51, %v255_v56  ;;  %v3275_v37 = vadd.f32 -1.0, %v357_v36 }
 0x33f   :  { %v260_v25 = vsel %vm259_vm5, %v3477_v51, %v256_v60  ;;  %v359_v39 = vsel %vm3871_vm6, %v3275_v37, %v355_v30 }
 0x340   :  { %v265_v27 = vsel %vm262_vm7, %v264_v24, %v260_v25  ;;  %v363_v48 = vmul.f32 %v361_v47, %v359_v39 }
 0x341   :  { %v267_v29 = vmul.f32 2.0, %v265_v27 }
 0x343   :  { %v3271_v31 = vadd.f32 -1.0, %v267_v29 }
 0x345   :  { %v269_v33 = vsel %vm3871_vm6, %v3271_v31, %v265_v27 }
 0x346   :  { %272 = vrot.lane.b32.xlu2 %v269_v33, %s3766_s0  ;;  %v270_v44 = vmul.f32 0.0, %v269_v33 }
 0x34e   :  { %365 = vrot.lane.b32.xlu2 %v359_v39, %s3766_s0 }
 0x3a0   :  { %v273_v40 = vpop.permute.xlu2 %272 }
 0x3a1   :  { %v275_v41 = vmul.f32 %v273_v40, %v269_v33 }
 0x3a3   :  { %277 = vrot.lane.b32.xlu0 %v275_v41, %s3767_s1 }
 0x3a8   :  { %v366_v42 = vpop.permute.xlu2 %365 }
 0x3a9   :  { %v368_v43 = vmul.f32 %v366_v42, %v359_v39 }
 0x3ab   :  { %370 = vrot.lane.b32.xlu1 %v368_v43, %s3767_s1 }
 0x415   :  { %v278_v45 = vpop.permute.xlu0 %277 }
 0x416   :  { %v3965_v46 = vadd.f32 %v278_v45, %v270_v44 }
 0x418   :  { %3478 = vtanh.f32 %v3965_v46 }
 0x41d   :  { %v371_v49 = vpop.permute.xlu1 %370 }
 0x41e   :  { %v3479_v50 = vpop.eup %3478  ;;  %v3969_v51 = vadd.f32 %v371_v49, %v363_v48 }
 0x41f   :  { %283 = vrot.lane.b32.xlu2 %v3479_v50, %s3766_s0 }
 0x420   :  { %3480 = vtanh.f32 %v3969_v51 }
 0x426   :  { %v3481_v52 = vpop.eup %3480 }
 0x427   :  { %376 = vrot.lane.b32.xlu0 %v3481_v52, %s3766_s0 }
 0x479   :  { %v284_v53 = vpop.permute.xlu2 %283 }
 0x47a   :  { %v286_v54 = vmul.f32 %v284_v53, %v269_v33 }
 0x47c   :  { %288 = vrot.lane.b32.xlu1 %v286_v54, %s3767_s1 }
 0x499   :  { %v377_v55 = vpop.permute.xlu0 %376 }
 0x49a   :  { %v379_v56 = vmul.f32 %v377_v55, %v359_v39 }
 0x49c   :  { %v381_v57 = vrot.slane %v379_v56, 1 }
 0x49e   :  { %382 = vrot.lane.b32.xlu2 %v381_v57, %s3767_s1 }
 0x4ee   :  { %v289_v61 = vpop.permute.xlu1 %288 }
 0x4ef   :  { %3272 = vmatmul.msk.f32.vlgmr.msra.gmra.mxu3 %vm134_vm11, %v289_v61 }
 0x4f0   :  { %720 = vmatpush.msra.mxu3 %v3890_v14 }
 0x4f2   :  { %721 = vmatpush.msra.mxu3 %v3892_v15 }
 0x4f4   :  { %722 = vmatpush.msra.mxu3 %v3900_v17 }
 0x4f6   :  { %723 = vmatpush.msra.mxu3 %v3908_v23 }
 0x4f8   :  { %v383_v58 = vpop.permute.xlu2 %382 }
 0x4f9   :  { %3276 = vmatmul.msk.f32.vlgmr.msra.gmra.mxu1 %vm134_vm11, %v383_v58  ;;  %3280 = vmatmul.msk.f32.vlgmr.msrb.gmra.mxu3 %vm134_vm11, %v383_v58 }
 0x4fa   :  { %807 = vmatpush.msra.mxu1 %v3843_v18  ;;  %948 = vmatpush.msrb.mxu3 %v3885_v63 }
 0x4fc   :  { %808 = vmatpush.msra.mxu1 %v3847_v19  ;;  %949 = vmatpush.msrb.mxu3 %v3887_v0 }
 0x4fe   :  { %809 = vmatpush.msra.mxu1 %v3850_v20  ;;  %950 = vmatpush.msrb.mxu3 %v3895_v16 }
 0x500   :  { %810 = vmatpush.msra.mxu1 %v3853_v21  ;;  %951 = vmatpush.msrb.mxu3 %v3903_v22 }
 0x572   :  { %v309_v59 = vpop.f32.mrf.mxu3 }
 0x576   :  { %v403_v60 = vpop.f32.mrf.mxu1 }
 0x577   :  { %v404_v62 = vadd.f32 %v403_v60, %v309_v59 }
 0x579   :  { %v406_v24 = vadd.f32 %v404_v62, %v3950_v32 }
 0x57b   :  { %v407_v25 = vmul.f32 2.0, %v406_v24 }
 0x57c   :  { %v490_v26 = vpop.f32.mrf.mxu3 }
 0x57d   :  { %v408_v27 = vsel %vm3871_vm6, %v407_v25, %v406_v24  ;;  %v494_v28 = vrot.slane %v490_v26, 6 }
 0x57e   :  { %v3277_v29 = vmul.f32 -1.442695, %v408_v27 }
 0x57f   :  { %v496_v30 = vadd.f32 %v494_v28, %v3868_v35 }
 0x580   :  { %3482 = vpow2.f32 %v3277_v29 }
 0x581   :  { %v497_v31 = vmul.f32 2.0, %v496_v30 }
 0x583   :  { %v498_v33 = vsel %vm3871_vm6, %v497_v31, %v496_v30 }
 0x584   :  { %v3281_v36 = vmul.f32 -1.442695, %v498_v33 }
 0x586   :  { %v3483_v37 = vpop.eup %3482  ;;  %3484 = vpow2.f32 %v3281_v36 }
 0x587   :  { %v412_v39 = vadd.f32 1.0, %v3483_v37 }
 0x589   :  { %3486 = vrcp.f32 %v412_v39  ;;  %v424_v45 = vand.u32 2147483648, %v412_v39  ;;  %v422_v48 = vand.u32 2147483647, %v412_v39  ;;  %vm418_vm10 = vweird.f32 %v412_v39 }
 0x58b   :  { %v425_v53 = vor.u32 1.1754944e-38, %v424_v45  ;;  %vm423_vm13 = vcmp.eq.f32.partialorder %v422_v48, 8.507059e+37 }
 0x58c   :  { %v3485_v40 = vpop.eup %3484 }
 0x58d   :  { %v502_v41 = vadd.f32 1.0, %v3485_v40 }
 0x58f   :  { %v3487_v42 = vpop.eup %3486  ;;  %3488 = vrcp.f32 %v502_v41  ;;  %v514_v57 = vand.u32 2147483648, %v502_v41  ;;  %v512_v59 = vand.u32 2147483647, %v502_v41  ;;  %vm508_vm15 = vweird.f32 %v502_v41 }
 0x590   :  { %v414_v43 = vmul.f32 %v3487_v42, %v412_v39  ;;  %vm419_vm9 = vweird.f32 %v3487_v42 }
 0x591   :  { %vm420_vm12 = vmor %vm418_vm10, %vm419_vm9  ;;  %v515_v24 = vor.u32 1.1754944e-38, %v514_v57  ;;  %vm513_vm5 = vcmp.eq.f32.partialorder %v512_v59, 8.507059e+37 }
 0x592   :  { %v415_v44 = vsub.f32 1.0, %v414_v43  ;;  %v522_v43 = vrot.slane %v3969_v51, 7 }
 0x594   :  { %v416_v47 = vmul.f32 %v3487_v42, %v415_v44 }
 0x595   :  { %v3489_v49 = vpop.eup %3488 }
 0x596   :  { %v417_v50 = vadd.f32 %v3487_v42, %v416_v47  ;;  %v504_v52 = vmul.f32 %v3489_v49, %v502_v41  ;;  %vm509_vm14 = vweird.f32 %v3489_v49 }
 0x597   :  { %vm510_vm4 = vmor %vm508_vm15, %vm509_vm14 }
 0x598   :  { %v421_v54 = vsel %vm420_vm12, %v3487_v42, %v417_v50  ;;  %v505_v55 = vsub.f32 1.0, %v504_v52 }
 0x599   :  { %v426_v56 = vsel %vm423_vm13, %v425_v53, %v421_v54 }
 0x59a   :  { %v428_v61 = vmul.f32 2.0, %v426_v56  ;;  %v506_v58 = vmul.f32 %v3489_v49, %v505_v55 }
 0x59c   :  { %v3278_v60 = vadd.f32 -1.0, %v428_v61  ;;  %v507_v62 = vadd.f32 %v3489_v49, %v506_v58 }
 0x59e   :  { %v430_v25 = vsel %vm3871_vm6, %v3278_v60, %v426_v56  ;;  %v511_v26 = vsel %vm510_vm4, %v3489_v49, %v507_v62 }
 0x59f   :  { %433 = vrot.lane.b32.xlu0 %v430_v25, %s3766_s0  ;;  %v516_v27 = vsel %vm513_vm5, %v515_v24, %v511_v26  ;;  %v431_v39 = vmul.f32 %v430_v25, %v3965_v46 }
 0x5a0   :  { %v518_v28 = vmul.f32 2.0, %v516_v27 }
 0x5a2   :  { %v3282_v29 = vadd.f32 -1.0, %v518_v28 }
 0x5a4   :  { %v520_v30 = vsel %vm3871_vm6, %v3282_v29, %v516_v27 }
 0x5a5   :  { %526 = vrot.lane.b32.xlu1 %v520_v30, %s3766_s0  ;;  %v524_v44 = vmul.f32 %v522_v43, %v520_v30 }
 0x611   :  { %v434_v31 = vpop.permute.xlu0 %433 }
 0x612   :  { %v436_v33 = vmul.f32 %v434_v31, %v430_v25 }
 0x614   :  { %438 = vrot.lane.b32.xlu2 %v436_v33, %s3767_s1 }
 0x617   :  { %v527_v36 = vpop.permute.xlu1 %526 }
 0x618   :  { %v529_v37 = vmul.f32 %v527_v36, %v520_v30 }
 0x61a   :  { %531 = vrot.lane.b32.xlu0 %v529_v37, %s3767_s1 }
 0x66e   :  { %v439_v40 = vpop.permute.xlu2 %438 }
 0x66f   :  { %v4006_v41 = vadd.f32 %v439_v40, %v431_v39 }
 0x671   :  { %3490 = vtanh.f32 %v4006_v41 }
 0x677   :  { %v3491_v42 = vpop.eup %3490 }
 0x678   :  { %444 = vrot.lane.b32.xlu1 %v3491_v42, %s3766_s0 }
 0x68c   :  { %v532_v45 = vpop.permute.xlu0 %531 }
 0x68d   :  { %v4011_v47 = vadd.f32 %v532_v45, %v524_v44 }
 0x68f   :  { %3492 = vtanh.f32 %v4011_v47 }
 0x695   :  { %v3493_v48 = vpop.eup %3492 }
 0x696   :  { %537 = vrot.lane.b32.xlu2 %v3493_v48, %s3766_s0 }
 0x6ea   :  { %v445_v46 = vpop.permute.xlu1 %444 }
 0x6eb   :  { %v447_v49 = vmul.f32 %v445_v46, %v430_v25 }
 0x6ed   :  { %449 = vrot.lane.b32.xlu0 %v447_v49, %s3767_s1 }
 0x6f0   :  { %v538_v50 = vpop.permute.xlu2 %537 }
 0x6f1   :  { %v540_v52 = vmul.f32 %v538_v50, %v520_v30 }
 0x6f3   :  { %v542_v53 = vrot.slane %v540_v52, 2 }
 0x6f5   :  { %543 = vrot.lane.b32.xlu1 %v542_v53, %s3767_s1 }
 0x75f   :  { %v450_v54 = vpop.permute.xlu0 %449 }
 0x760   :  { %3279 = vmatmul.msk.f32.vlgmr.msrb.gmra.mxu2 %vm134_vm11, %v450_v54 }
 0x761   :  { %881 = vmatpush.msrb.mxu2 %v3890_v14 }
 0x763   :  { %882 = vmatpush.msrb.mxu2 %v3892_v15 }
 0x765   :  { %883 = vmatpush.msrb.mxu2 %v3900_v17 }
 0x767   :  { %v544_v51 = vpop.permute.xlu1 %543  ;;  %884 = vmatpush.msrb.mxu2 %v3908_v23 }
 0x768   :  { %3283 = vmatmul.msk.f32.vlgmr.msrb.gmra.mxu0 %vm134_vm11, %v544_v51  ;;  %3287 = vmatmul.msk.f32.vlgmr.msra.gmra.mxu2 %vm134_vm11, %v544_v51 }
 0x769   :  { %968 = vmatpush.msrb.mxu0 %v3843_v18  ;;  %1109 = vmatpush.msra.mxu2 %v3885_v63 }
 0x76b   :  { %969 = vmatpush.msrb.mxu0 %v3847_v19  ;;  %1110 = vmatpush.msra.mxu2 %v3887_v0 }
 0x76d   :  { %970 = vmatpush.msrb.mxu0 %v3850_v20  ;;  %1111 = vmatpush.msra.mxu2 %v3895_v16 }
 0x76f   :  { %971 = vmatpush.msrb.mxu0 %v3853_v21  ;;  %1112 = vmatpush.msra.mxu2 %v3903_v22 }
 0x7e3   :  { %v470_v55 = vpop.f32.mrf.mxu2 }
 0x7e5   :  { %v564_v56 = vpop.f32.mrf.mxu0 }
 0x7e6   :  { %v565_v57 = vadd.f32 %v564_v56, %v470_v55 }
 0x7e8   :  { %v567_v61 = vadd.f32 %v565_v57, %v3950_v32 }
 0x7ea   :  { %v568_v58 = vmul.f32 2.0, %v567_v61 }
 0x7eb   :  { %v651_v59 = vpop.f32.mrf.mxu2 }
 0x7ec   :  { %v569_v60 = vsel %vm3871_vm6, %v568_v58, %v567_v61  ;;  %v655_v62 = vrot.slane %v651_v59, 5 }
 0x7ed   :  { %v3284_v24 = vmul.f32 -1.442695, %v569_v60 }
 0x7ee   :  { %v657_v25 = vadd.f32 %v655_v62, %v3868_v35 }
 0x7ef   :  { %3494 = vpow2.f32 %v3284_v24 }
 0x7f0   :  { %v658_v26 = vmul.f32 2.0, %v657_v25 }
 0x7f2   :  { %v659_v27 = vsel %vm3871_vm6, %v658_v26, %v657_v25 }
 0x7f3   :  { %v3288_v28 = vmul.f32 -1.442695, %v659_v27 }
 0x7f5   :  { %v3495_v29 = vpop.eup %3494  ;;  %3496 = vpow2.f32 %v3288_v28 }
 0x7f6   :  { %v573_v30 = vadd.f32 1.0, %v3495_v29 }
 0x7f8   :  { %3498 = vrcp.f32 %v573_v30  ;;  %v585_v40 = vand.u32 2147483648, %v573_v30  ;;  %v583_v43 = vand.u32 2147483647, %v573_v30  ;;  %vm579_vm8 = vweird.f32 %v573_v30 }
 0x7fa   :  { %v586_v46 = vor.u32 1.1754944e-38, %v585_v40  ;;  %vm584_vm10 = vcmp.eq.f32.partialorder %v583_v43, 8.507059e+37 }
 0x7fb   :  { %v3497_v31 = vpop.eup %3496 }
 0x7fc   :  { %v663_v33 = vadd.f32 1.0, %v3497_v31 }
 0x7fe   :  { %v3499_v36 = vpop.eup %3498  ;;  %3500 = vrcp.f32 %v663_v33  ;;  %v675_v53 = vand.u32 2147483648, %v663_v33  ;;  %v673_v55 = vand.u32 2147483647, %v663_v33  ;;  %vm669_vm13 = vweird.f32 %v663_v33 }
 0x7ff   :  { %v575_v37 = vmul.f32 %v3499_v36, %v573_v30  ;;  %vm580_vm7 = vweird.f32 %v3499_v36 }
 0x800   :  { %vm581_vm9 = vmor %vm579_vm8, %vm580_vm7  ;;  %v676_v61 = vor.u32 1.1754944e-38, %v675_v53  ;;  %vm674_vm15 = vcmp.eq.f32.partialorder %v673_v55, 8.507059e+37 }
 0x801   :  { %v576_v39 = vsub.f32 1.0, %v575_v37 }
 0x803   :  { %v577_v42 = vmul.f32 %v3499_v36, %v576_v39 }
 0x804   :  { %v3501_v44 = vpop.eup %3500 }
 0x805   :  { %v578_v45 = vadd.f32 %v3499_v36, %v577_v42  ;;  %v665_v48 = vmul.f32 %v3501_v44, %v663_v33  ;;  %vm670_vm12 = vweird.f32 %v3501_v44 }
 0x806   :  { %vm671_vm14 = vmor %vm669_vm13, %vm670_vm12 }
 0x807   :  { %v582_v49 = vsel %vm581_vm9, %v3499_v36, %v578_v45  ;;  %v666_v50 = vsub.f32 1.0, %v665_v48  ;;  %v683_v36 = vrot.slane %v4011_v47, 7 }
 0x808   :  { %v587_v52 = vsel %vm584_vm10, %v586_v46, %v582_v49 }
 0x809   :  { %v589_v54 = vmul.f32 2.0, %v587_v52  ;;  %v667_v51 = vmul.f32 %v3501_v44, %v666_v50 }
 0x80b   :  { %v3285_v56 = vadd.f32 -1.0, %v589_v54  ;;  %v668_v57 = vadd.f32 %v3501_v44, %v667_v51 }
 0x80d   :  { %v591_v58 = vsel %vm3871_vm6, %v3285_v56, %v587_v52  ;;  %v672_v59 = vsel %vm671_vm14, %v3501_v44, %v668_v57 }
 0x80e   :  { %594 = vrot.lane.b32.xlu2 %v591_v58, %s3766_s0  ;;  %v677_v60 = vsel %vm674_vm15, %v676_v61, %v672_v59  ;;  %v592_v30 = vmul.f32 %v591_v58, %v4006_v41 }
 0x80f   :  { %v679_v62 = vmul.f32 2.0, %v677_v60 }
 0x811   :  { %v3289_v24 = vadd.f32 -1.0, %v679_v62 }
 0x813   :  { %v681_v25 = vsel %vm3871_vm6, %v3289_v24, %v677_v60 }
 0x814   :  { %687 = vrot.lane.b32.xlu0 %v681_v25, %s3766_s0  ;;  %v685_v37 = vmul.f32 %v683_v36, %v681_v25 }
 0x868   :  { %v595_v26 = vpop.permute.xlu2 %594 }
 0x869   :  { %v597_v27 = vmul.f32 %v595_v26, %v591_v58 }
 0x86b   :  { %599 = vrot.lane.b32.xlu1 %v597_v27, %s3767_s1 }
 0x886   :  { %v688_v28 = vpop.permute.xlu0 %687 }
 0x887   :  { %v690_v29 = vmul.f32 %v688_v28, %v681_v25 }
 0x889   :  { %692 = vrot.lane.b32.xlu2 %v690_v29, %s3767_s1 }
 0x8dd   :  { %v600_v31 = vpop.permute.xlu1 %599 }
 0x8de   :  { %v4047_v33 = vadd.f32 %v600_v31, %v592_v30 }
 0x8e0   :  { %3502 = vtanh.f32 %v4047_v33 }
 0x8e3   :  { %v693_v39 = vpop.permute.xlu2 %692 }
 0x8e4   :  { %v4051_v40 = vadd.f32 %v693_v39, %v685_v37 }
 0x8e6   :  { %v3503_v42 = vpop.eup %3502  ;;  %3504 = vtanh.f32 %v4051_v40 }
 0x8e7   :  { %605 = vrot.lane.b32.xlu0 %v3503_v42, %s3766_s0 }
 0x8ec   :  { %v3505_v43 = vpop.eup %3504 }
 0x8ed   :  { %698 = vrot.lane.b32.xlu1 %v3505_v43, %s3766_s0 }
 0x959   :  { %v606_v41 = vpop.permute.xlu0 %605 }
 0x95a   :  { %v608_v44 = vmul.f32 %v606_v41, %v591_v58 }
 0x95c   :  { %610 = vrot.lane.b32.xlu2 %v608_v44, %s3767_s1 }
 0x95f   :  { %v699_v45 = vpop.permute.xlu1 %698 }
 0x960   :  { %v701_v47 = vmul.f32 %v699_v45, %v681_v25 }
 0x962   :  { %v703_v48 = vrot.slane %v701_v47, 3 }
 0x964   :  { %704 = vrot.lane.b32.xlu0 %v703_v48, %s3767_s1 }
 0x9b6   :  { %v611_v46 = vpop.permute.xlu2 %610 }
 0x9b7   :  { %3286 = vmatmul.msk.f32.vlgmr.msrb.gmra.mxu1 %vm134_vm11, %v611_v46 }
 0x9b8   :  { %1042 = vmatpush.msrb.mxu1 %v3890_v14 }
 0x9ba   :  { %1043 = vmatpush.msrb.mxu1 %v3892_v15 }
 0x9bc   :  { %1044 = vmatpush.msrb.mxu1 %v3900_v17 }
 0x9be   :  { %1045 = vmatpush.msrb.mxu1 %v3908_v23 }
 0x9d6   :  { %v705_v49 = vpop.permute.xlu0 %704 }
 0x9d7   :  { %3290 = vmatmul.msk.f32.vlgmr.msra.gmra.mxu3 %vm134_vm11, %v705_v49  ;;  %3294 = vmatmul.msk.f32.vlgmr.msra.gmra.mxu1 %vm134_vm11, %v705_v49 }
 0x9d8   :  { %1129 = vmatpush.msra.mxu3 %v3843_v18  ;;  %1270 = vmatpush.msra.mxu1 %v3885_v63 }
 0x9da   :  { %1130 = vmatpush.msra.mxu3 %v3847_v19  ;;  %1271 = vmatpush.msra.mxu1 %v3887_v0 }
 0x9dc   :  { %1131 = vmatpush.msra.mxu3 %v3850_v20  ;;  %1272 = vmatpush.msra.mxu1 %v3895_v16 }
 0x9de   :  { %1132 = vmatpush.msra.mxu3 %v3853_v21  ;;  %1273 = vmatpush.msra.mxu1 %v3903_v22 }
 0xa34   :  { %v631_v50 = vpop.f32.mrf.mxu1 }
 0xa54   :  { %v812_v52 = vpop.f32.mrf.mxu1 }
 0xa55   :  { %v816_v53 = vrot.slane %v812_v52, 4 }
 0xa57   :  { %v818_v54 = vadd.f32 %v816_v53, %v3868_v35 }
 0xa59   :  { %v819_v18 = vmul.f32 2.0, %v818_v54 }
 0xa5a   :  { %v725_v51 = vpop.f32.mrf.mxu3 }
 0xa5b   :  { %v820_v19 = vsel %vm3871_vm6, %v819_v18, %v818_v54  ;;  %v726_v55 = vadd.f32 %v725_v51, %v631_v50 }
 0xa5c   :  { %v3295_v56 = vmul.f32 -1.442695, %v820_v19 }
 0xa5d   :  { %v728_v20 = vadd.f32 %v726_v55, %v3950_v32 }
 0xa5e   :  { %3506 = vpow2.f32 %v3295_v56 }
 0xa5f   :  { %v729_v57 = vmul.f32 2.0, %v728_v20 }
 0xa61   :  { %v730_v21 = vsel %vm3871_vm6, %v729_v57, %v728_v20 }
 0xa62   :  { %v3291_v61 = vmul.f32 -1.442695, %v730_v21 }
 0xa64   :  { %v3507_v58 = vpop.eup %3506  ;;  %3508 = vpow2.f32 %v3291_v61 }
 0xa65   :  { %v824_v59 = vadd.f32 1.0, %v3507_v58 }
 0xa67   :  { %3510 = vrcp.f32 %v824_v59  ;;  %v836_v27 = vand.u32 2147483648, %v824_v59  ;;  %v834_v29 = vand.u32 2147483647, %v824_v59  ;;  %vm830_vm5 = vweird.f32 %v824_v59 }
 0xa69   :  { %v837_v37 = vor.u32 1.1754944e-38, %v836_v27  ;;  %vm835_vm8 = vcmp.eq.f32.partialorder %v834_v29, 8.507059e+37 }
 0xa6a   :  { %v3509_v60 = vpop.eup %3508 }
 0xa6b   :  { %v734_v62 = vadd.f32 1.0, %v3509_v60 }
 0xa6d   :  { %v3511_v24 = vpop.eup %3510  ;;  %3512 = vrcp.f32 %v734_v62  ;;  %v746_v41 = vand.u32 2147483648, %v734_v62  ;;  %v744_v47 = vand.u32 2147483647, %v734_v62  ;;  %vm740_vm10 = vweird.f32 %v734_v62 }
 0xa6e   :  { %v826_v25 = vmul.f32 %v3511_v24, %v824_v59  ;;  %vm831_vm4 = vweird.f32 %v3511_v24  ;;  %v844_v59 = vrot.slane %v4051_v40, 7 }
 0xa6f   :  { %vm832_vm7 = vmor %vm830_vm5, %vm831_vm4  ;;  %v747_v49 = vor.u32 1.1754944e-38, %v746_v41  ;;  %vm745_vm13 = vcmp.eq.f32.partialorder %v744_v47, 8.507059e+37 }
 0xa70   :  { %v827_v26 = vsub.f32 1.0, %v826_v25 }
 0xa72   :  { %v828_v28 = vmul.f32 %v3511_v24, %v827_v26 }
 0xa73   :  { %v3513_v30 = vpop.eup %3512 }
 0xa74   :  { %v829_v31 = vadd.f32 %v3511_v24, %v828_v28  ;;  %v736_v36 = vmul.f32 %v3513_v30, %v734_v62  ;;  %vm741_vm9 = vweird.f32 %v3513_v30 }
 0xa75   :  { %vm742_vm12 = vmor %vm740_vm10, %vm741_vm9 }
 0xa76   :  { %v833_v39 = vsel %vm832_vm7, %v3511_v24, %v829_v31  ;;  %v737_v42 = vsub.f32 1.0, %v736_v36  ;;  %v4106_v31 = vld [vmem:[#allocation4 + $0x30] sm:$0xff]  ;;  %v4110_v36 = vld [vmem:[#allocation4 + $0x28] sm:$0xff] }
 0xa77   :  { %v838_v43 = vsel %vm835_vm8, %v837_v37, %v833_v39 }
 0xa78   :  { %v840_v44 = vmul.f32 2.0, %v838_v43  ;;  %v738_v45 = vmul.f32 %v3513_v30, %v737_v42 }
 0xa7a   :  { %v3296_v48 = vadd.f32 -1.0, %v840_v44  ;;  %v739_v46 = vadd.f32 %v3513_v30, %v738_v45 }
 0xa7c   :  { %v842_v50 = vsel %vm3871_vm6, %v3296_v48, %v838_v43  ;;  %v743_v52 = vsel %vm742_vm12, %v3513_v30, %v739_v46 }
 0xa7d   :  { %848 = vrot.lane.b32.xlu1 %v842_v50, %s3766_s0  ;;  %v748_v53 = vsel %vm745_vm13, %v747_v49, %v743_v52  ;;  %v846_v60 = vmul.f32 %v844_v59, %v842_v50 }
 0xa7e   :  { %v750_v54 = vmul.f32 2.0, %v748_v53 }
 0xa80   :  { %v3292_v18 = vadd.f32 -1.0, %v750_v54 }
 0xa82   :  { %v752_v51 = vsel %vm3871_vm6, %v3292_v18, %v748_v53 }
 0xa83   :  { %755 = vrot.lane.b32.xlu2 %v752_v51, %s3766_s0  ;;  %v753_v57 = vmul.f32 %v752_v51, %v4047_v33 }
 0xadd   :  { %v756_v19 = vpop.permute.xlu2 %755 }
 0xade   :  { %v758_v55 = vmul.f32 %v756_v19, %v752_v51 }
 0xae0   :  { %760 = vrot.lane.b32.xlu1 %v758_v55, %s3767_s1 }
 0xaef   :  { %v849_v56 = vpop.permute.xlu1 %848 }
 0xaf0   :  { %v851_v20 = vmul.f32 %v849_v56, %v842_v50 }
 0xaf2   :  { %853 = vrot.lane.b32.xlu0 %v851_v20, %s3767_s1 }
 0xb52   :  { %v761_v21 = vpop.permute.xlu1 %760 }
 0xb53   :  { %v4088_v61 = vadd.f32 %v761_v21, %v753_v57 }
 0xb55   :  { %3514 = vtanh.f32 %v4088_v61 }
 0xb5b   :  { %v3515_v58 = vpop.eup %3514 }
 0xb5c   :  { %766 = vrot.lane.b32.xlu0 %v3515_v58, %s3766_s0 }
 0xb64   :  { %v854_v62 = vpop.permute.xlu0 %853 }
 0xb65   :  { %v4093_v24 = vadd.f32 %v854_v62, %v846_v60 }
 0xb67   :  { %3516 = vtanh.f32 %v4093_v24 }
 0xb6d   :  { %v3517_v25 = vpop.eup %3516 }
 0xb6e   :  { %859 = vrot.lane.b32.xlu2 %v3517_v25, %s3766_s0 }
 0xbc8   :  { %v860_v33 = vpop.permute.xlu2 %859 }
 0xbc9   :  { %v862_v26 = vmul.f32 %v860_v33, %v842_v50 }
 0xbcb   :  { %v864_v27 = vrot.slane %v862_v26, 4 }
 0xbcd   :  { %865 = vrot.lane.b32.xlu1 %v864_v27, %s3767_s1 }
 0xbce   :  { %v767_v28 = vpop.permute.xlu0 %766 }
 0xbcf   :  { %v769_v29 = vmul.f32 %v767_v28, %v752_v51 }
 0xbd1   :  { %771 = vrot.lane.b32.xlu2 %v769_v29, %s3767_s1 }
 0xc2b   :  { %v772_v30 = vpop.permute.xlu2 %771 }
 0xc2c   :  { %3293 = vmatmul.msk.f32.vlgmr.msra.gmra.mxu0 %vm134_vm11, %v772_v30 }
 0xc2d   :  { %1203 = vmatpush.msra.mxu0 %v3890_v14  ;;  %v4114_v14 = vld [vmem:[#allocation4 + $0x20] sm:$0xff] }
 0xc2f   :  { %1204 = vmatpush.msra.mxu0 %v3892_v15  ;;  %v4118_v15 = vld [vmem:[#allocation4 + $0x18] sm:$0xff] }
 0xc31   :  { %1205 = vmatpush.msra.mxu0 %v3900_v17 }
 0xc33   :  { %1206 = vmatpush.msra.mxu0 %v3908_v23 }
 0xc3f   :  { %v866_v40 = vpop.permute.xlu1 %865 }
 0xc40   :  { %3297 = vmatmul.msk.f32.vlgmr.msrb.gmra.mxu2 %vm134_vm11, %v866_v40  ;;  %3301 = vmatmul.msk.f32.vlgmr.msrb.gmra.mxu0 %vm134_vm11, %v866_v40 }
 0xc41   :  { %1290 = vmatpush.msrb.mxu2 %v4106_v31  ;;  %1431 = vmatpush.msrb.mxu0 %v3885_v63 }
 0xc43   :  { %1291 = vmatpush.msrb.mxu2 %v4110_v36  ;;  %1432 = vmatpush.msrb.mxu0 %v3887_v0 }
 0xc45   :  { %1292 = vmatpush.msrb.mxu2 %v4114_v14  ;;  %1433 = vmatpush.msrb.mxu0 %v3895_v16 }
 0xc47   :  { %1293 = vmatpush.msrb.mxu2 %v4118_v15  ;;  %1434 = vmatpush.msrb.mxu0 %v3903_v22 }
 0xca9   :  { %v792_v17 = vpop.f32.mrf.mxu0 }
 0xcbd   :  { %v973_v63 = vpop.f32.mrf.mxu0 }
 0xcbe   :  { %v977_v23 = vrot.slane %v973_v63, 3 }
 0xcc0   :  { %v979_v37 = vadd.f32 %v977_v23, %v3868_v35 }
 0xcc2   :  { %v980_v39 = vmul.f32 2.0, %v979_v37 }
 0xcc3   :  { %v886_v42 = vpop.f32.mrf.mxu2 }
 0xcc4   :  { %v981_v0 = vsel %vm3871_vm6, %v980_v39, %v979_v37  ;;  %v887_v43 = vadd.f32 %v886_v42, %v792_v17 }
 0xcc5   :  { %v3302_v41 = vmul.f32 -1.442695, %v981_v0 }
 0xcc6   :  { %v889_v16 = vadd.f32 %v887_v43, %v3950_v32 }
 0xcc7   :  { %3518 = vpow2.f32 %v3302_v41 }
 0xcc8   :  { %v890_v44 = vmul.f32 2.0, %v889_v16 }
 0xcca   :  { %v891_v45 = vsel %vm3871_vm6, %v890_v44, %v889_v16  ;;  %v1005_v44 = vrot.slane %v4093_v24, 7 }
 0xccb   :  { %v3298_v22 = vmul.f32 -1.442695, %v891_v45 }
 0xccd   :  { %v3519_v47 = vpop.eup %3518  ;;  %3520 = vpow2.f32 %v3298_v22 }
 0xcce   :  { %v985_v48 = vadd.f32 1.0, %v3519_v47 }
 0xcd0   :  { %3522 = vrcp.f32 %v985_v48  ;;  %v997_v54 = vand.u32 2147483648, %v985_v48  ;;  %v995_v51 = vand.u32 2147483647, %v985_v48  ;;  %vm991_vm15 = vweird.f32 %v985_v48 }
 0xcd2   :  { %v998_v20 = vor.u32 1.1754944e-38, %v997_v54  ;;  %vm996_vm5 = vcmp.eq.f32.partialorder %v995_v51, 8.507059e+37  ;;  %v4152_v54 = vld [vmem:[#allocation4 + $0x50] sm:$0xff]  ;;  %v4160_v51 = vld [vmem:[#allocation4 + $0x40] sm:$0xff] }
 0xcd3   :  { %v3521_v46 = vpop.eup %3520 }
 0xcd4   :  { %v895_v49 = vadd.f32 1.0, %v3521_v46 }
 0xcd6   :  { %v3523_v50 = vpop.eup %3522  ;;  %3524 = vrcp.f32 %v895_v49  ;;  %v907_v59 = vand.u32 2147483648, %v895_v49  ;;  %v905_v25 = vand.u32 2147483647, %v895_v49  ;;  %vm901_vm8 = vweird.f32 %v895_v49 }
 0xcd7   :  { %v987_v52 = vmul.f32 %v3523_v50, %v985_v48  ;;  %vm992_vm14 = vweird.f32 %v3523_v50 }
 0xcd8   :  { %vm993_vm4 = vmor %vm991_vm15, %vm992_vm14  ;;  %v908_v27 = vor.u32 1.1754944e-38, %v907_v59  ;;  %vm906_vm10 = vcmp.eq.f32.partialorder %v905_v25, 8.507059e+37 }
 0xcd9   :  { %v988_v53 = vsub.f32 1.0, %v987_v52 }
 0xcdb   :  { %v989_v18 = vmul.f32 %v3523_v50, %v988_v53 }
 0xcdc   :  { %v3525_v19 = vpop.eup %3524 }
 0xcdd   :  { %v990_v55 = vadd.f32 %v3523_v50, %v989_v18  ;;  %v897_v56 = vmul.f32 %v3525_v19, %v895_v49  ;;  %vm902_vm7 = vweird.f32 %v3525_v19  ;;  %v4156_v18 = vld [vmem:[#allocation4 + $0x48] sm:$0xff] }
 0xcde   :  { %vm903_vm9 = vmor %vm901_vm8, %vm902_vm7 }
 0xcdf   :  { %v994_v57 = vsel %vm993_vm4, %v3523_v50, %v990_v55  ;;  %v898_v21 = vsub.f32 1.0, %v897_v56  ;;  %v3592_v55 = vld [vmem:[#allocation4 + $0x70] sm:$0xff]  ;;  %v3593_v56 = vld [vmem:[#allocation4 + $0x68] sm:$0xff] }
 0xce0   :  { %v999_v58 = vsel %vm996_vm5, %v998_v20, %v994_v57  ;;  %v3594_v20 = vld [vmem:[#allocation4 + $0x60] sm:$0xff]  ;;  %v3595_v57 = vld [vmem:[#allocation4 + $0x58] sm:$0xff] }
 0xce1   :  { %v1001_v60 = vmul.f32 2.0, %v999_v58  ;;  %v899_v62 = vmul.f32 %v3525_v19, %v898_v21 }
 0xce3   :  { %v3303_v33 = vadd.f32 -1.0, %v1001_v60  ;;  %v900_v26 = vadd.f32 %v3525_v19, %v899_v62 }
 0xce5   :  { %v1003_v28 = vsel %vm3871_vm6, %v3303_v33, %v999_v58  ;;  %v904_v29 = vsel %vm903_vm9, %v3525_v19, %v900_v26  ;;  %v4163_v19 = vld [vmem:[#allocation4 + $0x38] sm:$0xff] }
 0xce6   :  { %1009 = vrot.lane.b32.xlu1 %v1003_v28, %s3766_s0  ;;  %v909_v30 = vsel %vm906_vm10, %v908_v27, %v904_v29  ;;  %v1007_v45 = vmul.f32 %v1005_v44, %v1003_v28 }
 0xce7   :  { %v911_v40 = vmul.f32 2.0, %v909_v30 }
 0xce9   :  { %v3299_v17 = vadd.f32 -1.0, %v911_v40 }
 0xceb   :  { %v913_v63 = vsel %vm3871_vm6, %v3299_v17, %v909_v30 }
 0xcec   :  { %916 = vrot.lane.b32.xlu0 %v913_v63, %s3766_s0  ;;  %v914_v0 = vmul.f32 %v913_v63, %v4088_v61 }
 0xd58   :  { %v1010_v23 = vpop.permute.xlu1 %1009 }
 0xd59   :  { %v1012_v37 = vmul.f32 %v1010_v23, %v1003_v28 }
 0xd5b   :  { %1014 = vrot.lane.b32.xlu0 %v1012_v37, %s3767_s1 }
 0xd5e   :  { %v917_v39 = vpop.permute.xlu0 %916 }
 0xd5f   :  { %v919_v42 = vmul.f32 %v917_v39, %v913_v63 }
 0xd61   :  { %921 = vrot.lane.b32.xlu2 %v919_v42, %s3767_s1 }
 0xdbb   :  { %v922_v43 = vpop.permute.xlu2 %921 }
 0xdbc   :  { %v4137_v41 = vadd.f32 %v922_v43, %v914_v0 }
 0xdbe   :  { %3526 = vtanh.f32 %v4137_v41 }
 0xdc4   :  { %v3527_v16 = vpop.eup %3526 }
 0xdc5   :  { %927 = vrot.lane.b32.xlu1 %v3527_v16, %s3766_s0 }
 0xdcd   :  { %v1015_v22 = vpop.permute.xlu0 %1014 }
 0xdce   :  { %v4142_v47 = vadd.f32 %v1015_v22, %v1007_v45 }
 0xdd0   :  { %3528 = vtanh.f32 %v4142_v47 }
 0xdd6   :  { %v3529_v48 = vpop.eup %3528 }
 0xdd7   :  { %1020 = vrot.lane.b32.xlu2 %v3529_v48, %s3766_s0 }
 0xe31   :  { %v1021_v61 = vpop.permute.xlu2 %1020 }
 0xe32   :  { %v1023_v46 = vmul.f32 %v1021_v61, %v1003_v28 }
 0xe34   :  { %v1025_v49 = vrot.slane %v1023_v46, 5 }
 0xe36   :  { %1026 = vrot.lane.b32.xlu1 %v1025_v49, %s3767_s1 }
 0xe37   :  { %v928_v50 = vpop.permute.xlu1 %927 }
 0xe38   :  { %v930_v52 = vmul.f32 %v928_v50, %v913_v63 }
 0xe3a   :  { %932 = vrot.lane.b32.xlu0 %v930_v52, %s3767_s1 }
 0xea8   :  { %v1027_v53 = vpop.permute.xlu1 %1026 }
 0xea9   :  { %3304 = vmatmul.msk.f32.vlgmr.msrb.gmra.mxu1 %vm134_vm11, %v1027_v53 }
 0xeaa   :  { %1451 = vmatpush.msrb.mxu1 %v4106_v31 }
 0xeac   :  { %v933_v24 = vpop.permute.xlu0 %932  ;;  %1452 = vmatpush.msrb.mxu1 %v4110_v36 }
 0xead   :  { %3300 = vmatmul.msk.f32.vlgmr.msrb.gmra.mxu3 %vm134_vm11, %v933_v24 }
 0xeae   :  { %1364 = vmatpush.msrb.mxu3 %v4152_v54  ;;  %1453 = vmatpush.msrb.mxu1 %v4114_v14 }
 0xeb0   :  { %1365 = vmatpush.msrb.mxu3 %v4156_v18  ;;  %1454 = vmatpush.msrb.mxu1 %v4118_v15 }
 0xeb2   :  { %1366 = vmatpush.msrb.mxu3 %v4160_v51 }
 0xeb4   :  { %1367 = vmatpush.msrb.mxu3 %v4163_v19 }
 0xeb5   :  { %3308 = vmatmul.msk.f32.vlgmr.msra.gmra.mxu3 %vm134_vm11, %v1027_v53 }
 0xeb6   :  { %1588 = vmatpush.msra.mxu3 %v3592_v55 }
 0xeb8   :  { %1589 = vmatpush.msra.mxu3 %v3593_v56 }
 0xeba   :  { %1590 = vmatpush.msra.mxu3 %v3594_v20 }
 0xebc   :  { %1591 = vmatpush.msra.mxu3 %v3595_v57 }
 0xf26   :  { %v1047_v21 = vpop.f32.mrf.mxu1 }
 0xf30   :  { %v953_v58 = vpop.f32.mrf.mxu3 }
 0xf31   :  { %v1048_v59 = vadd.f32 %v1047_v21, %v953_v58 }
 0xf33   :  { %v1050_v60 = vadd.f32 %v1048_v59, %v3950_v32 }
 0xf35   :  { %v1051_v62 = vmul.f32 2.0, %v1050_v60 }
 0xf37   :  { %v1052_v25 = vsel %vm3871_vm6, %v1051_v62, %v1050_v60 }
 0xf38   :  { %v3305_v33 = vmul.f32 -1.442695, %v1052_v25  ;;  %v1134_v26 = vpop.f32.mrf.mxu3 }
 0xf39   :  { %v1138_v27 = vrot.slane %v1134_v26, 2 }
 0xf3a   :  { %3530 = vpow2.f32 %v3305_v33 }
 0xf3b   :  { %v1140_v28 = vadd.f32 %v1138_v27, %v3868_v35 }
 0xf3d   :  { %v1141_v29 = vmul.f32 2.0, %v1140_v28 }
 0xf3f   :  { %v1142_v30 = vsel %vm3871_vm6, %v1141_v29, %v1140_v28 }
 0xf40   :  { %v3531_v40 = vpop.eup %3530  ;;  %v3309_v17 = vmul.f32 -1.442695, %v1142_v30 }
 0xf41   :  { %v1056_v63 = vadd.f32 1.0, %v3531_v40  ;;  %v1166_v40 = vrot.slane %v4142_v47, 7 }
 0xf42   :  { %3532 = vpow2.f32 %v3309_v17 }
 0xf43   :  { %3534 = vrcp.f32 %v1056_v63  ;;  %v1068_v0 = vand.u32 2147483648, %v1056_v63  ;;  %v1066_v16 = vand.u32 2147483647, %v1056_v63  ;;  %vm1062_vm13 = vweird.f32 %v1056_v63 }
 0xf45   :  { %v1069_v22 = vor.u32 1.1754944e-38, %v1068_v0  ;;  %vm1067_vm15 = vcmp.eq.f32.partialorder %v1066_v16, 8.507059e+37 }
 0xf48   :  { %v3533_v32 = vpop.eup %3532 }
 0xf49   :  { %v3535_v23 = vpop.eup %3534  ;;  %v1146_v37 = vadd.f32 1.0, %v3533_v32 }
 0xf4a   :  { %v1058_v39 = vmul.f32 %v3535_v23, %v1056_v63  ;;  %vm1063_vm12 = vweird.f32 %v3535_v23 }
 0xf4b   :  { %3536 = vrcp.f32 %v1146_v37  ;;  %vm1064_vm14 = vmor %vm1062_vm13, %vm1063_vm12  ;;  %v1158_v52 = vand.u32 2147483648, %v1146_v37  ;;  %v1156_v55 = vand.u32 2147483647, %v1146_v37  ;;  %vm1152_vm5 = vweird.f32 %v1146_v37 }
 0xf4c   :  { %v1059_v42 = vsub.f32 1.0, %v1058_v39 }
 0xf4d   :  { %v1159_v57 = vor.u32 1.1754944e-38, %v1158_v52  ;;  %vm1157_vm8 = vcmp.eq.f32.partialorder %v1156_v55, 8.507059e+37 }
 0xf4e   :  { %v1060_v43 = vmul.f32 %v3535_v23, %v1059_v42 }
 0xf50   :  { %v1061_v44 = vadd.f32 %v3535_v23, %v1060_v43 }
 0xf51   :  { %v3537_v45 = vpop.eup %3536 }
 0xf52   :  { %v1065_v48 = vsel %vm1064_vm14, %v3535_v23, %v1061_v44  ;;  %v1148_v61 = vmul.f32 %v3537_v45, %v1146_v37  ;;  %vm1153_vm4 = vweird.f32 %v3537_v45 }
 0xf53   :  { %v1070_v46 = vsel %vm1067_vm15, %v1069_v22, %v1065_v48  ;;  %vm1154_vm7 = vmor %vm1152_vm5, %vm1153_vm4  ;;  %v4204_v48 = vld [vmem:[#allocation4 + $0x78] sm:$0x1] }
 0xf54   :  { %v1072_v49 = vmul.f32 2.0, %v1070_v46  ;;  %v1149_v50 = vsub.f32 1.0, %v1148_v61 }
 0xf56   :  { %v3306_v53 = vadd.f32 -1.0, %v1072_v49  ;;  %v1150_v24 = vmul.f32 %v3537_v45, %v1149_v50 }
 0xf58   :  { %v1074_v56 = vsel %vm3871_vm6, %v3306_v53, %v1070_v46  ;;  %v1151_v20 = vadd.f32 %v3537_v45, %v1150_v24 }
 0xf59   :  { %1077 = vrot.lane.b32.xlu2 %v1074_v56, %s3766_s0  ;;  %v1075_v28 = vmul.f32 %v1074_v56, %v4137_v41 }
 0xf5a   :  { %v1155_v21 = vsel %vm1154_vm7, %v3537_v45, %v1151_v20 }
 0xf5b   :  { %v1160_v58 = vsel %vm1157_vm8, %v1159_v57, %v1155_v21 }
 0xf5c   :  { %v1162_v59 = vmul.f32 2.0, %v1160_v58 }
 0xf5e   :  { %v3310_v60 = vadd.f32 -1.0, %v1162_v59 }
 0xf60   :  { %v1164_v62 = vsel %vm3871_vm6, %v3310_v60, %v1160_v58 }
 0xf61   :  { %1170 = vrot.lane.b32.xlu0 %v1164_v62, %s3766_s0  ;;  %v1168_v17 = vmul.f32 %v1166_v40, %v1164_v62 }
 0xfb3   :  { %v1078_v25 = vpop.permute.xlu2 %1077 }
 0xfb4   :  { %v1080_v33 = vmul.f32 %v1078_v25, %v1074_v56 }
 0xfb6   :  { %1082 = vrot.lane.b32.xlu1 %v1080_v33, %s3767_s1 }
 0xfd3   :  { %v1171_v26 = vpop.permute.xlu0 %1170 }
 0xfd4   :  { %v1173_v27 = vmul.f32 %v1171_v26, %v1164_v62 }
 0xfd6   :  { %1175 = vrot.lane.b32.xlu2 %v1173_v27, %s3767_s1 }
0x1028   :  { %v1083_v29 = vpop.permute.xlu1 %1082 }
0x1029   :  { %v4182_v30 = vadd.f32 %v1083_v29, %v1075_v28 }
0x102b   :  { %3538 = vtanh.f32 %v4182_v30 }
0x1030   :  { %v1176_v63 = vpop.permute.xlu2 %1175 }
0x1031   :  { %v3539_v32 = vpop.eup %3538  ;;  %v4186_v23 = vadd.f32 %v1176_v63, %v1168_v17 }
0x1032   :  { %1088 = vrot.lane.b32.xlu0 %v3539_v32, %s3766_s0 }
0x1033   :  { %3540 = vtanh.f32 %v4186_v23 }
0x1039   :  { %v3541_v37 = vpop.eup %3540 }
0x103a   :  { %1181 = vrot.lane.b32.xlu1 %v3541_v37, %s3766_s0 }
0x10a4   :  { %v1089_v41 = vpop.permute.xlu0 %1088 }
0x10a5   :  { %v1091_v39 = vmul.f32 %v1089_v41, %v1074_v56 }
0x10a7   :  { %1093 = vrot.lane.b32.xlu2 %v1091_v39, %s3767_s1 }
0x10ac   :  { %v1182_v42 = vpop.permute.xlu1 %1181 }
0x10ad   :  { %v1184_v0 = vmul.f32 %v1182_v42, %v1164_v62 }
0x10af   :  { %v1186_v43 = vrot.slane %v1184_v0, 6 }
0x10b1   :  { %1187 = vrot.lane.b32.xlu0 %v1186_v43, %s3767_s1 }
0x1101   :  { %v1094_v47 = vpop.permute.xlu2 %1093 }
0x1102   :  { %3307 = vmatmul.msk.f32.vlgmr.msra.gmra.mxu2 %vm134_vm11, %v1094_v47 }
0x1103   :  { %1521 = vmatpush.msra.mxu2 %v4152_v54 }
0x1105   :  { %1522 = vmatpush.msra.mxu2 %v4156_v18 }
0x1107   :  { %1523 = vmatpush.msra.mxu2 %v4160_v51 }
0x1109   :  { %1524 = vmatpush.msra.mxu2 %v4163_v19 }
0x1123   :  { %v1188_v16 = vpop.permute.xlu0 %1187 }
0x1124   :  { %3311 = vmatmul.msk.f32.vlgmr.msra.gmra.mxu0 %vm134_vm11, %v1188_v16  ;;  %3315 = vmatmul.msk.f32.vlgmr.msrb.gmra.mxu2 %vm134_vm11, %v1188_v16 }
0x1125   :  { %1608 = vmatpush.msra.mxu0 %v4106_v31 }
0x1127   :  { %1609 = vmatpush.msra.mxu0 %v4110_v36 }
0x1129   :  { %1610 = vmatpush.msra.mxu0 %v4114_v14 }
0x112b   :  { %1611 = vmatpush.msra.mxu0 %v4118_v15 }
0x1185   :  { %v1114_v44 = vpop.f32.mrf.mxu2 }
0x11a1   :  { %v1208_v45 = vpop.f32.mrf.mxu0 }
0x11a2   :  { %v1209_v22 = vadd.f32 %v1208_v45, %v1114_v44 }
0x11a4   :  { %v1211_v61 = vadd.f32 %v4204_v48, %v1209_v22 }
0x11a6   :  { %v1212_v46 = vmul.f32 2.0, %v1211_v61 }
0x11a7   :  { %v1295_v49 = vpop.f32.mrf.mxu2 }
0x11a8   :  { %v1213_v50 = vsel %vm3871_vm6, %v1212_v46, %v1211_v61  ;;  %v1299_v52 = vrot.slane %v1295_v49, 1  ;;  %v1327_v49 = vrot.slane %v4186_v23, 7 }
0x11a9   :  { %v3312_v31 = vmul.f32 -1.442695, %v1213_v50 }
0x11aa   :  { %v1301_v36 = vadd.f32 %v1299_v52, %v3868_v35 }
0x11ab   :  { %3542 = vpow2.f32 %v3312_v31 }
0x11ac   :  { %v1302_v14 = vmul.f32 2.0, %v1301_v36 }
0x11ae   :  { %v1303_v15 = vsel %vm3871_vm6, %v1302_v14, %v1301_v36 }
0x11af   :  { %v3316_v53 = vmul.f32 -1.442695, %v1303_v15 }
0x11b1   :  { %v3543_v24 = vpop.eup %3542  ;;  %3544 = vpow2.f32 %v3316_v53 }
0x11b2   :  { %v1217_v55 = vadd.f32 1.0, %v3543_v24 }
0x11b4   :  { %3546 = vrcp.f32 %v1217_v55  ;;  %v1229_v59 = vand.u32 2147483648, %v1217_v55  ;;  %v1227_v35 = vand.u32 2147483647, %v1217_v55  ;;  %vm1223_vm10 = vweird.f32 %v1217_v55 }
0x11b6   :  { %v1230_v26 = vor.u32 1.1754944e-38, %v1229_v59  ;;  %vm1228_vm13 = vcmp.eq.f32.partialorder %v1227_v35, 8.507059e+37 }
0x11b7   :  { %v3545_v56 = vpop.eup %3544 }
0x11b8   :  { %v1307_v20 = vadd.f32 1.0, %v3545_v56 }
0x11ba   :  { %v3547_v57 = vpop.eup %3546  ;;  %3548 = vrcp.f32 %v1307_v20  ;;  %v1319_v40 = vand.u32 2147483648, %v1307_v20  ;;  %v1317_v32 = vand.u32 2147483647, %v1307_v20  ;;  %vm1313_vm15 = vweird.f32 %v1307_v20 }
0x11bb   :  { %v1219_v21 = vmul.f32 %v3547_v57, %v1217_v55  ;;  %vm1224_vm9 = vweird.f32 %v3547_v57 }
0x11bc   :  { %vm1225_vm12 = vmor %vm1223_vm10, %vm1224_vm9  ;;  %v1320_v39 = vor.u32 1.1754944e-38, %v1319_v40  ;;  %vm1318_vm5 = vcmp.eq.f32.partialorder %v1317_v32, 8.507059e+37 }
0x11bd   :  { %v1220_v58 = vsub.f32 1.0, %v1219_v21 }
0x11bf   :  { %v1221_v60 = vmul.f32 %v3547_v57, %v1220_v58 }
0x11c0   :  { %v3549_v62 = vpop.eup %3548 }
0x11c1   :  { %v1222_v25 = vadd.f32 %v3547_v57, %v1221_v60  ;;  %v1309_v33 = vmul.f32 %v3549_v62, %v1307_v20  ;;  %vm1314_vm14 = vweird.f32 %v3549_v62 }
0x11c2   :  { %vm1315_vm4 = vmor %vm1313_vm15, %vm1314_vm14 }
0x11c3   :  { %v1226_v27 = vsel %vm1225_vm12, %v3547_v57, %v1222_v25  ;;  %v1310_v28 = vsub.f32 1.0, %v1309_v33 }
0x11c4   :  { %v1231_v29 = vsel %vm1228_vm13, %v1230_v26, %v1226_v27 }
0x11c5   :  { %v1233_v17 = vmul.f32 2.0, %v1231_v29  ;;  %v1311_v63 = vmul.f32 %v3549_v62, %v1310_v28 }
0x11c7   :  { %v3313_v37 = vadd.f32 -1.0, %v1233_v17  ;;  %v1312_v41 = vadd.f32 %v3549_v62, %v1311_v63 }
0x11c9   :  { %v1235_v42 = vsel %vm3871_vm6, %v3313_v37, %v1231_v29  ;;  %v1316_v0 = vsel %vm1315_vm4, %v3549_v62, %v1312_v41 }
0x11ca   :  { %1238 = vrot.lane.b32.xlu1 %v1235_v42, %s3766_s0  ;;  %v1321_v43 = vsel %vm1318_vm5, %v1320_v39, %v1316_v0  ;;  %v1236_v14 = vmul.f32 %v1235_v42, %v4182_v30 }
0x11cb   :  { %v1323_v47 = vmul.f32 2.0, %v1321_v43 }
0x11cd   :  { %v3317_v16 = vadd.f32 -1.0, %v1323_v47 }
0x11cf   :  { %v1325_v44 = vsel %vm3871_vm6, %v3317_v16, %v1321_v43 }
0x11d0   :  { %1331 = vrot.lane.b32.xlu2 %v1325_v44, %s3766_s0  ;;  %v1329_v50 = vmul.f32 %v1327_v49, %v1325_v44 }
0x122a   :  { %v1332_v45 = vpop.permute.xlu2 %1331 }
0x122b   :  { %v1334_v22 = vmul.f32 %v1332_v45, %v1325_v44 }
0x122d   :  { %1336 = vrot.lane.b32.xlu1 %v1334_v22, %s3767_s1 }
0x123c   :  { %v1239_v61 = vpop.permute.xlu1 %1238 }
0x123d   :  { %v1241_v46 = vmul.f32 %v1239_v61, %v1235_v42 }
0x123f   :  { %1243 = vrot.lane.b32.xlu0 %v1241_v46, %s3767_s1 }
0x129f   :  { %v1337_v52 = vpop.permute.xlu1 %1336 }
0x12a0   :  { %v4221_v31 = vadd.f32 %v1337_v52, %v1329_v50 }
0x12a2   :  { %3550 = vtanh.f32 %v4221_v31 }
0x12a8   :  { %v3551_v36 = vpop.eup %3550 }
0x12a9   :  { %1342 = vrot.lane.b32.xlu0 %v3551_v36, %s3766_s0 }
0x12b1   :  { %v1244_v15 = vpop.permute.xlu0 %1243 }
0x12b2   :  { %v4226_v53 = vadd.f32 %v1244_v15, %v1236_v14 }
0x12b4   :  { %3552 = vtanh.f32 %v4226_v53 }
0x12ba   :  { %v3553_v24 = vpop.eup %3552 }
0x12bb   :  { %1249 = vrot.lane.b32.xlu2 %v3553_v24, %s3766_s0 }
0x1315   :  { %v1250_v23 = vpop.permute.xlu2 %1249 }
0x1316   :  { %v1252_v55 = vmul.f32 %v1250_v23, %v1235_v42 }
0x1318   :  { %1254 = vrot.lane.b32.xlu1 %v1252_v55, %s3767_s1 }
0x131b   :  { %v1343_v56 = vpop.permute.xlu0 %1342 }
0x131c   :  { %v1345_v20 = vmul.f32 %v1343_v56, %v1325_v44 }
0x131e   :  { %v1347_v57 = vrot.slane %v1345_v20, 7 }
0x1320   :  { %1348 = vrot.lane.b32.xlu2 %v1347_v57, %s3767_s1 }
0x137a   :  { %v1349_v21 = vpop.permute.xlu2 %1348 }
0x137b   :  { %3318 = vmatmul.msk.f32.vlgmr.msrb.gmra.mxu3 %vm134_vm11, %v1349_v21 }
0x138a   :  { %v1255_v30 = vpop.permute.xlu1 %1254 }
0x138b   :  { %3314 = vmatmul.msk.f32.vlgmr.msra.gmra.mxu1 %vm134_vm11, %v1255_v30 }
0x138c   :  { %1682 = vmatpush.msra.mxu1 %v4152_v54 }
0x138e   :  { %1683 = vmatpush.msra.mxu1 %v4156_v18 }
0x1390   :  { %1684 = vmatpush.msra.mxu1 %v4160_v51 }
0x1392   :  { %1685 = vmatpush.msra.mxu1 %v4163_v19 }
0x1393   :  { %3322 = vmatmul.msk.f32.vlgmr.msrb.gmra.mxu1 %vm134_vm11, %v1349_v21 }
0x13fe   :  { %v1369_v58 = vpop.f32.mrf.mxu3 }
0x1408   :  { %v1275_v59 = vpop.f32.mrf.mxu1 }
0x1409   :  { %v1370_v60 = vadd.f32 %v1369_v58, %v1275_v59  ;;  %v1485_v58 = vrot.slane %v4221_v31, 7 }
0x140b   :  { %v1372_v35 = vadd.f32 %v4204_v48, %v1370_v60 }
0x140d   :  { %v1373_v62 = vmul.f32 2.0, %v1372_v35 }
0x140f   :  { %v1374_v25 = vsel %vm3871_vm6, %v1373_v62, %v1372_v35 }
0x1410   :  { %v3319_v33 = vmul.f32 -1.442695, %v1374_v25  ;;  %v1456_v26 = vpop.f32.mrf.mxu1 }
0x1411   :  { %v1459_v54 = vadd.f32 %v1456_v26, %v3866_v34 }
0x1412   :  { %3554 = vpow2.f32 %v3319_v33 }
0x1413   :  { %v1460_v18 = vmul.f32 2.0, %v1459_v54 }
0x1415   :  { %v1461_v51 = vsel %vm3871_vm6, %v1460_v18, %v1459_v54 }
0x1416   :  { %v3323_v19 = vmul.f32 -1.442695, %v1461_v51 }
0x1418   :  { %v3555_v27 = vpop.eup %3554  ;;  %3556 = vpow2.f32 %v3323_v19 }
0x1419   :  { %v1378_v28 = vadd.f32 1.0, %v3555_v27 }
0x141b   :  { %3558 = vrcp.f32 %v1378_v28  ;;  %v1390_v37 = vand.u32 2147483648, %v1378_v28  ;;  %v1388_v39 = vand.u32 2147483647, %v1378_v28  ;;  %vm1384_vm8 = vweird.f32 %v1378_v28 }
0x141d   :  { %v1391_v47 = vor.u32 1.1754944e-38, %v1390_v37  ;;  %vm1389_vm10 = vcmp.eq.f32.partialorder %v1388_v39, 8.507059e+37 }
0x141e   :  { %v3557_v29 = vpop.eup %3556 }
0x141f   :  { %v1465_v40 = vadd.f32 1.0, %v3557_v29 }
0x1421   :  { %v3559_v17 = vpop.eup %3558  ;;  %3560 = vrcp.f32 %v1465_v40  ;;  %v1477_v22 = vand.u32 2147483648, %v1465_v40  ;;  %v1475_v49 = vand.u32 2147483647, %v1465_v40  ;;  %vm1471_vm13 = vweird.f32 %v1465_v40 }
0x1422   :  { %v1380_v63 = vmul.f32 %v3559_v17, %v1378_v28  ;;  %vm1385_vm7 = vweird.f32 %v3559_v17 }
0x1423   :  { %vm1386_vm9 = vmor %vm1384_vm8, %vm1385_vm7  ;;  %v1478_v36 = vor.u32 1.1754944e-38, %v1477_v22  ;;  %vm1476_vm15 = vcmp.eq.f32.partialorder %v1475_v49, 8.507059e+37 }
0x1424   :  { %v1381_v32 = vsub.f32 1.0, %v1380_v63 }
0x1426   :  { %v1382_v41 = vmul.f32 %v3559_v17, %v1381_v32 }
0x1427   :  { %v3561_v42 = vpop.eup %3560 }
0x1428   :  { %v1383_v0 = vadd.f32 %v3559_v17, %v1382_v41  ;;  %v1467_v43 = vmul.f32 %v3561_v42, %v1465_v40  ;;  %vm1472_vm12 = vweird.f32 %v3561_v42 }
0x1429   :  { %vm1473_vm14 = vmor %vm1471_vm13, %vm1472_vm12 }
0x142a   :  { %v1387_v16 = vsel %vm1386_vm9, %v3559_v17, %v1383_v0  ;;  %v1468_v44 = vsub.f32 1.0, %v1467_v43 }
0x142b   :  { %v1392_v45 = vsel %vm1389_vm10, %v1391_v47, %v1387_v16 }
0x142c   :  { %v1394_v61 = vmul.f32 2.0, %v1392_v45  ;;  %v1469_v46 = vmul.f32 %v3561_v42, %v1468_v44 }
0x142e   :  { %v3320_v50 = vadd.f32 -1.0, %v1394_v61  ;;  %v1470_v52 = vadd.f32 %v3561_v42, %v1469_v46 }
0x1430   :  { %v1396_v14 = vsel %vm3871_vm6, %v3320_v50, %v1392_v45  ;;  %v1474_v15 = vsel %vm1473_vm14, %v3561_v42, %v1470_v52 }
0x1431   :  { %1399 = vrot.lane.b32.xlu1 %v1396_v14, %s3766_s0  ;;  %v1479_v24 = vsel %vm1476_vm15, %v1478_v36, %v1474_v15  ;;  %v1397_v25 = vmul.f32 %v1396_v14, %v4226_v53 }
0x1432   :  { %v1481_v23 = vmul.f32 2.0, %v1479_v24 }
0x1434   :  { %v3324_v55 = vadd.f32 -1.0, %v1481_v23 }
0x1436   :  { %v1483_v56 = vsel %vm3871_vm6, %v3324_v55, %v1479_v24 }
0x1437   :  { %1489 = vrot.lane.b32.xlu0 %v1483_v56, %s3766_s0  ;;  %v1487_v59 = vmul.f32 %v1485_v58, %v1483_v56 }
0x14a3   :  { %v1400_v20 = vpop.permute.xlu1 %1399 }
0x14a4   :  { %v1402_v57 = vmul.f32 %v1400_v20, %v1396_v14 }
0x14a6   :  { %1404 = vrot.lane.b32.xlu0 %v1402_v57, %s3767_s1 }
0x14a9   :  { %v1490_v21 = vpop.permute.xlu0 %1489 }
0x14aa   :  { %v1492_v30 = vmul.f32 %v1490_v21, %v1483_v56 }
0x14ac   :  { %1494 = vrot.lane.b32.xlu2 %v1492_v30, %s3767_s1 }
0x1506   :  { %v1495_v60 = vpop.permute.xlu2 %1494 }
0x1507   :  { %v4254_v35 = vadd.f32 %v1495_v60, %v1487_v59 }
0x1509   :  { %3562 = vtanh.f32 %v4254_v35 }
0x150f   :  { %v3563_v62 = vpop.eup %3562 }
0x1510   :  { %1500 = vrot.lane.b32.xlu1 %v3563_v62, %s3766_s0 }
0x1518   :  { %v1405_v33 = vpop.permute.xlu0 %1404 }
0x1519   :  { %v4259_v26 = vadd.f32 %v1405_v33, %v1397_v25 }
0x151b   :  { %3564 = vtanh.f32 %v4259_v26 }
0x1521   :  { %v3565_v54 = vpop.eup %3564 }
0x1522   :  { %1410 = vrot.lane.b32.xlu2 %v3565_v54, %s3766_s0 }
0x157c   :  { %v1411_v31 = vpop.permute.xlu2 %1410 }
0x157d   :  { %v1413_v18 = vmul.f32 %v1411_v31, %v1396_v14 }
0x157f   :  { %1415 = vrot.lane.b32.xlu1 %v1413_v18, %s3767_s1 }
0x1582   :  { %v1501_v51 = vpop.permute.xlu1 %1500 }
0x1583   :  { %v1503_v19 = vmul.f32 %v1501_v51, %v1483_v56 }
0x1585   :  { %1505 = vrot.lane.b32.xlu0 %v1503_v19, %s3767_s1 }
0x15f1   :  { %v1416_v27 = vpop.permute.xlu1 %1415 }
0x15f2   :  { %3321 = vmatmul.msk.f32.vlgmr.msrb.gmra.mxu0 %vm134_vm11, %v1416_v27 }
0x15f7   :  { %v1506_v53 = vpop.permute.xlu0 %1505 }
0x15f8   :  { %3325 = vmatmul.msk.f32.vlgmr.msra.gmra.mxu2 %vm134_vm11, %v1506_v53 }
0x15fa   :  { %3329 = vmatmul.msk.f32.vlgmr.msra.gmra.mxu0 %vm134_vm11, %v1506_v53 }
0x166f   :  { %v1436_v28 = vpop.f32.mrf.mxu0 }
0x1677   :  { %v1613_v29 = vpop.f32.mrf.mxu0 }
0x1678   :  { %v1617_v40 = vrot.slane %v1613_v29, 7 }
0x167a   :  { %v1619_v17 = vadd.f32 %v1617_v40, %v3866_v34 }
0x167b   :  { %v1526_v63 = vpop.f32.mrf.mxu2 }
0x167c   :  { %v1620_v32 = vmul.f32 2.0, %v1619_v17  ;;  %v1527_v37 = vadd.f32 %v1526_v63, %v1436_v28  ;;  %v1645_v28 = vrot.slane %v4254_v35, 7 }
0x167e   :  { %v1621_v41 = vsel %vm3871_vm6, %v1620_v32, %v1619_v17  ;;  %v1529_v39 = vadd.f32 %v4204_v48, %v1527_v37 }
0x167f   :  { %v3330_v42 = vmul.f32 -1.442695, %v1621_v41 }
0x1680   :  { %v1530_v0 = vmul.f32 2.0, %v1529_v39 }
0x1681   :  { %3566 = vpow2.f32 %v3330_v42 }
0x1682   :  { %v1531_v43 = vsel %vm3871_vm6, %v1530_v0, %v1529_v39 }
0x1683   :  { %v3326_v47 = vmul.f32 -1.442695, %v1531_v43 }
0x1685   :  { %3568 = vpow2.f32 %v3326_v47 }
0x1687   :  { %v3567_v16 = vpop.eup %3566 }
0x1688   :  { %v1625_v44 = vadd.f32 1.0, %v3567_v16 }
0x168a   :  { %3570 = vrcp.f32 %v1625_v44  ;;  %v1635_v50 = vand.u32 2147483647, %v1625_v44  ;;  %v1637_v52 = vand.u32 2147483648, %v1625_v44  ;;  %vm1631_vm5 = vweird.f32 %v1625_v44 }
0x168b   :  { %v3569_v34 = vpop.eup %3568 }
0x168c   :  { %v1535_v45 = vadd.f32 1.0, %v3569_v34  ;;  %vm1636_vm8 = vcmp.eq.f32.partialorder %v1635_v50, 8.507059e+37  ;;  %v1638_v23 = vor.u32 1.1754944e-38, %v1637_v52 }
0x168e   :  { %3572 = vrcp.f32 %v1535_v45  ;;  %v1547_v55 = vand.u32 2147483648, %v1535_v45  ;;  %v1545_v57 = vand.u32 2147483647, %v1535_v45  ;;  %vm1541_vm10 = vweird.f32 %v1535_v45 }
0x1690   :  { %v3571_v22 = vpop.eup %3570  ;;  %v1548_v59 = vor.u32 1.1754944e-38, %v1547_v55  ;;  %vm1546_vm13 = vcmp.eq.f32.partialorder %v1545_v57, 8.507059e+37 }
0x1691   :  { %v1627_v61 = vmul.f32 %v3571_v22, %v1625_v44  ;;  %vm1632_vm4 = vweird.f32 %v3571_v22 }
0x1692   :  { %vm1633_vm7 = vmor %vm1631_vm5, %vm1632_vm4 }
0x1693   :  { %v1628_v46 = vsub.f32 1.0, %v1627_v61 }
0x1694   :  { %v3573_v49 = vpop.eup %3572 }
0x1695   :  { %v1629_v36 = vmul.f32 %v3571_v22, %v1628_v46  ;;  %v1537_v14 = vmul.f32 %v3573_v49, %v1535_v45  ;;  %vm1542_vm9 = vweird.f32 %v3573_v49 }
0x1696   :  { %vm1543_vm12 = vmor %vm1541_vm10, %vm1542_vm9 }
0x1697   :  { %v1630_v15 = vadd.f32 %v3571_v22, %v1629_v36  ;;  %v1538_v24 = vsub.f32 1.0, %v1537_v14 }
0x1699   :  { %v1634_v56 = vsel %vm1633_vm7, %v3571_v22, %v1630_v15  ;;  %v1539_v20 = vmul.f32 %v3573_v49, %v1538_v24 }
0x169a   :  { %v1639_v21 = vsel %vm1636_vm8, %v1638_v23, %v1634_v56 }
0x169b   :  { %v1641_v30 = vmul.f32 2.0, %v1639_v21  ;;  %v1540_v58 = vadd.f32 %v3573_v49, %v1539_v20 }
0x169d   :  { %v3331_v60 = vadd.f32 -1.0, %v1641_v30  ;;  %v1544_v62 = vsel %vm1543_vm12, %v3573_v49, %v1540_v58 }
0x169e   :  { %v1549_v25 = vsel %vm1546_vm13, %v1548_v59, %v1544_v62  ;;  %v1732_v62 = vld [vmem:[#allocation4 + $0x80] sm:$0x7f] }
0x169f   :  { %v1643_v33 = vsel %vm3871_vm6, %v3331_v60, %v1639_v21  ;;  %v1551_v54 = vmul.f32 2.0, %v1549_v25  ;;  %v1733_v60 = vld [vmem:[#allocation4 + $0x88] sm:$0xf]  ;;  %3339 = vmatpush.msk.msrb.mxu3 %vm104_vm2, %v1732_v62 }
0x16a0   :  { %1649 = vrot.lane.b32.xlu0 %v1643_v33, %s3766_s0  ;;  %v1647_v29 = vmul.f32 %v1645_v28, %v1643_v33  ;;  %3335 = vmatpush.msk.msrb.mxu2 %vm70_vm1, %v1733_v60 }
0x16a1   :  { %v3327_v31 = vadd.f32 -1.0, %v1551_v54  ;;  %v1752_v54 = vld [vmem:[%s4741_s3 + $0x8] sm:$0xff] }
0x16a3   :  { %v1553_v18 = vsel %vm3871_vm6, %v3327_v31, %v1549_v25  ;;  %v1751_v25 = vld [vmem:[%s4741_s3] sm:$0xff]  ;;  %v1749_v31 = vld [vmem:[%s4740_s2 + $0x8] sm:$0xff] }
0x16a4   :  { %1556 = vrot.lane.b32.xlu2 %v1553_v18, %s3766_s0  ;;  %v1554_v63 = vmul.f32 %v1553_v18, %v4259_v26  ;;  %3336 = vmatmul.msk.f32.vlgmr.msrb.gmra.mxu2 %vm63_vm3, %v1751_v25 }
0x16ac   :  { %3337 = vmatmul.msk.f32.gmra.mxu2 %vm63_vm3, %v1752_v54 }
0x16fe   :  { %v1557_v51 = vpop.permute.xlu2 %1556 }
0x16ff   :  { %v1559_v19 = vmul.f32 %v1557_v51, %v1553_v18  ;;  %v1750_v51 = vld [vmem:[%s4740_s2 + $0x10] sm:$0xff] }
0x1701   :  { %1561 = vrot.lane.b32.xlu1 %v1559_v19, %s3767_s1 }
0x1712   :  { %v1650_v27 = vpop.permute.xlu0 %1649 }
0x1713   :  { %v1652_v53 = vmul.f32 %v1650_v27, %v1643_v33 }
0x1715   :  { %1654 = vrot.lane.b32.xlu2 %v1652_v53, %s3767_s1 }
0x176f   :  { %v1655_v40 = vpop.permute.xlu2 %1654 }
0x1770   :  { %v1657_v17 = vadd.f32 %v1655_v40, %v1647_v29 }
0x1772   :  { %3574 = vtanh.f32 %v1657_v17  ;;  %v1840_v59 = vrot.slane %v1657_v17, 1 }
0x1773   :  { %v1562_v32 = vpop.permute.xlu1 %1561 }
0x1774   :  { %v4284_v37 = vadd.f32 %v1562_v32, %v1554_v63  ;;  %v3463_v63 = vld [vmem:[#allocation4 + $0x90] ss:$0 sm:$0xff]  ;;  %v1783_v32 = vpop.f32.mrf.mxu2 }
0x1776   :  { %3576 = vtanh.f32 %v4284_v37 }
0x1778   :  { %v3575_v41 = vpop.eup %3574 }
0x1779   :  { %1660 = vrot.lane.b32.xlu1 %v3575_v41, %s3766_s0 }
0x177c   :  { %v3577_v39 = vpop.eup %3576 }
0x177d   :  { %1567 = vrot.lane.b32.xlu0 %v3577_v39, %s3766_s0 }
0x17eb   :  { %v1661_v42 = vpop.permute.xlu1 %1660 }
0x17ec   :  { %v1663_v0 = vmul.f32 %v1661_v42, %v1643_v33  ;;  %v1748_v33 = vld [vmem:[%s4740_s2] sm:$0xff]  ;;  %s4340_s2 = smov 0  }
0x17ee   :  { %v1665_v35 = vrot.slane %v1663_v0, 1  ;;  %v1786_v0 = vpop.f32.mrf.mxu2 }
0x17ef   :  { %v1568_v43 = vpop.permute.xlu0 %1567 }
0x17f0   :  { %v1570_v47 = vmul.f32 %v1568_v43, %v1553_v18  ;;  %1666 = vrot.lane.b32.xlu0 %v1665_v35, %s3767_s1  ;;  %v1753_v18 = vld [vmem:[%s4741_s3 + $0x10] sm:$0xff] }
0x17f1   :  { %3338 = vmatmul.msk.f32.gmra.mxu2 %vm63_vm3, %v1753_v18 }
0x17f2   :  { %1572 = vrot.lane.b32.xlu2 %v1570_v47, %s3767_s1 }
0x184c   :  { %v1573_v26 = vpop.permute.xlu2 %1572 }
0x184d   :  { %3328 = vmatmul.msk.f32.vlgmr.msra.gmra.mxu3 %vm134_vm11, %v1573_v26 }
0x1855   :  { %3340 = vmatmul.msk.f32.vlgmr.msrb.gmra.mxu3 %vm97_vm0, %v1748_v33 }
0x185d   :  { %3341 = vmatmul.msk.f32.gmra.mxu3 %vm97_vm0, %v1749_v31 }
0x1862   :  { %v4292_v16 = vpop.permute.xlu0 %1666  }
0x1863   :  { %3332 = vmatmul.msk.f32.vlgmr.msra.gmra.mxu1 %vm134_vm11, %v4292_v16 }
0x1865   :  { %3342 = vmatmul.msk.f32.gmra.mxu3 %vm97_vm0, %v1750_v51 }
0x1874   :  { %v1789_v26 = vpop.f32.mrf.mxu2 }
0x18d0   :  { %v1593_v44 = vpop.f32.mrf.mxu3 }
0x18d8   :  { %v1821_v41 = vpop.f32.mrf.mxu3 }
0x18d9   :  { %v1822_v39 = vadd.f32 %v1821_v41, %v1783_v32 }
0x18db   :  { %v1831_v42 = vadd.f32 %v3463_v63, %v1822_v39 }
0x18dd   :  { %1834 = vst [vmem:[#allocation2] sm:$0xff] %v1831_v42 }
0x18e0   :  { %v1687_v34 = vpop.f32.mrf.mxu1  ;;  %v1824_v35 = vpop.f32.mrf.mxu3 }
0x18e1   :  { %v1688_v45 = vadd.f32 %v1687_v34, %v1593_v44  ;;  %v1825_v43 = vadd.f32 %v1824_v35, %v1786_v0 }
0x18e3   :  { %v1690_v22 = vadd.f32 %v4204_v48, %v1688_v45  ;;  %v1832_v47 = vadd.f32 %v3463_v63, %v1825_v43 }
0x18e5   :  { %v1691_v61 = vmul.f32 2.0, %v1690_v22  ;;  %1835 = vst [vmem:[#allocation2 + $0x8] sm:$0xff] %v1832_v47 }
0x18e7   :  { %v1692_v46 = vsel %vm3871_vm6, %v1691_v61, %v1690_v22 }
0x18e8   :  { %v3333_v49 = vmul.f32 -1.442695, %v1692_v46  ;;  %v1827_v44 = vpop.f32.mrf.mxu3 }
0x18ea   :  { %3578 = vpow2.f32 %v3333_v49 }
0x18f0   :  { %v3579_v50 = vpop.eup %3578 }
0x18f1   :  { %v1696_v52 = vadd.f32 1.0, %v3579_v50 }
0x18f3   :  { %3580 = vrcp.f32 %v1696_v52  ;;  %v1708_v24 = vand.u32 2147483648, %v1696_v52  ;;  %v1706_v55 = vand.u32 2147483647, %v1696_v52  ;;  %vm1702_vm15 = vweird.f32 %v1696_v52 }
0x18f5   :  { %v1709_v48 = vor.u32 1.1754944e-38, %v1708_v24  ;;  %vm1707_vm5 = vcmp.eq.f32.partialorder %v1706_v55, 8.507059e+37 }
0x18f9   :  { %v3581_v36 = vpop.eup %3580 }
0x18fa   :  { %v1698_v14 = vmul.f32 %v3581_v36, %v1696_v52  ;;  %vm1703_vm14 = vweird.f32 %v3581_v36 }
0x18fb   :  { %vm1704_vm4 = vmor %vm1702_vm15, %vm1703_vm14 }
0x18fc   :  { %v1699_v15 = vsub.f32 1.0, %v1698_v14 }
0x18fe   :  { %v1700_v23 = vmul.f32 %v3581_v36, %v1699_v15 }
0x1900   :  { %v1701_v56 = vadd.f32 %v3581_v36, %v1700_v23 }
0x1902   :  { %v1705_v20 = vsel %vm1704_vm4, %v3581_v36, %v1701_v56 }
0x1903   :  { %v1710_v57 = vsel %vm1707_vm5, %v1709_v48, %v1705_v20 }
0x1904   :  { %v1712_v21 = vmul.f32 2.0, %v1710_v57 }
0x1906   :  { %v3334_v30 = vadd.f32 -1.0, %v1712_v21 }
0x1908   :  { %v1714_v58 = vsel %vm3871_vm6, %v3334_v30, %v1710_v57 }
0x1909   :  { %1717 = vrot.lane.b32.xlu1 %v1714_v58, %s3766_s0  ;;  %v1715_v28 = vmul.f32 %v1714_v58, %v4284_v37  ;;  %v1828_v37 = vadd.f32 %v1827_v44, %v1789_v26 }
0x190b   :  { %v1833_v34 = vadd.f32 %v3463_v63, %v1828_v37 }
0x190d   :  { %1836 = vst [vmem:[#allocation2 + $0x10] sm:$0xff] %v1833_v34 }
0x1911   :  { %1841 = vrot.lane.b32.xlu1 %v1840_v59, %s3768_s9 }
0x197b   :  { %v1718_v19 = vpop.permute.xlu1 %1717 }
0x197c   :  { %v1720_v27 = vmul.f32 %v1718_v19, %v1714_v58 }
0x197e   :  { %1722 = vrot.lane.b32.xlu2 %v1720_v27, %s3767_s1 }
0x1983   :  { %v1842_v53 = vpop.permute.xlu1 %1841  }
0x19d8   :  { %v1723_v29 = vpop.permute.xlu2 %1722 }
0x19d9   :  { %v1725_v40 = vadd.f32 %v1723_v29, %v1715_v28  }
0x19db   :  { %3582 = vtanh.f32 %v1725_v40 }
0x19e1   :  { %v3583_v17 = vpop.eup %3582 }
0x19e2   :  { %1728 = vrot.lane.b32.xlu0 %v3583_v17, %s3766_s0 }
0x1a54   :  { %v1729_v45 = vpop.permute.xlu0 %1728 }
0x1a55   :  { %v1731_v22 = vmul.f32 %v1729_v45, %v1714_v58  }
0x1a56 LB: > { %1897 = vmatpush.msra.mxu1 %v3815_v4  ;;  %1968 = vmatpush.msra.mxu2 %v3823_v8  ;;  %s3343_s3 = sshll.u32 %s3759_s2, 3  ;;  %s3769_s23 = smov 64   ;;  %s3759_s2 = sphi %s4340_s2, %s1849_s2   ;;  %v3755_v16 = vphi %v4292_v16, %v3080_v16   ;;  %v3751_v53 = vphi %v1842_v53, %v3182_v53   ;;  %v3747_v22 = vphi %v1731_v22, %v3144_v22   ;;  %v3743_v40 = vphi %v1725_v40, %v3138_v40  }
0x1a57   : > { %1874 = vmatpush.msra.mxu0 %v3831_v12  ;;  %2035 = vmatpush.msra.mxu3 %v3831_v12  ;;  %s4395_s22 = scalar_lea.vmem [#allocation2], %s3343_s3  ;;  %s3770_s24 = smov 32  }
0x1a58   : > { %1898 = vmatpush.msra.mxu1 %v3813_v3  ;;  %1969 = vmatpush.msra.mxu2 %v3821_v7  ;;  %s3771_s25 = smov 96   ;;  %s3176_s26 = scalar_lea.vmem [#allocation3], %s3343_s3 }
0x1a59   : > { %1875 = vmatpush.msra.mxu0 %v3829_v11  ;;  %2036 = vmatpush.msra.mxu3 %v3829_v11  ;;  %s1849_s2 = sadd.s32 1, %s3759_s2  }
0x1a5a   : > { %1899 = vmatpush.msra.mxu1 %v3811_v2  ;;  %1970 = vmatpush.msra.mxu2 %v3819_v6  ;;  %p1846_p0 = scmp.ge.s32.totalorder %s1849_s2, 3  }
0x1a5b   : > { %1876 = vmatpush.msra.mxu0 %v3827_v10  ;;  %2037 = vmatpush.msra.mxu3 %v3827_v10 }
0x1a5c   : > { %1900 = vmatpush.msra.mxu1 %v3809_v1  ;;  %1971 = vmatpush.msra.mxu2 %v3817_v5 }
0x1a5d   : > { %3345 = vmatmul.msk.f32.vlgmr.msra.gmra.mxu1 %vm134_vm11, %v3755_v16  ;;  %1877 = vmatpush.msra.mxu0 %v3825_v9  ;;  %v4398_v16 = vld [vmem:[%s4395_s22] sm:$0xff] }
0x1a5e   : > { %2038 = vmatpush.msra.mxu3 %v3825_v9  ;;  %2129 = vmatpush.msrb.mxu1 %v3823_v8 }
0x1a5f   : > { %2055 = vmatpush.msrb.mxu0 %v3815_v4  ;;  %2196 = vmatpush.msrb.mxu2 %v3831_v12 }
0x1a60   : > { %2216 = vmatpush.msrb.mxu3 %v3815_v4  ;;  %2130 = vmatpush.msrb.mxu1 %v3821_v7 }
0x1a61   : > { %2056 = vmatpush.msrb.mxu0 %v3813_v3  ;;  %2197 = vmatpush.msrb.mxu2 %v3829_v11 }
0x1a62   : > { %2217 = vmatpush.msrb.mxu3 %v3813_v3  ;;  %2131 = vmatpush.msrb.mxu1 %v3819_v6 }
0x1a63   : > { %2057 = vmatpush.msrb.mxu0 %v3811_v2  ;;  %2198 = vmatpush.msrb.mxu2 %v3827_v10 }
0x1a64   : > { %2218 = vmatpush.msrb.mxu3 %v3811_v2  ;;  %2132 = vmatpush.msrb.mxu1 %v3817_v5 }
0x1a65   : > { %2058 = vmatpush.msrb.mxu0 %v3809_v1  ;;  %2199 = vmatpush.msrb.mxu2 %v3825_v9 }
0x1a66   : > { %2219 = vmatpush.msrb.mxu3 %v3809_v1  ;;  %2357 = vmatpush.msra.mxu1 %v3831_v12 }
0x1a68   : > { %2358 = vmatpush.msra.mxu1 %v3829_v11 }
0x1a6a   : > { %2359 = vmatpush.msra.mxu1 %v3827_v10 }
0x1a6c   : > { %2360 = vmatpush.msra.mxu1 %v3825_v9 }
0x1ada   : > { %v1902_v61 = vpop.f32.mrf.mxu1 }
0x1adb   : > { %v1905_v46 = vadd.f32 %v1902_v61, %v4398_v16 }
0x1add   : > { %v1906_v49 = vmul.f32 2.0, %v1905_v46 }
0x1adf   : > { %v1907_v50 = vsel %vm3871_vm6, %v1906_v49, %v1905_v46 }
0x1ae0   : > { %v3346_v52 = vmul.f32 -1.442695, %v1907_v50 }
0x1ae2   : > { %3597 = vpow2.f32 %v3346_v52 }
0x1ae8   : > { %v3598_v36 = vpop.eup %3597 }
0x1ae9   : > { %v1911_v14 = vadd.f32 1.0, %v3598_v36 }
0x1aeb   : > { %3599 = vrcp.f32 %v1911_v14  ;;  %v1923_v55 = vand.u32 2147483648, %v1911_v14  ;;  %v1921_v48 = vand.u32 2147483647, %v1911_v14  ;;  %vm1917_vm7 = vweird.f32 %v1911_v14 }
0x1aed   : > { %v1924_v57 = vor.u32 1.1754944e-38, %v1923_v55  ;;  %vm1922_vm9 = vcmp.eq.f32.partialorder %v1921_v48, 8.507059e+37 }
0x1af1   : > { %v3600_v15 = vpop.eup %3599 }
0x1af2   : > { %v1913_v24 = vmul.f32 %v3600_v15, %v1911_v14  ;;  %vm1918_vm3 = vweird.f32 %v3600_v15 }
0x1af3   : > { %vm1919_vm8 = vmor %vm1917_vm7, %vm1918_vm3 }
0x1af4   : > { %v1914_v23 = vsub.f32 1.0, %v1913_v24 }
0x1af6   : > { %v1915_v56 = vmul.f32 %v3600_v15, %v1914_v23 }
0x1af8   : > { %v1916_v20 = vadd.f32 %v3600_v15, %v1915_v56 }
0x1afa   : > { %v1920_v21 = vsel %vm1919_vm8, %v3600_v15, %v1916_v20 }
0x1afb   : > { %v1925_v30 = vsel %vm1922_vm9, %v1924_v57, %v1920_v21 }
0x1afc   : > { %v1927_v58 = vmul.f32 2.0, %v1925_v30 }
0x1afe   : > { %v3347_v59 = vadd.f32 -1.0, %v1927_v58 }
0x1b00   : > { %v1929_v60 = vsel %vm3871_vm6, %v3347_v59, %v1925_v30 }
0x1b01   : > { %1936 = vrot.lane.b32.xlu0 %v1929_v60, %s3769_s23 }
0x1b09   : > { %1931 = vrot.lane.b32.xlu0 %v3751_v53, %s3770_s24 }
0x1b73   : > { %v1937_v62 = vpop.permute.xlu0 %1936 }
0x1b74   : > { %v1939_v25 = vmul.f32 %v1937_v62, %v1929_v60 }
0x1b76   : > { %1941 = vrot.lane.b32.xlu1 %v1939_v25, %s3770_s24 }
0x1b7b   : > { %v1932_v33 = vpop.permute.xlu0 %1931 }
0x1b7c   : > { %v1934_v54 = vmul.f32 %v1932_v33, %v1929_v60 }
0x1be8   : > { %v1942_v31 = vpop.permute.xlu1 %1941 }
0x1be9   : > { %v4409_v18 = vadd.f32 %v1942_v31, %v1934_v54 }
0x1beb   : > { %3601 = vtanh.f32 %v4409_v18 }
0x1bf1   : > { %v3602_v51 = vpop.eup %3601 }
0x1bf2   : > { %1947 = vrot.lane.b32.xlu1 %v3602_v51, %s3769_s23 }
0x1c64   : > { %v1948_v19 = vpop.permute.xlu1 %1947 }
0x1c65   : > { %v1950_v27 = vmul.f32 %v1948_v19, %v1929_v60 }
0x1c67   : > { %1952 = vrot.lane.b32.xlu2 %v1950_v27, %s3770_s24 }
0x1c6f   : > { %1858 = vrot.lane.b32.xlu2 %v3747_v22, %s3770_s24 }
0x1cc1   : > { %v1953_v53 = vpop.permute.xlu2 %1952 }
0x1cc2   : > { %3348 = vmatmul.msk.f32.vlgmr.msra.gmra.mxu2 %vm134_vm11, %v1953_v53 }
0x1cc3   : > { %2377 = vmatpush.msra.mxu2 %v3815_v4 }
0x1cc5   : > { %2378 = vmatpush.msra.mxu2 %v3813_v3 }
0x1cc7   : > { %2379 = vmatpush.msra.mxu2 %v3811_v2 }
0x1cc9   : > { %v1859_v28 = vpop.permute.xlu2 %1858  ;;  %2380 = vmatpush.msra.mxu2 %v3809_v1 }
0x1cca   : > { %3344 = vmatmul.msk.f32.vlgmr.msra.gmra.mxu0 %vm134_vm11, %v1859_v28 }
0x1ccb   : > { %2290 = vmatpush.msra.mxu0 %v3823_v8 }
0x1ccd   : > { %2291 = vmatpush.msra.mxu0 %v3821_v7 }
0x1ccf   : > { %2292 = vmatpush.msra.mxu0 %v3819_v6 }
0x1cd1   : > { %2293 = vmatpush.msra.mxu0 %v3817_v5 }
0x1cd2   : > { %3352 = vmatmul.msk.f32.vlgmr.msrb.gmra.mxu0 %vm134_vm11, %v1953_v53 }
0x1cd3   : > { %2518 = vmatpush.msrb.mxu0 %v3831_v12 }
0x1cd5   : > { %2519 = vmatpush.msrb.mxu0 %v3829_v11 }
0x1cd7   : > { %2520 = vmatpush.msrb.mxu0 %v3827_v10 }
0x1cd9   : > { %2521 = vmatpush.msrb.mxu0 %v3825_v9 }
0x1d45   : > { %v1973_v29 = vpop.f32.mrf.mxu2 }
0x1d47   : > { %v1879_v17 = vpop.f32.mrf.mxu0 }
0x1d48   : > { %v1974_v63 = vadd.f32 %v1973_v29, %v1879_v17 }
0x1d4a   : > { %v1976_v32 = vadd.f32 %v1974_v63, %v3833_v13 }
0x1d4c   : > { %v1977_v41 = vmul.f32 2.0, %v1976_v32 }
0x1d4e   : > { %v1978_v39 = vsel %vm3871_vm6, %v1977_v41, %v1976_v32  ;;  %v2092_v41 = vrot.slane %v4409_v18, 7 }
0x1d4f   : > { %v3349_v42 = vmul.f32 -1.442695, %v1978_v39  ;;  %v2060_v0 = vpop.f32.mrf.mxu0 }
0x1d50   : > { %v2064_v35 = vrot.slane %v2060_v0, 7 }
0x1d51   : > { %3603 = vpow2.f32 %v3349_v42 }
0x1d52   : > { %v2066_v43 = vadd.f32 %v2064_v35, %v4398_v16 }
0x1d54   : > { %v2067_v47 = vmul.f32 2.0, %v2066_v43 }
0x1d56   : > { %v2068_v26 = vsel %vm3871_vm6, %v2067_v47, %v2066_v43 }
0x1d57   : > { %v3604_v44 = vpop.eup %3603  ;;  %v3353_v37 = vmul.f32 -1.442695, %v2068_v26 }
0x1d58   : > { %v1982_v34 = vadd.f32 1.0, %v3604_v44 }
0x1d59   : > { %3605 = vpow2.f32 %v3353_v37 }
0x1d5a   : > { %3607 = vrcp.f32 %v1982_v34  ;;  %v1994_v50 = vand.u32 2147483648, %v1982_v34  ;;  %v1992_v36 = vand.u32 2147483647, %v1982_v34  ;;  %vm1988_vm12 = vweird.f32 %v1982_v34 }
0x1d5c   : > { %v1995_v24 = vor.u32 1.1754944e-38, %v1994_v50  ;;  %vm1993_vm14 = vcmp.eq.f32.partialorder %v1992_v36, 8.507059e+37 }
0x1d5f   : > { %v3606_v45 = vpop.eup %3605 }
0x1d60   : > { %v3608_v22 = vpop.eup %3607  ;;  %v2072_v61 = vadd.f32 1.0, %v3606_v45 }
0x1d61   : > { %v1984_v46 = vmul.f32 %v3608_v22, %v1982_v34  ;;  %vm1989_vm10 = vweird.f32 %v3608_v22 }
0x1d62   : > { %3609 = vrcp.f32 %v2072_v61  ;;  %vm1990_vm13 = vmor %vm1988_vm12, %vm1989_vm10  ;;  %v2084_v57 = vand.u32 2147483648, %v2072_v61  ;;  %v2082_v58 = vand.u32 2147483647, %v2072_v61  ;;  %vm2078_vm4 = vweird.f32 %v2072_v61 }
0x1d63   : > { %v1985_v49 = vsub.f32 1.0, %v1984_v46 }
0x1d64   : > { %v2085_v62 = vor.u32 1.1754944e-38, %v2084_v57  ;;  %vm2083_vm3 = vcmp.eq.f32.partialorder %v2082_v58, 8.507059e+37 }
0x1d65   : > { %v1986_v52 = vmul.f32 %v3608_v22, %v1985_v49 }
0x1d67   : > { %v1987_v14 = vadd.f32 %v3608_v22, %v1986_v52 }
0x1d68   : > { %v3610_v15 = vpop.eup %3609 }
0x1d69   : > { %v1991_v23 = vsel %vm1990_vm13, %v3608_v22, %v1987_v14  ;;  %v2074_v55 = vmul.f32 %v3610_v15, %v2072_v61  ;;  %vm2079_vm15 = vweird.f32 %v3610_v15 }
0x1d6a   : > { %v1996_v56 = vsel %vm1993_vm14, %v1995_v24, %v1991_v23  ;;  %vm2080_vm5 = vmor %vm2078_vm4, %vm2079_vm15 }
0x1d6b   : > { %v1998_v48 = vmul.f32 2.0, %v1996_v56  ;;  %v2075_v20 = vsub.f32 1.0, %v2074_v55 }
0x1d6d   : > { %v3350_v21 = vadd.f32 -1.0, %v1998_v48  ;;  %v2076_v30 = vmul.f32 %v3610_v15, %v2075_v20 }
0x1d6f   : > { %v2000_v59 = vsel %vm3871_vm6, %v3350_v21, %v1996_v56  ;;  %v2077_v60 = vadd.f32 %v3610_v15, %v2076_v30 }
0x1d70   : > { %2003 = vrot.lane.b32.xlu0 %v2000_v59, %s3769_s23  ;;  %v2001_v29 = vmul.f32 %v3743_v40, %v2000_v59 }
0x1d71   : > { %v2081_v25 = vsel %vm2080_vm5, %v3610_v15, %v2077_v60 }
0x1d72   : > { %v2086_v33 = vsel %vm2083_vm3, %v2085_v62, %v2081_v25 }
0x1d73   : > { %v2088_v54 = vmul.f32 2.0, %v2086_v33 }
0x1d75   : > { %v3354_v31 = vadd.f32 -1.0, %v2088_v54 }
0x1d77   : > { %v2090_v51 = vsel %vm3871_vm6, %v3354_v31, %v2086_v33 }
0x1d78   : > { %2096 = vrot.lane.b32.xlu1 %v2090_v51, %s3769_s23  ;;  %v2094_v39 = vmul.f32 %v2092_v41, %v2090_v51 }
0x1de2   : > { %v2004_v19 = vpop.permute.xlu0 %2003 }
0x1de3   : > { %v2006_v27 = vmul.f32 %v2004_v19, %v2000_v59 }
0x1de5   : > { %2008 = vrot.lane.b32.xlu2 %v2006_v27, %s3770_s24 }
0x1dea   : > { %v2097_v53 = vpop.permute.xlu1 %2096 }
0x1deb   : > { %v2099_v28 = vmul.f32 %v2097_v53, %v2090_v51 }
0x1ded   : > { %2101 = vrot.lane.b32.xlu0 %v2099_v28, %s3770_s24 }
0x1e3f   : > { %v2009_v17 = vpop.permute.xlu2 %2008 }
0x1e40   : > { %v4446_v63 = vadd.f32 %v2009_v17, %v2001_v29 }
0x1e42   : > { %3611 = vtanh.f32 %v4446_v63 }
0x1e48   : > { %v3612_v32 = vpop.eup %3611 }
0x1e49   : > { %2014 = vrot.lane.b32.xlu1 %v3612_v32, %s3769_s23 }
0x1e5f   : > { %v2102_v42 = vpop.permute.xlu0 %2101 }
0x1e60   : > { %v4451_v0 = vadd.f32 %v2102_v42, %v2094_v39 }
0x1e62   : > { %3613 = vtanh.f32 %v4451_v0 }
0x1e68   : > { %v3614_v35 = vpop.eup %3613 }
0x1e69   : > { %2107 = vrot.lane.b32.xlu2 %v3614_v35, %s3769_s23 }
0x1ebb   : > { %v2015_v40 = vpop.permute.xlu1 %2014 }
0x1ebc   : > { %v4455_v43 = vmul.f32 %v2015_v40, %v2000_v59 }
0x1ebe   : > { %2019 = vrot.lane.b32.xlu0 %v4455_v43, %s3770_s24 }
0x1ec3   : > { %v2108_v47 = vpop.permute.xlu2 %2107 }
0x1ec4   : > { %v2110_v26 = vmul.f32 %v2108_v47, %v2090_v51 }
0x1ec6   : > { %v2112_v44 = vrot.slane %v2110_v26, 1 }
0x1ec8   : > { %2113 = vrot.lane.b32.xlu1 %v2112_v44, %s3770_s24 }
0x1f30   : > { %v2020_v18 = vpop.permute.xlu0 %2019 }
0x1f31   : > { %3351 = vmatmul.msk.f32.vlgmr.msra.gmra.mxu3 %vm134_vm11, %v2020_v18 }
0x1f32   : > { %2451 = vmatpush.msra.mxu3 %v3823_v8 }
0x1f34   : > { %2452 = vmatpush.msra.mxu3 %v3821_v7 }
0x1f36   : > { %2453 = vmatpush.msra.mxu3 %v3819_v6 }
0x1f38   : > { %2454 = vmatpush.msra.mxu3 %v3817_v5 }
0x1f3a   : > { %v2114_v37 = vpop.permute.xlu1 %2113 }
0x1f3b   : > { %3355 = vmatmul.msk.f32.vlgmr.msrb.gmra.mxu1 %vm134_vm11, %v2114_v37  ;;  %3359 = vmatmul.msk.f32.vlgmr.msrb.gmra.mxu3 %vm134_vm11, %v2114_v37 }
0x1f3c   : > { %2538 = vmatpush.msrb.mxu1 %v3815_v4  ;;  %2679 = vmatpush.msrb.mxu3 %v3831_v12 }
0x1f3e   : > { %2539 = vmatpush.msrb.mxu1 %v3813_v3  ;;  %2680 = vmatpush.msrb.mxu3 %v3829_v11 }
0x1f40   : > { %2540 = vmatpush.msrb.mxu1 %v3811_v2  ;;  %2681 = vmatpush.msrb.mxu3 %v3827_v10 }
0x1f42   : > { %2541 = vmatpush.msrb.mxu1 %v3809_v1  ;;  %2682 = vmatpush.msrb.mxu3 %v3825_v9 }
0x1fb4   : > { %v2040_v34 = vpop.f32.mrf.mxu3 }
0x1fb8   : > { %v2134_v45 = vpop.f32.mrf.mxu1 }
0x1fb9   : > { %v2135_v22 = vadd.f32 %v2134_v45, %v2040_v34 }
0x1fbb   : > { %v2137_v61 = vadd.f32 %v2135_v22, %v3833_v13 }
0x1fbd   : > { %v2138_v46 = vmul.f32 2.0, %v2137_v61 }
0x1fbe   : > { %v2221_v49 = vpop.f32.mrf.mxu3 }
0x1fbf   : > { %v2139_v50 = vsel %vm3871_vm6, %v2138_v46, %v2137_v61  ;;  %v2225_v52 = vrot.slane %v2221_v49, 6  ;;  %v2253_v46 = vrot.slane %v4451_v0, 7 }
0x1fc0   : > { %v3356_v36 = vmul.f32 -1.442695, %v2139_v50 }
0x1fc1   : > { %v2227_v14 = vadd.f32 %v2225_v52, %v4398_v16 }
0x1fc2   : > { %3615 = vpow2.f32 %v3356_v36 }
0x1fc3   : > { %v2228_v15 = vmul.f32 2.0, %v2227_v14 }
0x1fc5   : > { %v2229_v24 = vsel %vm3871_vm6, %v2228_v15, %v2227_v14 }
0x1fc6   : > { %v3360_v23 = vmul.f32 -1.442695, %v2229_v24 }
0x1fc8   : > { %v3616_v55 = vpop.eup %3615  ;;  %3617 = vpow2.f32 %v3360_v23 }
0x1fc9   : > { %v2143_v56 = vadd.f32 1.0, %v3616_v55 }
0x1fcb   : > { %3619 = vrcp.f32 %v2143_v56  ;;  %v2155_v58 = vand.u32 2147483648, %v2143_v56  ;;  %v2153_v60 = vand.u32 2147483647, %v2143_v56  ;;  %vm2149_vm8 = vweird.f32 %v2143_v56 }
0x1fcd   : > { %v2156_v54 = vor.u32 1.1754944e-38, %v2155_v58  ;;  %vm2154_vm10 = vcmp.eq.f32.partialorder %v2153_v60, 8.507059e+37 }
0x1fce   : > { %v3618_v48 = vpop.eup %3617 }
0x1fcf   : > { %v2233_v20 = vadd.f32 1.0, %v3618_v48 }
0x1fd1   : > { %v3620_v57 = vpop.eup %3619  ;;  %3621 = vrcp.f32 %v2233_v20  ;;  %v2245_v27 = vand.u32 2147483648, %v2233_v20  ;;  %v2243_v29 = vand.u32 2147483647, %v2233_v20  ;;  %vm2239_vm13 = vweird.f32 %v2233_v20 }
0x1fd2   : > { %v2145_v21 = vmul.f32 %v3620_v57, %v2143_v56  ;;  %vm2150_vm7 = vweird.f32 %v3620_v57 }
0x1fd3   : > { %vm2151_vm9 = vmor %vm2149_vm8, %vm2150_vm7  ;;  %v2246_v41 = vor.u32 1.1754944e-38, %v2245_v27  ;;  %vm2244_vm15 = vcmp.eq.f32.partialorder %v2243_v29, 8.507059e+37 }
0x1fd4   : > { %v2146_v30 = vsub.f32 1.0, %v2145_v21 }
0x1fd6   : > { %v2147_v59 = vmul.f32 %v3620_v57, %v2146_v30 }
0x1fd7   : > { %v3622_v62 = vpop.eup %3621 }
0x1fd8   : > { %v2148_v25 = vadd.f32 %v3620_v57, %v2147_v59  ;;  %v2235_v33 = vmul.f32 %v3622_v62, %v2233_v20  ;;  %vm2240_vm12 = vweird.f32 %v3622_v62 }
0x1fd9   : > { %vm2241_vm14 = vmor %vm2239_vm13, %vm2240_vm12  ;;  %vm3160_vm13 = vcmask 1040384  }
0x1fda   : > { %v2152_v31 = vsel %vm2151_vm9, %v3620_v57, %v2148_v25  ;;  %v2236_v51 = vsub.f32 1.0, %v2235_v33 }
0x1fdb   : > { %v2157_v19 = vsel %vm2154_vm10, %v2156_v54, %v2152_v31 }
0x1fdc   : > { %v2159_v53 = vmul.f32 2.0, %v2157_v19  ;;  %v2237_v28 = vmul.f32 %v3622_v62, %v2236_v51 }
0x1fde   : > { %v3357_v17 = vadd.f32 -1.0, %v2159_v53  ;;  %v2238_v32 = vadd.f32 %v3622_v62, %v2237_v28 }
0x1fe0   : > { %v2161_v39 = vsel %vm3871_vm6, %v3357_v17, %v2157_v19  ;;  %v2242_v42 = vsel %vm2241_vm14, %v3622_v62, %v2238_v32  ;;  %vm3162_vm14 = vcmask 1041408  }
0x1fe1   : > { %2164 = vrot.lane.b32.xlu2 %v2161_v39, %s3769_s23  ;;  %v2247_v35 = vsel %vm2244_vm15, %v2246_v41, %v2242_v42  ;;  %v2162_v45 = vmul.f32 %v2161_v39, %v4446_v63 }
0x1fe2   : > { %v2249_v40 = vmul.f32 2.0, %v2247_v35 }
0x1fe4   : > { %v3361_v47 = vadd.f32 -1.0, %v2249_v40 }
0x1fe6   : > { %v2251_v26 = vsel %vm3871_vm6, %v3361_v47, %v2247_v35 }
0x1fe7   : > { %2257 = vrot.lane.b32.xlu0 %v2251_v26, %s3769_s23  ;;  %v2255_v49 = vmul.f32 %v2253_v46, %v2251_v26 }
0x203b   : > { %v2165_v44 = vpop.permute.xlu2 %2164 }
0x203c   : > { %v2167_v18 = vmul.f32 %v2165_v44, %v2161_v39 }
0x203e   : > { %2169 = vrot.lane.b32.xlu1 %v2167_v18, %s3770_s24 }
0x2059   : > { %v2258_v37 = vpop.permute.xlu0 %2257 }
0x205a   : > { %v2260_v34 = vmul.f32 %v2258_v37, %v2251_v26 }
0x205c   : > { %2262 = vrot.lane.b32.xlu2 %v2260_v34, %s3770_s24 }
0x20b0   : > { %v2170_v22 = vpop.permute.xlu1 %2169 }
0x20b1   : > { %v4490_v61 = vadd.f32 %v2170_v22, %v2162_v45 }
0x20b3   : > { %3623 = vtanh.f32 %v4490_v61 }
0x20b6   : > { %v2263_v50 = vpop.permute.xlu2 %2262 }
0x20b7   : > { %v4494_v52 = vadd.f32 %v2263_v50, %v2255_v49 }
0x20b9   : > { %v3624_v36 = vpop.eup %3623  ;;  %3625 = vtanh.f32 %v4494_v52 }
0x20ba   : > { %2175 = vrot.lane.b32.xlu0 %v3624_v36, %s3769_s23 }
0x20bf   : > { %v3626_v14 = vpop.eup %3625 }
0x20c0   : > { %2268 = vrot.lane.b32.xlu1 %v3626_v14, %s3769_s23 }
0x212c   : > { %v2176_v63 = vpop.permute.xlu0 %2175 }
0x212d   : > { %v4499_v15 = vmul.f32 %v2176_v63, %v2161_v39 }
0x212f   : > { %2180 = vrot.lane.b32.xlu2 %v4499_v15, %s3770_s24 }
0x2132   : > { %v2269_v0 = vpop.permute.xlu1 %2268 }
0x2133   : > { %v2271_v24 = vmul.f32 %v2269_v0, %v2251_v26 }
0x2135   : > { %v2273_v23 = vrot.slane %v2271_v24, 2 }
0x2137   : > { %2274 = vrot.lane.b32.xlu0 %v2273_v23, %s3770_s24 }
0x2189   : > { %v2181_v55 = vpop.permute.xlu2 %2180 }
0x218a   : > { %3358 = vmatmul.msk.f32.vlgmr.msrb.gmra.mxu2 %vm134_vm11, %v2181_v55 }
0x218b   : > { %2612 = vmatpush.msrb.mxu2 %v3823_v8 }
0x218d   : > { %2613 = vmatpush.msrb.mxu2 %v3821_v7 }
0x218f   : > { %2614 = vmatpush.msrb.mxu2 %v3819_v6 }
0x2191   : > { %2615 = vmatpush.msrb.mxu2 %v3817_v5 }
0x21a9   : > { %v2275_v56 = vpop.permute.xlu0 %2274 }
0x21aa   : > { %3362 = vmatmul.msk.f32.vlgmr.msra.gmra.mxu0 %vm134_vm11, %v2275_v56  ;;  %3366 = vmatmul.msk.f32.vlgmr.msra.gmra.mxu2 %vm134_vm11, %v2275_v56 }
0x21ab   : > { %2699 = vmatpush.msra.mxu0 %v3815_v4  ;;  %2840 = vmatpush.msra.mxu2 %v3831_v12 }
0x21ad   : > { %2700 = vmatpush.msra.mxu0 %v3813_v3  ;;  %2841 = vmatpush.msra.mxu2 %v3829_v11 }
0x21af   : > { %2701 = vmatpush.msra.mxu0 %v3811_v2  ;;  %2842 = vmatpush.msra.mxu2 %v3827_v10 }
0x21b1   : > { %2702 = vmatpush.msra.mxu0 %v3809_v1  ;;  %2843 = vmatpush.msra.mxu2 %v3825_v9 }
0x220d   : > { %v2201_v48 = vpop.f32.mrf.mxu2 }
0x2227   : > { %v2295_v20 = vpop.f32.mrf.mxu0 }
0x2228   : > { %v2296_v57 = vadd.f32 %v2295_v20, %v2201_v48 }
0x222a   : > { %v2298_v21 = vadd.f32 %v2296_v57, %v3833_v13  ;;  %v2414_v57 = vrot.slane %v4494_v52, 7  ;;  %v3145_v52 = vrot.slane %v4499_v15, 7 }
0x222c   : > { %v2299_v30 = vmul.f32 2.0, %v2298_v21 }
0x222d   : > { %v2382_v58 = vpop.f32.mrf.mxu2 }
0x222e   : > { %v2300_v59 = vsel %vm3871_vm6, %v2299_v30, %v2298_v21  ;;  %v2386_v60 = vrot.slane %v2382_v58, 5 }
0x222f   : > { %v3363_v62 = vmul.f32 -1.442695, %v2300_v59 }
0x2230   : > { %v2388_v25 = vadd.f32 %v2386_v60, %v4398_v16 }
0x2231   : > { %3627 = vpow2.f32 %v3363_v62 }
0x2232   : > { %v2389_v33 = vmul.f32 2.0, %v2388_v25 }
0x2234   : > { %v2390_v54 = vsel %vm3871_vm6, %v2389_v33, %v2388_v25 }
0x2235   : > { %v3367_v31 = vmul.f32 -1.442695, %v2390_v54 }
0x2237   : > { %v3628_v51 = vpop.eup %3627  ;;  %3629 = vpow2.f32 %v3367_v31 }
0x2238   : > { %v2304_v19 = vadd.f32 1.0, %v3628_v51 }
0x223a   : > { %3631 = vrcp.f32 %v2304_v19  ;;  %v2316_v32 = vand.u32 2147483648, %v2304_v19  ;;  %v2314_v39 = vand.u32 2147483647, %v2304_v19  ;;  %vm2310_vm5 = vweird.f32 %v2304_v19 }
0x223c   : > { %v2317_v47 = vor.u32 1.1754944e-38, %v2316_v32  ;;  %vm2315_vm7 = vcmp.eq.f32.partialorder %v2314_v39, 8.507059e+37 }
0x223d   : > { %v3630_v27 = vpop.eup %3629 }
0x223e   : > { %v2394_v53 = vadd.f32 1.0, %v3630_v27 }
0x2240   : > { %v3632_v28 = vpop.eup %3631  ;;  %3633 = vrcp.f32 %v2394_v53  ;;  %v2406_v37 = vand.u32 2147483648, %v2394_v53  ;;  %v2404_v22 = vand.u32 2147483647, %v2394_v53  ;;  %vm2400_vm9 = vweird.f32 %v2394_v53 }
0x2241   : > { %v2306_v29 = vmul.f32 %v3632_v28, %v2304_v19  ;;  %vm2311_vm4 = vweird.f32 %v3632_v28  ;;  %v3161_v19 = vsel %vm3160_vm13, %v4455_v43, %v3145_v52 }
0x2242   : > { %vm2312_vm3 = vmor %vm2310_vm5, %vm2311_vm4  ;;  %v2407_v50 = vor.u32 1.1754944e-38, %v2406_v37  ;;  %vm2405_vm12 = vcmp.eq.f32.partialorder %v2404_v22, 8.507059e+37 }
0x2243   : > { %v2307_v17 = vsub.f32 1.0, %v2306_v29 }
0x2245   : > { %v2308_v41 = vmul.f32 %v3632_v28, %v2307_v17 }
0x2246   : > { %v3634_v42 = vpop.eup %3633 }
0x2247   : > { %v2309_v35 = vadd.f32 %v3632_v28, %v2308_v41  ;;  %v2396_v40 = vmul.f32 %v3634_v42, %v2394_v53  ;;  %vm2401_vm8 = vweird.f32 %v3634_v42 }
0x2248   : > { %vm2402_vm10 = vmor %vm2400_vm9, %vm2401_vm8 }
0x2249   : > { %v2313_v26 = vsel %vm2312_vm3, %v3632_v28, %v2309_v35  ;;  %v2397_v44 = vsub.f32 1.0, %v2396_v40 }
0x224a   : > { %v2318_v18 = vsel %vm2315_vm7, %v2317_v47, %v2313_v26 }
0x224b   : > { %v2320_v34 = vmul.f32 2.0, %v2318_v18  ;;  %v2398_v45 = vmul.f32 %v3634_v42, %v2397_v44 }
0x224d   : > { %v3364_v46 = vadd.f32 -1.0, %v2320_v34  ;;  %v2399_v49 = vadd.f32 %v3634_v42, %v2398_v45 }
0x224f   : > { %v2322_v36 = vsel %vm3871_vm6, %v3364_v46, %v2318_v18  ;;  %v2403_v14 = vsel %vm2402_vm10, %v3634_v42, %v2399_v49 }
0x2250   : > { %2325 = vrot.lane.b32.xlu1 %v2322_v36, %s3769_s23  ;;  %v2408_v63 = vsel %vm2405_vm12, %v2407_v50, %v2403_v14  ;;  %v2323_v60 = vmul.f32 %v2322_v36, %v4490_v61  ;;  %vm3164_vm12 = vcmask 1042432  }
0x2251   : > { %v2410_v0 = vmul.f32 2.0, %v2408_v63 }
0x2253   : > { %v3368_v24 = vadd.f32 -1.0, %v2410_v0 }
0x2255   : > { %v2412_v23 = vsel %vm3871_vm6, %v3368_v24, %v2408_v63 }
0x2256   : > { %2418 = vrot.lane.b32.xlu2 %v2412_v23, %s3769_s23  ;;  %v2416_v21 = vmul.f32 %v2414_v57, %v2412_v23 }
0x22b0   : > { %v2419_v55 = vpop.permute.xlu2 %2418 }
0x22b1   : > { %v2421_v56 = vmul.f32 %v2419_v55, %v2412_v23 }
0x22b3   : > { %2423 = vrot.lane.b32.xlu1 %v2421_v56, %s3770_s24 }
0x22c2   : > { %v2326_v48 = vpop.permute.xlu1 %2325 }
0x22c3   : > { %v2328_v20 = vmul.f32 %v2326_v48, %v2322_v36 }
0x22c5   : > { %2330 = vrot.lane.b32.xlu0 %v2328_v20, %s3770_s24 }
0x2325   : > { %v2424_v30 = vpop.permute.xlu1 %2423 }
0x2326   : > { %v4534_v58 = vadd.f32 %v2424_v30, %v2416_v21 }
0x2328   : > { %3635 = vtanh.f32 %v4534_v58 }
0x232e   : > { %v3636_v59 = vpop.eup %3635 }
0x232f   : > { %2429 = vrot.lane.b32.xlu0 %v3636_v59, %s3769_s23 }
0x2337   : > { %v2331_v62 = vpop.permute.xlu0 %2330 }
0x2338   : > { %v4539_v25 = vadd.f32 %v2331_v62, %v2323_v60 }
0x233a   : > { %3637 = vtanh.f32 %v4539_v25 }
0x2340   : > { %v3638_v33 = vpop.eup %3637 }
0x2341   : > { %2336 = vrot.lane.b32.xlu2 %v3638_v33, %s3769_s23 }
0x239b   : > { %v2337_v54 = vpop.permute.xlu2 %2336 }
0x239c   : > { %v2339_v31 = vmul.f32 %v2337_v54, %v2322_v36 }
0x239e   : > { %v3147_v51 = vrot.slane %v2339_v31, 6  ;;  %2341 = vrot.lane.b32.xlu1 %v2339_v31, %s3770_s24 }
0x23a0   : > { %v4546_v61 = vsel %vm3162_vm14, %v3161_v19, %v3147_v51 }
0x23a1   : > { %v2430_v27 = vpop.permute.xlu0 %2429 }
0x23a2   : > { %v2432_v53 = vmul.f32 %v2430_v27, %v2412_v23 }
0x23a4   : > { %v2434_v28 = vrot.slane %v2432_v53, 3 }
0x23a6   : > { %2435 = vrot.lane.b32.xlu2 %v2434_v28, %s3770_s24 }
0x2400   : > { %v2436_v29 = vpop.permute.xlu2 %2435 }
0x2401   : > { %3369 = vmatmul.msk.f32.vlgmr.msra.gmra.mxu3 %vm134_vm11, %v2436_v29 }
0x2402   : > { %2860 = vmatpush.msra.mxu3 %v3815_v4 }
0x2404   : > { %2861 = vmatpush.msra.mxu3 %v3813_v3 }
0x2406   : > { %2862 = vmatpush.msra.mxu3 %v3811_v2 }
0x2408   : > { %2863 = vmatpush.msra.mxu3 %v3809_v1 }
0x2410   : > { %v2342_v15 = vpop.permute.xlu1 %2341 }
0x2411   : > { %3365 = vmatmul.msk.f32.vlgmr.msra.gmra.mxu1 %vm134_vm11, %v2342_v15 }
0x2412   : > { %2773 = vmatpush.msra.mxu1 %v3823_v8 }
0x2414   : > { %2774 = vmatpush.msra.mxu1 %v3821_v7 }
0x2416   : > { %2775 = vmatpush.msra.mxu1 %v3819_v6 }
0x2418   : > { %2776 = vmatpush.msra.mxu1 %v3817_v5 }
0x2419   : > { %3373 = vmatmul.msk.f32.vlgmr.msrb.gmra.mxu1 %vm134_vm11, %v2436_v29 }
0x241a   : > { %3001 = vmatpush.msrb.mxu1 %v3831_v12 }
0x241c   : > { %3002 = vmatpush.msrb.mxu1 %v3829_v11 }
0x241e   : > { %3003 = vmatpush.msrb.mxu1 %v3827_v10 }
0x2420   : > { %3004 = vmatpush.msrb.mxu1 %v3825_v9 }
0x2484   : > { %v2456_v43 = vpop.f32.mrf.mxu3 }
0x248e   : > { %v2362_v17 = vpop.f32.mrf.mxu1 }
0x248f   : > { %v2457_v32 = vadd.f32 %v2456_v43, %v2362_v17  ;;  %v2575_v17 = vrot.slane %v4534_v58, 7 }
0x2491   : > { %v2459_v41 = vadd.f32 %v2457_v32, %v3833_v13 }
0x2493   : > { %v2460_v39 = vmul.f32 2.0, %v2459_v41 }
0x2495   : > { %v2461_v42 = vsel %vm3871_vm6, %v2460_v39, %v2459_v41 }
0x2496   : > { %v3370_v35 = vmul.f32 -1.442695, %v2461_v42  ;;  %v2543_v40 = vpop.f32.mrf.mxu1 }
0x2497   : > { %v2547_v47 = vrot.slane %v2543_v40, 4 }
0x2498   : > { %3639 = vpow2.f32 %v3370_v35 }
0x2499   : > { %v2549_v26 = vadd.f32 %v2547_v47, %v4398_v16 }
0x249b   : > { %v2550_v44 = vmul.f32 2.0, %v2549_v26 }
0x249d   : > { %v2551_v18 = vsel %vm3871_vm6, %v2550_v44, %v2549_v26 }
0x249e   : > { %v3640_v37 = vpop.eup %3639  ;;  %v3374_v34 = vmul.f32 -1.442695, %v2551_v18 }
0x249f   : > { %v2465_v45 = vadd.f32 1.0, %v3640_v37 }
0x24a0   : > { %3641 = vpow2.f32 %v3374_v34 }
0x24a1   : > { %3643 = vrcp.f32 %v2465_v45  ;;  %v2477_v14 = vand.u32 2147483648, %v2465_v45  ;;  %v2475_v0 = vand.u32 2147483647, %v2465_v45  ;;  %vm2471_vm4 = vweird.f32 %v2465_v45 }
0x24a3   : > { %v2478_v55 = vor.u32 1.1754944e-38, %v2477_v14  ;;  %vm2476_vm3 = vcmp.eq.f32.partialorder %v2475_v0, 8.507059e+37 }
0x24a6   : > { %v3642_v22 = vpop.eup %3641 }
0x24a7   : > { %v3644_v46 = vpop.eup %3643  ;;  %v2555_v49 = vadd.f32 1.0, %v3642_v22 }
0x24a8   : > { %v2467_v50 = vmul.f32 %v3644_v46, %v2465_v45  ;;  %vm2472_vm15 = vweird.f32 %v3644_v46 }
0x24a9   : > { %3645 = vrcp.f32 %v2555_v49  ;;  %vm2473_vm5 = vmor %vm2471_vm4, %vm2472_vm15  ;;  %v2567_v30 = vand.u32 2147483648, %v2555_v49  ;;  %v2565_v62 = vand.u32 2147483647, %v2555_v49  ;;  %vm2561_vm8 = vweird.f32 %v2555_v49 }
0x24aa   : > { %v2468_v36 = vsub.f32 1.0, %v2467_v50 }
0x24ab   : > { %v2568_v54 = vor.u32 1.1754944e-38, %v2567_v30  ;;  %vm2566_vm10 = vcmp.eq.f32.partialorder %v2565_v62, 8.507059e+37 }
0x24ac   : > { %v2469_v63 = vmul.f32 %v3644_v46, %v2468_v36 }
0x24ae   : > { %v2470_v24 = vadd.f32 %v3644_v46, %v2469_v63 }
0x24af   : > { %v3646_v23 = vpop.eup %3645 }
0x24b0   : > { %v2474_v56 = vsel %vm2473_vm5, %v3644_v46, %v2470_v24  ;;  %v2557_v48 = vmul.f32 %v3646_v23, %v2555_v49  ;;  %vm2562_vm7 = vweird.f32 %v3646_v23 }
0x24b1   : > { %v2479_v20 = vsel %vm2476_vm3, %v2478_v55, %v2474_v56  ;;  %vm2563_vm9 = vmor %vm2561_vm8, %vm2562_vm7 }
0x24b2   : > { %v2481_v57 = vmul.f32 2.0, %v2479_v20  ;;  %v2558_v21 = vsub.f32 1.0, %v2557_v48 }
0x24b4   : > { %v3371_v59 = vadd.f32 -1.0, %v2481_v57  ;;  %v2559_v60 = vmul.f32 %v3646_v23, %v2558_v21 }
0x24b6   : > { %v2483_v33 = vsel %vm3871_vm6, %v3371_v59, %v2479_v20  ;;  %v2560_v52 = vadd.f32 %v3646_v23, %v2559_v60 }
0x24b7   : > { %2486 = vrot.lane.b32.xlu1 %v2483_v33, %s3769_s23  ;;  %v2484_v35 = vmul.f32 %v2483_v33, %v4539_v25 }
0x24b8   : > { %v2564_v31 = vsel %vm2563_vm9, %v3646_v23, %v2560_v52 }
0x24b9   : > { %v2569_v51 = vsel %vm2566_vm10, %v2568_v54, %v2564_v31 }
0x24ba   : > { %v2571_v19 = vmul.f32 2.0, %v2569_v51 }
0x24bc   : > { %v3375_v27 = vadd.f32 -1.0, %v2571_v19 }
0x24be   : > { %v2573_v53 = vsel %vm3871_vm6, %v3375_v27, %v2569_v51 }
0x24bf   : > { %2579 = vrot.lane.b32.xlu0 %v2573_v53, %s3769_s23  ;;  %v2577_v32 = vmul.f32 %v2575_v17, %v2573_v53 }
0x2529   : > { %v2487_v28 = vpop.permute.xlu1 %2486 }
0x252a   : > { %v2489_v29 = vmul.f32 %v2487_v28, %v2483_v33 }
0x252c   : > { %2491 = vrot.lane.b32.xlu0 %v2489_v29, %s3770_s24 }
0x2531   : > { %v2580_v15 = vpop.permute.xlu0 %2579 }
0x2532   : > { %v2582_v43 = vmul.f32 %v2580_v15, %v2573_v53 }
0x2534   : > { %2584 = vrot.lane.b32.xlu2 %v2582_v43, %s3770_s24 }
0x258e   : > { %v2585_v41 = vpop.permute.xlu2 %2584 }
0x258f   : > { %v4579_v39 = vadd.f32 %v2585_v41, %v2577_v32 }
0x2591   : > { %3647 = vtanh.f32 %v4579_v39 }
0x2597   : > { %v3648_v42 = vpop.eup %3647 }
0x2598   : > { %2590 = vrot.lane.b32.xlu1 %v3648_v42, %s3769_s23 }
0x259e   : > { %v2492_v40 = vpop.permute.xlu0 %2491 }
0x259f   : > { %v4584_v47 = vadd.f32 %v2492_v40, %v2484_v35 }
0x25a1   : > { %3649 = vtanh.f32 %v4584_v47 }
0x25a7   : > { %v3650_v26 = vpop.eup %3649 }
0x25a8   : > { %2497 = vrot.lane.b32.xlu2 %v3650_v26, %s3769_s23 }
0x2602   : > { %v2498_v58 = vpop.permute.xlu2 %2497 }
0x2603   : > { %v2500_v44 = vmul.f32 %v2498_v58, %v2483_v33 }
0x2605   : > { %v3149_v18 = vrot.slane %v2500_v44, 5  ;;  %2502 = vrot.lane.b32.xlu1 %v2500_v44, %s3770_s24 }
0x2607   : > { %v4590_v37 = vsel %vm3164_vm12, %v4546_v61, %v3149_v18 }
0x260a   : > { %v2591_v34 = vpop.permute.xlu1 %2590 }
0x260b   : > { %v2593_v45 = vmul.f32 %v2591_v34, %v2573_v53 }
0x260d   : > { %v2595_v25 = vrot.slane %v2593_v45, 4 }
0x260f   : > { %2596 = vrot.lane.b32.xlu0 %v2595_v25, %s3770_s24 }
0x2677   : > { %v2503_v22 = vpop.permute.xlu1 %2502 }
0x2678   : > { %3372 = vmatmul.msk.f32.vlgmr.msrb.gmra.mxu0 %vm134_vm11, %v2503_v22 }
0x2679   : > { %2934 = vmatpush.msrb.mxu0 %v3823_v8 }
0x267b   : > { %2935 = vmatpush.msrb.mxu0 %v3821_v7 }
0x267d   : > { %2936 = vmatpush.msrb.mxu0 %v3819_v6 }
0x267f   : > { %2937 = vmatpush.msrb.mxu0 %v3817_v5 }
0x2681   : > { %v2597_v46 = vpop.permute.xlu0 %2596 }
0x2682   : > { %3376 = vmatmul.msk.f32.vlgmr.msrb.gmra.mxu2 %vm134_vm11, %v2597_v46  ;;  %3380 = vmatmul.msk.f32.vlgmr.msra.gmra.mxu0 %vm134_vm11, %v2597_v46 }
0x2683   : > { %3021 = vmatpush.msrb.mxu2 %v3815_v4 }
0x2685   : > { %3022 = vmatpush.msrb.mxu2 %v3813_v3 }
0x2687   : > { %3023 = vmatpush.msrb.mxu2 %v3811_v2 }
0x2689   : > { %3024 = vmatpush.msrb.mxu2 %v3809_v1  ;;  %v3694_v1 = vld [vmem:[#allocation4 + $0x120] ss:$0 sm:$0xff] (%p1846_p0) }
0x26f5   : > { %v2523_v61 = vpop.f32.mrf.mxu0 }
0x26ff   : > { %v2704_v49 = vpop.f32.mrf.mxu0 }
0x2700   : > { %v2708_v50 = vrot.slane %v2704_v49, 3 }
0x2702   : > { %v2710_v36 = vadd.f32 %v2708_v50, %v4398_v16 }
0x2704   : > { %v2711_v14 = vmul.f32 2.0, %v2710_v36 }
0x2705   : > { %v2617_v63 = vpop.f32.mrf.mxu2 }
0x2706   : > { %v2712_v0 = vsel %vm3871_vm6, %v2711_v14, %v2710_v36  ;;  %v2618_v24 = vadd.f32 %v2617_v63, %v2523_v61  ;;  %v2736_v61 = vrot.slane %v4579_v39, 7 }
0x2707   : > { %v3381_v23 = vmul.f32 -1.442695, %v2712_v0 }
0x2708   : > { %v2620_v55 = vadd.f32 %v2618_v24, %v3833_v13 }
0x2709   : > { %3651 = vpow2.f32 %v3381_v23 }
0x270a   : > { %v2621_v56 = vmul.f32 2.0, %v2620_v55 }
0x270c   : > { %v2622_v48 = vsel %vm3871_vm6, %v2621_v56, %v2620_v55 }
0x270d   : > { %v3377_v20 = vmul.f32 -1.442695, %v2622_v48 }
0x270f   : > { %v3652_v57 = vpop.eup %3651  ;;  %3653 = vpow2.f32 %v3377_v20 }
0x2710   : > { %v2716_v21 = vadd.f32 1.0, %v3652_v57 }
0x2712   : > { %3655 = vrcp.f32 %v2716_v21  ;;  %v2728_v33 = vand.u32 2147483648, %v2716_v21  ;;  %v2726_v54 = vand.u32 2147483647, %v2716_v21  ;;  %vm2722_vm14 = vweird.f32 %v2716_v21 }
0x2714   : > { %v2729_v27 = vor.u32 1.1754944e-38, %v2728_v33  ;;  %vm2727_vm4 = vcmp.eq.f32.partialorder %v2726_v54, 8.507059e+37 }
0x2715   : > { %v3654_v16 = vpop.eup %3653 }
0x2716   : > { %v2626_v30 = vadd.f32 1.0, %v3654_v16 }
0x2718   : > { %v3656_v59 = vpop.eup %3655  ;;  %3657 = vrcp.f32 %v2626_v30  ;;  %v2638_v15 = vand.u32 2147483648, %v2626_v30  ;;  %v2636_v32 = vand.u32 2147483647, %v2626_v30  ;;  %vm2632_vm3 = vweird.f32 %v2626_v30 }
0x2719   : > { %v2718_v60 = vmul.f32 %v3656_v59, %v2716_v21  ;;  %vm2723_vm13 = vweird.f32 %v3656_v59 }
0x271a   : > { %vm2724_vm15 = vmor %vm2722_vm14, %vm2723_vm13  ;;  %v2639_v35 = vor.u32 1.1754944e-38, %v2638_v15  ;;  %vm2637_vm8 = vcmp.eq.f32.partialorder %v2636_v32, 8.507059e+37 }
0x271b   : > { %v2719_v62 = vsub.f32 1.0, %v2718_v60 }
0x271d   : > { %v2720_v52 = vmul.f32 %v3656_v59, %v2719_v62 }
0x271e   : > { %v3658_v31 = vpop.eup %3657 }
0x271f   : > { %v2721_v51 = vadd.f32 %v3656_v59, %v2720_v52  ;;  %v2628_v19 = vmul.f32 %v3658_v31, %v2626_v30  ;;  %vm2633_vm5 = vweird.f32 %v3658_v31 }
0x2720   : > { %vm2634_vm7 = vmor %vm2632_vm3, %vm2633_vm5  ;;  %vm3167_vm3 = vcmask 1044480  }
0x2721   : > { %v2725_v53 = vsel %vm2724_vm15, %v3656_v59, %v2721_v51  ;;  %v2629_v28 = vsub.f32 1.0, %v2628_v19  ;;  %v4645_v51 = vld [vmem:[%s4395_s22] sm:$0xff] }
0x2722   : > { %v2730_v29 = vsel %vm2727_vm4, %v2729_v27, %v2725_v53 }
0x2723   : > { %v2732_v43 = vmul.f32 2.0, %v2730_v29  ;;  %v2630_v17 = vmul.f32 %v3658_v31, %v2629_v28 }
0x2725   : > { %v3382_v41 = vadd.f32 -1.0, %v2732_v43  ;;  %v2631_v42 = vadd.f32 %v3658_v31, %v2630_v17 }
0x2727   : > { %v2734_v40 = vsel %vm3871_vm6, %v3382_v41, %v2730_v29  ;;  %v2635_v26 = vsel %vm2634_vm7, %v3658_v31, %v2631_v42 }
0x2728   : > { %2740 = vrot.lane.b32.xlu0 %v2734_v40, %s3769_s23  ;;  %v2640_v58 = vsel %vm2637_vm8, %v2639_v35, %v2635_v26  ;;  %v2738_v49 = vmul.f32 %v2736_v61, %v2734_v40 }
0x2729   : > { %v2642_v44 = vmul.f32 2.0, %v2640_v58 }
0x272b   : > { %v3378_v18 = vadd.f32 -1.0, %v2642_v44 }
0x272d   : > { %v2644_v34 = vsel %vm3871_vm6, %v3378_v18, %v2640_v58 }
0x272e   : > { %2647 = vrot.lane.b32.xlu2 %v2644_v34, %s3769_s23  ;;  %v2645_v14 = vmul.f32 %v2644_v34, %v4584_v47 }
0x2788   : > { %v2648_v45 = vpop.permute.xlu2 %2647 }
0x2789   : > { %v2650_v25 = vmul.f32 %v2648_v45, %v2644_v34 }
0x278b   : > { %2652 = vrot.lane.b32.xlu1 %v2650_v25, %s3770_s24 }
0x279a   : > { %v2741_v22 = vpop.permute.xlu0 %2740 }
0x279b   : > { %v2743_v46 = vmul.f32 %v2741_v22, %v2734_v40 }
0x279d   : > { %2745 = vrot.lane.b32.xlu2 %v2743_v46, %s3770_s24 }
0x27f7   : > { %v2746_v50 = vpop.permute.xlu2 %2745 }
0x27f8   : > { %v4619_v36 = vadd.f32 %v2746_v50, %v2738_v49 }
0x27fa   : > { %3659 = vtanh.f32 %v4619_v36 }
0x27fd   : > { %v2653_v63 = vpop.permute.xlu1 %2652 }
0x27fe   : > { %v4623_v0 = vadd.f32 %v2653_v63, %v2645_v14 }
0x2800   : > { %v3660_v24 = vpop.eup %3659  ;;  %3661 = vtanh.f32 %v4623_v0 }
0x2801   : > { %2751 = vrot.lane.b32.xlu1 %v3660_v24, %s3769_s23 }
0x2806   : > { %v3662_v23 = vpop.eup %3661 }
0x2807   : > { %2658 = vrot.lane.b32.xlu0 %v3662_v23, %s3769_s23 }
0x2873   : > { %v2752_v39 = vpop.permute.xlu1 %2751 }
0x2874   : > { %v2754_v55 = vmul.f32 %v2752_v39, %v2734_v40 }
0x2876   : > { %v2756_v56 = vrot.slane %v2754_v55, 5 }
0x2878   : > { %2757 = vrot.lane.b32.xlu0 %v2756_v56, %s3770_s24 }
0x2879   : > { %v2659_v48 = vpop.permute.xlu0 %2658 }
0x287a   : > { %v2661_v20 = vmul.f32 %v2659_v48, %v2644_v34 }
0x287c   : > { %v3151_v57 = vrot.slane %v2661_v20, 4  ;;  %2663 = vrot.lane.b32.xlu2 %v2661_v20, %s3770_s24 }
0x287e   : > { %v4632_v47 = vsel %vm70_vm1, %v4590_v37, %v3151_v57 }
0x28d6   : > { %v2664_v21 = vpop.permute.xlu2 %2663 }
0x28d7   : > { %3379 = vmatmul.msk.f32.vlgmr.msrb.gmra.mxu3 %vm134_vm11, %v2664_v21 }
0x28d8   : > { %3095 = vmatpush.msrb.mxu3 %v3823_v8 }
0x28da   : > { %3096 = vmatpush.msrb.mxu3 %v3821_v7 }
0x28dc   : > { %3097 = vmatpush.msrb.mxu3 %v3819_v6 }
0x28de   : > { %3098 = vmatpush.msrb.mxu3 %v3817_v5 }
0x28ea   : > { %v2758_v16 = vpop.permute.xlu0 %2757 }
0x28eb   : > { %3383 = vmatmul.msk.f32.vlgmr.msra.gmra.mxu1 %vm134_vm11, %v2758_v16  ;;  %3387 = vmatmul.msk.f32.vlgmr.msra.gmra.mxu3 %vm134_vm11, %v2758_v16 }
0x295a   : > { %v2684_v30 = vpop.f32.mrf.mxu3 }
0x2968   : > { %v2778_v37 = vpop.f32.mrf.mxu1 }
0x2969   : > { %v2779_v59 = vadd.f32 %v2778_v37, %v2684_v30  ;;  %v2897_v37 = vrot.slane %v4619_v36, 7 }
0x296b   : > { %v2781_v60 = vadd.f32 %v2779_v59, %v3833_v13 }
0x296d   : > { %v2782_v62 = vmul.f32 2.0, %v2781_v60 }
0x296e   : > { %v2865_v33 = vpop.f32.mrf.mxu3 }
0x296f   : > { %v2783_v52 = vsel %vm3871_vm6, %v2782_v62, %v2781_v60  ;;  %v2869_v54 = vrot.slane %v2865_v33, 2 }
0x2970   : > { %v3384_v31 = vmul.f32 -1.442695, %v2783_v52 }
0x2971   : > { %v2871_v19 = vadd.f32 %v4645_v51, %v2869_v54 }
0x2972   : > { %3663 = vpow2.f32 %v3384_v31 }
0x2973   : > { %v2872_v27 = vmul.f32 2.0, %v2871_v19 }
0x2975   : > { %v2873_v53 = vsel %vm3871_vm6, %v2872_v27, %v2871_v19 }
0x2976   : > { %v3388_v28 = vmul.f32 -1.442695, %v2873_v53 }
0x2978   : > { %v3664_v29 = vpop.eup %3663  ;;  %3665 = vpow2.f32 %v3388_v28 }
0x2979   : > { %v2787_v15 = vadd.f32 1.0, %v3664_v29 }
0x297b   : > { %3667 = vrcp.f32 %v2787_v15  ;;  %v2799_v35 = vand.u32 2147483648, %v2787_v15  ;;  %v2797_v26 = vand.u32 2147483647, %v2787_v15  ;;  %vm2793_vm10 = vweird.f32 %v2787_v15 }
0x297d   : > { %v2800_v34 = vor.u32 1.1754944e-38, %v2799_v35  ;;  %vm2798_vm13 = vcmp.eq.f32.partialorder %v2797_v26, 8.507059e+37 }
0x297e   : > { %v3666_v43 = vpop.eup %3665 }
0x297f   : > { %v2877_v17 = vadd.f32 1.0, %v3666_v43 }
0x2981   : > { %v3668_v32 = vpop.eup %3667  ;;  %3669 = vrcp.f32 %v2877_v17  ;;  %v2889_v46 = vand.u32 2147483648, %v2877_v17  ;;  %v2887_v50 = vand.u32 2147483647, %v2877_v17  ;;  %vm2883_vm15 = vweird.f32 %v2877_v17 }
0x2982   : > { %v2789_v41 = vmul.f32 %v3668_v32, %v2787_v15  ;;  %vm2794_vm9 = vweird.f32 %v3668_v32 }
0x2983   : > { %vm2795_vm12 = vmor %vm2793_vm10, %vm2794_vm9  ;;  %v2890_v24 = vor.u32 1.1754944e-38, %v2889_v46  ;;  %vm2888_vm5 = vcmp.eq.f32.partialorder %v2887_v50, 8.507059e+37 }
0x2984   : > { %v2790_v42 = vsub.f32 1.0, %v2789_v41 }
0x2986   : > { %v2791_v40 = vmul.f32 %v3668_v32, %v2790_v42 }
0x2987   : > { %v3670_v58 = vpop.eup %3669 }
0x2988   : > { %v2792_v44 = vadd.f32 %v3668_v32, %v2791_v40  ;;  %v2879_v18 = vmul.f32 %v3670_v58, %v2877_v17  ;;  %vm2884_vm14 = vweird.f32 %v3670_v58 }
0x2989   : > { %vm2885_vm4 = vmor %vm2883_vm15, %vm2884_vm14 }
0x298a   : > { %v2796_v45 = vsel %vm2795_vm12, %v3668_v32, %v2792_v44  ;;  %v2880_v25 = vsub.f32 1.0, %v2879_v18 }
0x298b   : > { %v2801_v22 = vsel %vm2798_vm13, %v2800_v34, %v2796_v45 }
0x298c   : > { %v2803_v61 = vmul.f32 2.0, %v2801_v22  ;;  %v2881_v49 = vmul.f32 %v3670_v58, %v2880_v25 }
0x298e   : > { %v3385_v14 = vadd.f32 -1.0, %v2803_v61  ;;  %v2882_v63 = vadd.f32 %v3670_v58, %v2881_v49 }
0x2990   : > { %v2805_v23 = vsel %vm3871_vm6, %v3385_v14, %v2801_v22  ;;  %v2886_v39 = vsel %vm2885_vm4, %v3670_v58, %v2882_v63  ;;  %vm3169_vm4 = vcmask 1045504  }
0x2991   : > { %2808 = vrot.lane.b32.xlu1 %v2805_v23, %s3769_s23  ;;  %v2891_v55 = vsel %vm2888_vm5, %v2890_v24, %v2886_v39  ;;  %v2806_v52 = vmul.f32 %v2805_v23, %v4623_v0 }
0x2992   : > { %v2893_v56 = vmul.f32 2.0, %v2891_v55 }
0x2994   : > { %v3389_v48 = vadd.f32 -1.0, %v2893_v56 }
0x2996   : > { %v2895_v20 = vsel %vm3871_vm6, %v3389_v48, %v2891_v55 }
0x2997   : > { %2901 = vrot.lane.b32.xlu2 %v2895_v20, %s3769_s23  ;;  %v2899_v59 = vmul.f32 %v2897_v37, %v2895_v20 }
0x29f1   : > { %v2902_v57 = vpop.permute.xlu2 %2901 }
0x29f2   : > { %v2904_v21 = vmul.f32 %v2902_v57, %v2895_v20 }
0x29f4   : > { %2906 = vrot.lane.b32.xlu1 %v2904_v21, %s3770_s24 }
0x2a03   : > { %v2809_v16 = vpop.permute.xlu1 %2808 }
0x2a04   : > { %v2811_v30 = vmul.f32 %v2809_v16, %v2805_v23 }
0x2a06   : > { %2813 = vrot.lane.b32.xlu0 %v2811_v30, %s3770_s24 }
0x2a66   : > { %v2907_v60 = vpop.permute.xlu1 %2906 }
0x2a67   : > { %v4659_v62 = vadd.f32 %v2907_v60, %v2899_v59 }
0x2a69   : > { %3671 = vtanh.f32 %v4659_v62 }
0x2a6f   : > { %v3672_v33 = vpop.eup %3671 }
0x2a70   : > { %2912 = vrot.lane.b32.xlu0 %v3672_v33, %s3769_s23 }
0x2a78   : > { %v2814_v54 = vpop.permute.xlu0 %2813 }
0x2a79   : > { %v4664_v31 = vadd.f32 %v2814_v54, %v2806_v52 }
0x2a7b   : > { %3673 = vtanh.f32 %v4664_v31 }
0x2a81   : > { %v3674_v19 = vpop.eup %3673 }
0x2a82   : > { %2819 = vrot.lane.b32.xlu2 %v3674_v19, %s3769_s23 }
0x2adc   : > { %v2820_v36 = vpop.permute.xlu2 %2819 }
0x2add   : > { %v2822_v27 = vmul.f32 %v2820_v36, %v2805_v23 }
0x2adf   : > { %v3153_v53 = vrot.slane %v2822_v27, 3  ;;  %2824 = vrot.lane.b32.xlu1 %v2822_v27, %s3770_s24 }
0x2ae1   : > { %v4670_v28 = vsel %vm3167_vm3, %v4632_v47, %v3153_v53 }
0x2ae2   : > { %v2913_v29 = vpop.permute.xlu0 %2912 }
0x2ae3   : > { %v2915_v15 = vmul.f32 %v2913_v29, %v2895_v20 }
0x2ae5   : > { %v2917_v0 = vrot.slane %v2915_v15, 6 }
0x2ae7   : > { %2918 = vrot.lane.b32.xlu2 %v2917_v0, %s3770_s24 }
0x2b41   : > { %v2919_v43 = vpop.permute.xlu2 %2918 }
0x2b42   : > { %3390 = vmatmul.msk.f32.vlgmr.msrb.gmra.mxu0 %vm134_vm11, %v2919_v43 }
0x2b51   : > { %v2825_v17 = vpop.permute.xlu1 %2824 }
0x2b52   : > { %3386 = vmatmul.msk.f32.vlgmr.msra.gmra.mxu2 %vm134_vm11, %v2825_v17 }
0x2b5a   : > { %3394 = vmatmul.msk.f32.vlgmr.msrb.gmra.mxu2 %vm134_vm11, %v2919_v43 }
0x2bbf   : > { %v2939_v32 = vpop.f32.mrf.mxu0 }
0x2bd5   : > { %v2845_v41 = vpop.f32.mrf.mxu2 }
0x2bd6   : > { %v2940_v42 = vadd.f32 %v2939_v32, %v2845_v41  ;;  %v3058_v32 = vrot.slane %v4659_v62, 7 }
0x2bd8   : > { %v2942_v35 = vadd.f32 %v2940_v42, %v3833_v13 }
0x2bda   : > { %v2943_v47 = vmul.f32 2.0, %v2942_v35 }
0x2bdc   : > { %v2944_v40 = vsel %vm3871_vm6, %v2943_v47, %v2942_v35 }
0x2bdd   : > { %v3391_v26 = vmul.f32 -1.442695, %v2944_v40  ;;  %v3026_v58 = vpop.f32.mrf.mxu2 }
0x2bde   : > { %v3030_v44 = vrot.slane %v3026_v58, 1 }
0x2bdf   : > { %3675 = vpow2.f32 %v3391_v26 }
0x2be0   : > { %v3032_v18 = vadd.f32 %v4645_v51, %v3030_v44 }
0x2be2   : > { %v3033_v34 = vmul.f32 2.0, %v3032_v18 }
0x2be4   : > { %v3034_v45 = vsel %vm3871_vm6, %v3033_v34, %v3032_v18 }
0x2be5   : > { %v3676_v25 = vpop.eup %3675  ;;  %v3395_v22 = vmul.f32 -1.442695, %v3034_v45 }
0x2be6   : > { %v2948_v46 = vadd.f32 1.0, %v3676_v25 }
0x2be7   : > { %3677 = vpow2.f32 %v3395_v22 }
0x2be8   : > { %3679 = vrcp.f32 %v2948_v46  ;;  %v2960_v24 = vand.u32 2147483648, %v2948_v46  ;;  %v2958_v39 = vand.u32 2147483647, %v2948_v46  ;;  %vm2954_vm8 = vweird.f32 %v2948_v46 }
0x2bea   : > { %v2961_v56 = vor.u32 1.1754944e-38, %v2960_v24  ;;  %vm2959_vm10 = vcmp.eq.f32.partialorder %v2958_v39, 8.507059e+37 }
0x2bed   : > { %v3678_v61 = vpop.eup %3677 }
0x2bee   : > { %v3680_v49 = vpop.eup %3679  ;;  %v3038_v50 = vadd.f32 1.0, %v3678_v61 }
0x2bef   : > { %v2950_v14 = vmul.f32 %v3680_v49, %v2948_v46  ;;  %vm2955_vm7 = vweird.f32 %v3680_v49 }
0x2bf0   : > { %3681 = vrcp.f32 %v3038_v50  ;;  %vm2956_vm9 = vmor %vm2954_vm8, %vm2955_vm7  ;;  %v3050_v30 = vand.u32 2147483648, %v3038_v50  ;;  %v3048_v60 = vand.u32 2147483647, %v3038_v50  ;;  %vm3044_vm13 = vweird.f32 %v3038_v50 }
0x2bf1   : > { %v2951_v63 = vsub.f32 1.0, %v2950_v14 }
0x2bf2   : > { %v3051_v54 = vor.u32 1.1754944e-38, %v3050_v30  ;;  %vm3049_vm15 = vcmp.eq.f32.partialorder %v3048_v60, 8.507059e+37 }
0x2bf3   : > { %v2952_v23 = vmul.f32 %v3680_v49, %v2951_v63 }
0x2bf5   : > { %v2953_v51 = vadd.f32 %v3680_v49, %v2952_v23 }
0x2bf6   : > { %v3682_v55 = vpop.eup %3681 }
0x2bf7   : > { %v2957_v48 = vsel %vm2956_vm9, %v3680_v49, %v2953_v51  ;;  %v3040_v20 = vmul.f32 %v3682_v55, %v3038_v50  ;;  %vm3045_vm12 = vweird.f32 %v3682_v55 }
0x2bf8   : > { %v2962_v57 = vsel %vm2959_vm10, %v2961_v56, %v2957_v48  ;;  %vm3046_vm14 = vmor %vm3044_vm13, %vm3045_vm12 }
0x2bf9   : > { %v2964_v21 = vmul.f32 2.0, %v2962_v57  ;;  %v3041_v16 = vsub.f32 1.0, %v3040_v20 }
0x2bfb   : > { %v3392_v37 = vadd.f32 -1.0, %v2964_v21  ;;  %v3042_v59 = vmul.f32 %v3682_v55, %v3041_v16 }
0x2bfd   : > { %v2966_v33 = vsel %vm3871_vm6, %v3392_v37, %v2962_v57  ;;  %v3043_v52 = vadd.f32 %v3682_v55, %v3042_v59 }
0x2bfe   : > { %2969 = vrot.lane.b32.xlu1 %v2966_v33, %s3769_s23  ;;  %v2967_v40 = vmul.f32 %v2966_v33, %v4664_v31 }
0x2bff   : > { %v3047_v19 = vsel %vm3046_vm14, %v3682_v55, %v3043_v52 }
0x2c00   : > { %v3052_v36 = vsel %vm3049_vm15, %v3051_v54, %v3047_v19 }
0x2c01   : > { %v3054_v27 = vmul.f32 2.0, %v3052_v36 }
0x2c03   : > { %v3396_v53 = vadd.f32 -1.0, %v3054_v27 }
0x2c05   : > { %v3056_v29 = vsel %vm3871_vm6, %v3396_v53, %v3052_v36 }
0x2c06   : > { %3062 = vrot.lane.b32.xlu0 %v3056_v29, %s3769_s23  ;;  %v3060_v41 = vmul.f32 %v3058_v32, %v3056_v29  ;;  %v3187_v32 = vld [vmem:[#allocation4 + $0x118] sm:$0xff] (%p1846_p0) }
0x2c07   :  { %3404 = vmatpush.msra.mxu2 (%p1846_p0), %v3187_v32  ;;  %3214 = vmatpush.msra.mxu0 (%p1846_p0), %v3187_v32 }
0x2c08   :  { %3403 = vmatpush.msra.mxu1 (%p1846_p0), %v3187_v32 }
0x2c70   : > { %v2970_v15 = vpop.permute.xlu1 %2969 }
0x2c71   : > { %v2972_v0 = vmul.f32 %v2970_v15, %v2966_v33 }
0x2c73   : > { %2974 = vrot.lane.b32.xlu0 %v2972_v0, %s3770_s24 }
0x2c78   : > { %v3063_v43 = vpop.permute.xlu0 %3062 }
0x2c79   : > { %v3065_v17 = vmul.f32 %v3063_v43, %v3056_v29 }
0x2c7b   : > { %3067 = vrot.lane.b32.xlu2 %v3065_v17, %s3770_s24 }
0x2cd5   : > { %v3068_v42 = vpop.permute.xlu2 %3067 }
0x2cd6   : > { %v3070_v35 = vadd.f32 %v3068_v42, %v3060_v41  ;;  %v3186_v41 = vld [vmem:[#allocation4 + $0x110] sm:$0xff] (%p1846_p0)  ;;  %v3185_v42 = vld [vmem:[#allocation4 + $0x108] sm:$0xff] (%p1846_p0) }
0x2cd7   :  { %3406 = vmatpush.msra.mxu2 (%p1846_p0), %v3186_v41  ;;  %3215 = vmatpush.msra.mxu0 (%p1846_p0), %v3186_v41 }
0x2cd8   : > { %3683 = vtanh.f32 %v3070_v35  ;;  %v3180_v36 = vrot.slane %v3070_v35, 7  ;;  %v3184_v35 = vld [vmem:[#allocation4 + $0x100] sm:$0xff] (%p1846_p0)  ;;  %3405 = vmatpush.msra.mxu1 (%p1846_p0), %v3186_v41 }
0x2cd9   :  { %3408 = vmatpush.msra.mxu2 (%p1846_p0), %v3185_v42  ;;  %3216 = vmatpush.msra.mxu0 (%p1846_p0), %v3185_v42 }
0x2cda   :  { %3407 = vmatpush.msra.mxu1 (%p1846_p0), %v3185_v42 }
0x2cdb   :  { %3410 = vmatpush.msra.mxu2 (%p1846_p0), %v3184_v35  ;;  %3217 = vmatpush.msra.mxu0 (%p1846_p0), %v3184_v35 }
0x2cdc   :  { %3409 = vmatpush.msra.mxu1 (%p1846_p0), %v3184_v35 }
0x2cde   : > { %v3684_v47 = vpop.eup %3683 }
0x2cdf   : > { %3073 = vrot.lane.b32.xlu1 %v3684_v47, %s3769_s23 }
0x2ce5   : > { %v2975_v26 = vpop.permute.xlu0 %2974 }
0x2ce6   : > { %v2977_v58 = vadd.f32 %v2975_v26, %v2967_v40 }
0x2ce8   : > { %3685 = vtanh.f32 %v2977_v58 }
0x2cee   : > { %v3686_v44 = vpop.eup %3685 }
0x2cef   : > { %2980 = vrot.lane.b32.xlu2 %v3686_v44, %s3769_s23 }
0x2d49   : > { %v2981_v18 = vpop.permute.xlu2 %2980 }
0x2d4a   : > { %v2983_v34 = vmul.f32 %v2981_v18, %v2966_v33 }
0x2d4c   : > { %v3155_v45 = vrot.slane %v2983_v34, 2  ;;  %2985 = vrot.lane.b32.xlu1 %v2983_v34, %s3770_s24 }
0x2d4e   : > { %v3170_v62 = vsel %vm3169_vm4, %v4670_v28, %v3155_v45 }
0x2d51   : > { %v3074_v25 = vpop.permute.xlu1 %3073 }
0x2d52   : > { %v3076_v22 = vmul.f32 %v3074_v25, %v3056_v29 }
0x2d54   : > { %v3078_v46 = vrot.slane %v3076_v22, 7 }
0x2d56   : > { %3079 = vrot.lane.b32.xlu0 %v3078_v46, %s3770_s24 }
0x2dbe   : > { %v2986_v31 = vpop.permute.xlu1 %2985 }
0x2dbf   : > { %3393 = vmatmul.msk.f32.vlgmr.msrb.gmra.mxu1 %vm134_vm11, %v2986_v31 }
0x2dc8   : > { %v3080_v16 = vpop.permute.xlu0 %3079  }
0x2dc9   : > { %3397 = vmatmul.msk.f32.vlgmr.msrb.gmra.mxu3 %vm134_vm11, %v3080_v16 }
0x2e3c   : > { %v3006_v61 = vpop.f32.mrf.mxu1 }
0x2e4c   : > { %v3100_v49 = vpop.f32.mrf.mxu3 }
0x2e4d   : > { %v3101_v50 = vadd.f32 %v3100_v49, %v3006_v61 }
0x2e4f   : > { %v3103_v14 = vadd.f32 %v3101_v50, %v3833_v13 }
0x2e51   : > { %v3104_v63 = vmul.f32 2.0, %v3103_v14 }
0x2e53   : > { %v3105_v28 = vsel %vm3871_vm6, %v3104_v63, %v3103_v14 }
0x2e54   : > { %v3398_v24 = vmul.f32 -1.442695, %v3105_v28 }
0x2e56   : > { %3687 = vpow2.f32 %v3398_v24 }
0x2e5c   : > { %v3688_v23 = vpop.eup %3687 }
0x2e5d   : > { %v3109_v39 = vadd.f32 1.0, %v3688_v23 }
0x2e5f   : > { %3689 = vrcp.f32 %v3109_v39  ;;  %v3121_v48 = vand.u32 2147483648, %v3109_v39  ;;  %v3119_v57 = vand.u32 2147483647, %v3109_v39  ;;  %vm3115_vm3 = vweird.f32 %v3109_v39 }
0x2e61   : > { %v3122_v30 = vor.u32 1.1754944e-38, %v3121_v48  ;;  %vm3120_vm8 = vcmp.eq.f32.partialorder %v3119_v57, 8.507059e+37 }
0x2e65   : > { %v3690_v51 = vpop.eup %3689 }
0x2e66   : > { %v3111_v55 = vmul.f32 %v3690_v51, %v3109_v39  ;;  %vm3116_vm5 = vweird.f32 %v3690_v51 }
0x2e67   : > { %vm3117_vm7 = vmor %vm3115_vm3, %vm3116_vm5 }
0x2e68   : > { %v3112_v56 = vsub.f32 1.0, %v3111_v55 }
0x2e6a   : > { %v3113_v20 = vmul.f32 %v3690_v51, %v3112_v56 }
0x2e6c   : > { %v3114_v21 = vadd.f32 %v3690_v51, %v3113_v20 }
0x2e6e   : > { %v3118_v37 = vsel %vm3117_vm7, %v3690_v51, %v3114_v21 }
0x2e6f   : > { %v3123_v59 = vsel %vm3120_vm8, %v3122_v30, %v3118_v37 }
0x2e70   : > { %v3125_v60 = vmul.f32 2.0, %v3123_v59 }
0x2e72   : > { %v3399_v33 = vadd.f32 -1.0, %v3125_v60 }
0x2e74   : > { %v3127_v52 = vsel %vm3871_vm6, %v3399_v33, %v3123_v59 }
0x2e75   : > { %3130 = vrot.lane.b32.xlu2 %v3127_v52, %s3769_s23  ;;  %v3128_v27 = vmul.f32 %v3127_v52, %v2977_v58 }
0x2ecf   : > { %v3131_v54 = vpop.permute.xlu2 %3130 }
0x2ed0   : > { %v3133_v19 = vmul.f32 %v3131_v54, %v3127_v52 }
0x2ed2   : > { %3135 = vrot.lane.b32.xlu0 %v3133_v19, %s3770_s24 }
0x2eda   : > { %3181 = vrot.lane.b32.xlu0 %v3180_v36, %s3771_s25 }
0x2f44   : > { %v3136_v53 = vpop.permute.xlu0 %3135 }
0x2f45   : > { %v3138_v40 = vadd.f32 %v3136_v53, %v3128_v27  }
0x2f47   : > { %3691 = vtanh.f32 %v3138_v40 }
0x2f4c   : > { %v3182_v53 = vpop.permute.xlu0 %3181  }
0x2f4d   : > { %v3692_v29 = vpop.eup %3691 }
0x2f4e   : > { %3141 = vrot.lane.b32.xlu1 %v3692_v29, %s3769_s23 }
0x2fc0   : > { %v3142_v15 = vpop.permute.xlu1 %3141 }
0x2fc1   : > { %v3144_v22 = vmul.f32 %v3142_v15, %v3127_v52  }
0x2fc3   : > { %v3158_v0 = vrot.slane %v3144_v22, 1 }
0x2fc5   : > { %v3171_v43 = vsel %vm104_vm2, %v3170_v62, %v3158_v0 }
0x2fc6   : > { %3173 = vrot.lane.b32.xlu2 %v3171_v43, %s3770_s24 }
0x301d   :  { %1848 = sbr.rel (!%p1846_p0) target bundleno = 6742 (0x1a56), region = 55 }
0x3020   : > { %v3174_v17 = vpop.permute.xlu2 %3173 }
0x3021   : > { %3177 = vst.msk [vmem:[%s3176_s26] sm:$0xff] %vm134_vm11, %v3174_v17 }
0x3028   :  { %v3191_v47 = vld [vmem:[#allocation3 + $0x10] sm:$0xff]  ;;  %v3189_v26 = vld [vmem:[#allocation3] sm:$0xff]  ;;  %v3190_v58 = vld [vmem:[#allocation3 + $0x8] sm:$0xff] }
0x3029   :  { %3402 = vmatmul.msk.f32.vlgmr.msra.gmra.mxu2 %vm134_vm11, %v3191_v47  ;;  %3400 = vmatmul.msk.f32.vlgmr.msra.gmra.mxu0 %vm134_vm11, %v3189_v26 }
0x302a   :  { %3401 = vmatmul.msk.f32.vlgmr.msra.gmra.mxu1 %vm134_vm11, %v3190_v58 }
0x30a6   :  { %v3219_v2 = vpop.f32.mrf.mxu0 }
0x30a7   :  { %v3222_v3 = vpop.f32.mrf.mxu1  ;;  %v3220_v4 = vadd.f32 %v3694_v1, %v3219_v2 }
0x30a8   :  { %v3223_v5 = vadd.f32 %v3694_v1, %v3222_v3 }
0x30a9   :  { %3228 = vst.msk [vmem:[%s4743_s5 + $0x8] sm:$0xff] %vm97_vm0, %v3220_v4 }
0x30aa   :  { %3229 = vst.msk [vmem:[%s4743_s5 + $0x10] sm:$0xff] %vm97_vm0, %v3223_v5 }
0x30ac   :  { %v3225_v6 = vpop.f32.mrf.mxu2 }
0x30ad   :  { %v3226_v7 = vadd.f32 %v3694_v1, %v3225_v6 }
0x30af   :  { %3230 = vst.msk [vmem:[%s4743_s5 + $0x18] sm:$0xff] %vm97_vm0, %v3226_v7 }
0x30b0   :  { %3235 = vsyncpa [#allocation5], 1 }

</bundles_post_ra>
